<compile_context>
chip_gen: v5e
topology: v5e:2x2
jax: 0.10.0
libtpu: 0.0.40
codegen_flags: <defaults>
</compile_context>

<pallas_src>
import jax
import jax.numpy as jnp
from jax.experimental import pallas as pl
from jax.experimental.pallas import tpu as pltpu

NEG_SLOPE = 0.01          # F.leaky_relu default negative_slope
H = W = 15
C_IN = 3
C_OUT = 6
KS = 3
OH = OW = H - KS + 1      # 13
FEAT = C_OUT * OH * OW    # 1014  (torch NCHW flatten order: (c_out, oh, ow))
FEAT_PAD = 1024           # lane-dense padding of the conv-feature dim
IN_FLAT = H * W * C_IN    # 675   (NHWC flatten order: (h, w, c_in))


def _leaky(x):
    return jnp.where(x > 0, x, NEG_SLOPE * x)


# ---------------------------------------------------------------------------
# Fused kernel: [conv-as-matmul + leaky] -> fc1 -> leaky -> fc2 -> leaky
#               -> fc3 -> softmax        (one grid step = TB samples)
#   x  : (TB, 675)      raw NHWC-flattened obs rows
#   wc : (675, 1024)    folded dense conv weight (bf16), cols 1014..1023 zero
#   bc : (1, 1024)      conv bias per flattened feature (zeros in padding)
#   w1 : (1024, 32) b1 : (1, 32)
#   w2 : (32, 32)   b2 : (1, 32)
#   w3 : (32, A)    b3 : (1, A)
#   out: (TB, A)        softmax probabilities
# ---------------------------------------------------------------------------
def ppo_actor_kernel(x_ref, wc_ref, bc_ref, w1_ref, b1_ref, w2_ref, b2_ref,
                     w3_ref, b3_ref, o_ref):
    # conv (dominant matmul): bf16 operands, f32 accumulation.
    x = x_ref[...].astype(jnp.bfloat16)                                # (TB, 675)
    h = jnp.dot(x, wc_ref[...], preferred_element_type=jnp.float32)    # (TB, 1024)
    h = _leaky(h + bc_ref[...])
    # fc1 / fc2 / fc3 are tiny (N<=32): keep them in f32.
    h = _leaky(jnp.dot(h, w1_ref[...],
                       preferred_element_type=jnp.float32) + b1_ref[...])   # (TB, 32)
    h = _leaky(jnp.dot(h, w2_ref[...],
                       preferred_element_type=jnp.float32) + b2_ref[...])   # (TB, 32)
    logits = jnp.dot(h, w3_ref[...],
                     preferred_element_type=jnp.float32) + b3_ref[...]      # (TB, A)
    m = jnp.max(logits, axis=-1, keepdims=True)
    e = jnp.exp(logits - m)
    s = jnp.sum(e, axis=-1, keepdims=True)
    o_ref[...] = e * pl.reciprocal(s, approx=True)


# ---------------------------------------------------------------------------
# One-time weight folding: 3x3 valid conv (NHWC input, NCHW-flattened output)
# as a dense (675, 1024) matrix.  Acting on obs.reshape(B*T, 675) it produces
# exactly torch's  leaky(conv(x)).reshape(B*T, 1014)  pre-activation (order
# co*169 + oh*13 + ow), so fc1 weights need no permutation at all.
# ---------------------------------------------------------------------------
def _fold_conv_to_dense(conv_w, conv_b):
    # sel[h, kh, oh] = 1  iff  h == oh + kh
    sel = (jnp.arange(H)[:, None, None]
           == jnp.arange(OH)[None, None, :] + jnp.arange(KS)[None, :, None]
           ).astype(jnp.float32)                                        # (15, 3, 13)
    # W6[h, w, ci, co, oh, ow] = conv_w[co, ci, h-oh, w-ow] (0 if invalid)
    w6 = jnp.einsum('hap,wbq,oiab->hwiopq', sel, sel,
                    conv_w.astype(jnp.float32))                         # (15,15,3,6,13,13)
    wd = w6.reshape(IN_FLAT, FEAT)                                      # (675, 1014)
    wd = jnp.pad(wd, ((0, 0), (0, FEAT_PAD - FEAT)))                    # lane-dense
    bd = jnp.pad(jnp.repeat(conv_b, OH * OW), (0, FEAT_PAD - FEAT))
    return wd.astype(jnp.bfloat16), bd.reshape(1, FEAT_PAD).astype(jnp.float32)


def init_params(key, action_num):
    ks = jax.random.split(key, 8)
    return {
        "conv_w": jax.random.normal(ks[0], (C_OUT, C_IN, KS, KS), jnp.float32) * 0.1,
        "conv_b": jax.random.normal(ks[1], (C_OUT,), jnp.float32) * 0.1,
        "fc1_w": jax.random.normal(ks[2], (32, FEAT), jnp.float32) * 0.1,
        "fc1_b": jax.random.normal(ks[3], (32,), jnp.float32) * 0.1,
        "fc2_w": jax.random.normal(ks[4], (32, 32), jnp.float32) * 0.1,
        "fc2_b": jax.random.normal(ks[5], (32,), jnp.float32) * 0.1,
        "fc3_w": jax.random.normal(ks[6], (action_num, 32), jnp.float32) * 0.1,
        "fc3_b": jax.random.normal(ks[7], (action_num,), jnp.float32) * 0.1,
    }


def ppo_actor_forward(params, obs, *, block_rows=512):
    """obs: (B, T, 15, 15, 3) float32 -> probs (B, T, action_num)."""
    B, T, h, w, c = obs.shape
    assert (h, w, c) == (H, W, C_IN)
    n = B * T
    A = params["fc3_w"].shape[0]

    # Pure reshape (row-major), no transpose of activations.
    x = obs.reshape(n, IN_FLAT)

    # Row tiling: whole thing in one step if small, else TB rows per grid step
    # (TB multiple of 8, >=256 to keep the MXU M-dim well fed on v6e/v7x).
    tb = n if n <= block_rows else block_rows
    pad = (-n) % tb
    if pad:
        x = jnp.pad(x, ((0, pad), (0, 0)))
    n_pad = n + pad

    # One-time weight layout work (tiny tensors).
    wc, bc = _fold_conv_to_dense(params["conv_w"], params["conv_b"])
    w1 = jnp.pad(params["fc1_w"].T, ((0, FEAT_PAD - FEAT), (0, 0)))   # (1024, 32)
    b1 = params["fc1_b"].reshape(1, -1)
    w2 = params["fc2_w"].T                                            # (32, 32)
    b2 = params["fc2_b"].reshape(1, -1)
    w3 = params["fc3_w"].T                                            # (32, A)
    b3 = params["fc3_b"].reshape(1, -1)

    const = lambda i: (0, 0)    # weights stay resident across the row grid
    probs = pl.pallas_call(
        ppo_actor_kernel,
        out_shape=jax.ShapeDtypeStruct((n_pad, A), jnp.float32),
        grid=(n_pad // tb,),
        in_specs=[
            pl.BlockSpec((tb, IN_FLAT), lambda i: (i, 0)),
            pl.BlockSpec((IN_FLAT, FEAT_PAD), const),
            pl.BlockSpec((1, FEAT_PAD), const),
            pl.BlockSpec((FEAT_PAD, 32), const),
            pl.BlockSpec((1, 32), const),
            pl.BlockSpec((32, 32), const),
            pl.BlockSpec((1, 32), const),
            pl.BlockSpec((32, A), const),
            pl.BlockSpec((1, A), const),
        ],
        out_specs=pl.BlockSpec((tb, A), lambda i: (i, 0)),
        compiler_params=pltpu.CompilerParams(
            dimension_semantics=("parallel",)),
    )(x, wc, bc, w1, b1, w2, b2, w3, b3)

    return probs[:n].reshape(B, T, A)


# ---------------------------------------------------------------------------
# Pure-JAX f32 reference (same math as the PyTorch module) for sanity checks.
# ---------------------------------------------------------------------------
def _reference_forward(params, obs):
    B, T, h, w, c = obs.shape
    x = obs.transpose(0, 1, 4, 2, 3).reshape(B * T, c, h, w)
    y = jax.lax.conv_general_dilated(
        x, params["conv_w"], window_strides=(1, 1), padding="VALID",
        dimension_numbers=("NCHW", "OIHW", "NCHW"),
    ) + params["conv_b"][None, :, None, None]
    y = _leaky(y).reshape(B, T, -1)
    hh = _leaky(y @ params["fc1_w"].T + params["fc1_b"])
    hh = _leaky(hh @ params["fc2_w"].T + params["fc2_b"])
    logits = hh @ params["fc3_w"].T + params["fc3_b"]
    return jax.nn.softmax(logits, axis=-1)


if __name__ == "__main__":
    key = jax.random.PRNGKey(0)
    k_obs, k_par, k_obs2 = jax.random.split(key, 3)

    B, T, ACTION_NUM = 2, 8, 5
    obs = jax.random.normal(k_obs, (B, T, 15, 15, 3), jnp.float32)
    params = init_params(k_par, ACTION_NUM)

    out = jax.block_until_ready(ppo_actor_forward(params, obs))
    ref = jax.block_until_ready(_reference_forward(params, obs))
    assert out.shape == (B, T, ACTION_NUM)
    assert bool(jnp.all(jnp.isfinite(out)))
    assert jnp.allclose(out, ref, atol=1e-2, rtol=1e-2), (
        f"mismatch vs reference, max abs diff {jnp.max(jnp.abs(out - ref))}")

    # Also exercise the multi-step grid + row-padding path.
    B2, T2 = 2, 200                       # 400 rows, block_rows=256 -> grid of 2
    obs2 = jax.random.normal(k_obs2, (B2, T2, 15, 15, 3), jnp.float32)
    out2 = jax.block_until_ready(ppo_actor_forward(params, obs2, block_rows=256))
    ref2 = jax.block_until_ready(_reference_forward(params, obs2))
    assert out2.shape == (B2, T2, ACTION_NUM)
    assert jnp.allclose(out2, ref2, atol=1e-2, rtol=1e-2), (
        f"gridded mismatch, max abs diff {jnp.max(jnp.abs(out2 - ref2))}")

    print("KERNEL_OK")
</pallas_src>

<mosaic_0001>
module attributes {stable_mosaic.version = 11 : i64} {
  func.func @ppo_actor_kernel(%arg0: i32, %arg1: memref<16x675xf32, #tpu.memory_space<vmem>>, %arg2: memref<675x1024xbf16, #tpu.memory_space<vmem>>, %arg3: memref<1x1024xf32, #tpu.memory_space<vmem>>, %arg4: memref<1024x32xf32, #tpu.memory_space<vmem>>, %arg5: memref<1x32xf32, #tpu.memory_space<vmem>>, %arg6: memref<32x32xf32, #tpu.memory_space<vmem>>, %arg7: memref<1x32xf32, #tpu.memory_space<vmem>>, %arg8: memref<32x5xf32, #tpu.memory_space<vmem>>, %arg9: memref<1x5xf32, #tpu.memory_space<vmem>>, %arg10: memref<16x5xf32, #tpu.memory_space<vmem>>) attributes {dimension_semantics = [#tpu.dimension_semantics<parallel>], iteration_bounds = array<i64: 1>, scalar_prefetch = 0 : i64, scratch_operands = 0 : i64, tpu.core_type = #tpu.core_type<tc>, window_params = [{transform_indices = @transform_0, window_bounds = array<i64: 16, 675>}, {pipeline_mode = #tpu.pipeline_mode<synchronous>, transform_indices = @transform_1, window_bounds = array<i64: 675, 1024>}, {pipeline_mode = #tpu.pipeline_mode<synchronous>, transform_indices = @transform_2, window_bounds = array<i64: 1, 1024>}, {pipeline_mode = #tpu.pipeline_mode<synchronous>, transform_indices = @transform_3, window_bounds = array<i64: 1024, 32>}, {pipeline_mode = #tpu.pipeline_mode<synchronous>, transform_indices = @transform_4, window_bounds = array<i64: 1, 32>}, {pipeline_mode = #tpu.pipeline_mode<synchronous>, transform_indices = @transform_5, window_bounds = array<i64: 32, 32>}, {pipeline_mode = #tpu.pipeline_mode<synchronous>, transform_indices = @transform_6, window_bounds = array<i64: 1, 32>}, {pipeline_mode = #tpu.pipeline_mode<synchronous>, transform_indices = @transform_7, window_bounds = array<i64: 32, 5>}, {pipeline_mode = #tpu.pipeline_mode<synchronous>, transform_indices = @transform_8, window_bounds = array<i64: 1, 5>}, {transform_indices = @transform_9, window_bounds = array<i64: 16, 5>}]} {
    %c0 = arith.constant 0 : index
    %c0_0 = arith.constant 0 : index
    %0 = vector.load %arg1[%c0, %c0_0] : memref<16x675xf32, #tpu.memory_space<vmem>>, vector<16x675xf32>
    %1 = arith.truncf %0 : vector<16x675xf32> to vector<16x675xbf16>
    %c0_1 = arith.constant 0 : index
    %c0_2 = arith.constant 0 : index
    %2 = vector.load %arg2[%c0_1, %c0_2] : memref<675x1024xbf16, #tpu.memory_space<vmem>>, vector<675x1024xbf16>
    %cst = arith.constant dense<0.000000e+00> : vector<16x1024xf32>
    %3 = tpu.matmul %1, %2, %cst {dimension_numbers = #tpu.dot_dimension_numbers<[1], [0], [0], [1], [0, 0, 1, 1], [], []>} : vector<16x675xbf16>, vector<675x1024xbf16>, vector<16x1024xf32> -> vector<16x1024xf32>
    %c0_3 = arith.constant 0 : index
    %c0_4 = arith.constant 0 : index
    %4 = vector.load %arg3[%c0_3, %c0_4] : memref<1x1024xf32, #tpu.memory_space<vmem>>, vector<1x1024xf32>
    %5 = vector.broadcast %4 : vector<1x1024xf32> to vector<16x1024xf32>
    %6 = arith.addf %3, %5 : vector<16x1024xf32>
    %cst_5 = arith.constant 0.000000e+00 : f32
    %7 = vector.broadcast %cst_5 : f32 to vector<16x1024xf32>
    %8 = arith.cmpf ogt, %6, %7 : vector<16x1024xf32>
    %cst_6 = arith.constant 0.00999999977 : f32
    %9 = vector.broadcast %cst_6 : f32 to vector<16x1024xf32>
    %10 = arith.mulf %9, %6 : vector<16x1024xf32>
    %11 = arith.select %8, %6, %10 : vector<16x1024xi1>, vector<16x1024xf32>
    %c0_7 = arith.constant 0 : index
    %c0_8 = arith.constant 0 : index
    %12 = vector.load %arg4[%c0_7, %c0_8] : memref<1024x32xf32, #tpu.memory_space<vmem>>, vector<1024x32xf32>
    %cst_9 = arith.constant dense<0.000000e+00> : vector<16x32xf32>
    %13 = tpu.matmul %11, %12, %cst_9 {dimension_numbers = #tpu.dot_dimension_numbers<[1], [0], [0], [1], [0, 0, 1, 1], [], []>} : vector<16x1024xf32>, vector<1024x32xf32>, vector<16x32xf32> -> vector<16x32xf32>
    %c0_10 = arith.constant 0 : index
    %c0_11 = arith.constant 0 : index
    %14 = vector.load %arg5[%c0_10, %c0_11] : memref<1x32xf32, #tpu.memory_space<vmem>>, vector<1x32xf32>
    %15 = vector.broadcast %14 : vector<1x32xf32> to vector<16x32xf32>
    %16 = arith.addf %13, %15 : vector<16x32xf32>
    %cst_12 = arith.constant 0.000000e+00 : f32
    %17 = vector.broadcast %cst_12 : f32 to vector<16x32xf32>
    %18 = arith.cmpf ogt, %16, %17 : vector<16x32xf32>
    %cst_13 = arith.constant 0.00999999977 : f32
    %19 = vector.broadcast %cst_13 : f32 to vector<16x32xf32>
    %20 = arith.mulf %19, %16 : vector<16x32xf32>
    %21 = arith.select %18, %16, %20 : vector<16x32xi1>, vector<16x32xf32>
    %c0_14 = arith.constant 0 : index
    %c0_15 = arith.constant 0 : index
    %22 = vector.load %arg6[%c0_14, %c0_15] : memref<32x32xf32, #tpu.memory_space<vmem>>, vector<32x32xf32>
    %cst_16 = arith.constant dense<0.000000e+00> : vector<16x32xf32>
    %23 = tpu.matmul %21, %22, %cst_16 {dimension_numbers = #tpu.dot_dimension_numbers<[1], [0], [0], [1], [0, 0, 1, 1], [], []>} : vector<16x32xf32>, vector<32x32xf32>, vector<16x32xf32> -> vector<16x32xf32>
    %c0_17 = arith.constant 0 : index
    %c0_18 = arith.constant 0 : index
    %24 = vector.load %arg7[%c0_17, %c0_18] : memref<1x32xf32, #tpu.memory_space<vmem>>, vector<1x32xf32>
    %25 = vector.broadcast %24 : vector<1x32xf32> to vector<16x32xf32>
    %26 = arith.addf %23, %25 : vector<16x32xf32>
    %cst_19 = arith.constant 0.000000e+00 : f32
    %27 = vector.broadcast %cst_19 : f32 to vector<16x32xf32>
    %28 = arith.cmpf ogt, %26, %27 : vector<16x32xf32>
    %cst_20 = arith.constant 0.00999999977 : f32
    %29 = vector.broadcast %cst_20 : f32 to vector<16x32xf32>
    %30 = arith.mulf %29, %26 : vector<16x32xf32>
    %31 = arith.select %28, %26, %30 : vector<16x32xi1>, vector<16x32xf32>
    %c0_21 = arith.constant 0 : index
    %c0_22 = arith.constant 0 : index
    %32 = vector.load %arg8[%c0_21, %c0_22] : memref<32x5xf32, #tpu.memory_space<vmem>>, vector<32x5xf32>
    %cst_23 = arith.constant dense<0.000000e+00> : vector<16x5xf32>
    %33 = tpu.matmul %31, %32, %cst_23 {dimension_numbers = #tpu.dot_dimension_numbers<[1], [0], [0], [1], [0, 0, 1, 1], [], []>} : vector<16x32xf32>, vector<32x5xf32>, vector<16x5xf32> -> vector<16x5xf32>
    %c0_24 = arith.constant 0 : index
    %c0_25 = arith.constant 0 : index
    %34 = vector.load %arg9[%c0_24, %c0_25] : memref<1x5xf32, #tpu.memory_space<vmem>>, vector<1x5xf32>
    %35 = vector.broadcast %34 : vector<1x5xf32> to vector<16x5xf32>
    %36 = arith.addf %33, %35 : vector<16x5xf32>
    %cst_26 = arith.constant dense<0xFF800000> : vector<16xf32>
    %37 = vector.multi_reduction <maximumf>, %36, %cst_26 [1] : vector<16x5xf32> to vector<16xf32>
    %38 = vector.shape_cast %37 : vector<16xf32> to vector<16x1xf32>
    %39 = vector.broadcast %38 : vector<16x1xf32> to vector<16x5xf32>
    %40 = arith.subf %36, %39 : vector<16x5xf32>
    %41 = math.exp %40 : vector<16x5xf32>
    %cst_27 = arith.constant dense<0.000000e+00> : vector<16xf32>
    %42 = vector.multi_reduction <add>, %41, %cst_27 [1] : vector<16x5xf32> to vector<16xf32>
    %43 = vector.shape_cast %42 : vector<16xf32> to vector<16x1xf32>
    %44 = tpu.reciprocal %43 {approx = true} : vector<16x1xf32> -> vector<16x1xf32>
    %45 = vector.broadcast %44 : vector<16x1xf32> to vector<16x5xf32>
    %46 = arith.mulf %41, %45 : vector<16x5xf32>
    %c0_28 = arith.constant 0 : index
    %c0_29 = arith.constant 0 : index
    %47 = vector.load %arg10[%c0_28, %c0_29] : memref<16x5xf32, #tpu.memory_space<vmem>>, vector<16x5xf32>
    tpu.vector_store %arg10[%c0_28, %c0_29], %46 {strides = array<i32>} : memref<16x5xf32, #tpu.memory_space<vmem>>, vector<16x5xf32>,
    return
  }
  func.func @transform_0(%arg0: i32) -> (i32, i32) {
    %c0_i32 = arith.constant 0 : i32
    %c0_i32_0 = arith.constant 0 : i32
    return %arg0, %c0_i32 : i32, i32
  }
  func.func @transform_1(%arg0: i32) -> (i32, i32) {
    %c0_i32 = arith.constant 0 : i32
    %c0_i32_0 = arith.constant 0 : i32
    %c0_i32_1 = arith.constant 0 : i32
    return %c0_i32, %c0_i32_0 : i32, i32
  }
  func.func @transform_2(%arg0: i32) -> (i32, i32) {
    %c0_i32 = arith.constant 0 : i32
    %c0_i32_0 = arith.constant 0 : i32
    %c0_i32_1 = arith.constant 0 : i32
    return %c0_i32, %c0_i32_0 : i32, i32
  }
  func.func @transform_3(%arg0: i32) -> (i32, i32) {
    %c0_i32 = arith.constant 0 : i32
    %c0_i32_0 = arith.constant 0 : i32
    %c0_i32_1 = arith.constant 0 : i32
    return %c0_i32, %c0_i32_0 : i32, i32
  }
  func.func @transform_4(%arg0: i32) -> (i32, i32) {
    %c0_i32 = arith.constant 0 : i32
    %c0_i32_0 = arith.constant 0 : i32
    %c0_i32_1 = arith.constant 0 : i32
    return %c0_i32, %c0_i32_0 : i32, i32
  }
  func.func @transform_5(%arg0: i32) -> (i32, i32) {
    %c0_i32 = arith.constant 0 : i32
    %c0_i32_0 = arith.constant 0 : i32
    %c0_i32_1 = arith.constant 0 : i32
    return %c0_i32, %c0_i32_0 : i32, i32
  }
  func.func @transform_6(%arg0: i32) -> (i32, i32) {
    %c0_i32 = arith.constant 0 : i32
    %c0_i32_0 = arith.constant 0 : i32
    %c0_i32_1 = arith.constant 0 : i32
    return %c0_i32, %c0_i32_0 : i32, i32
  }
  func.func @transform_7(%arg0: i32) -> (i32, i32) {
    %c0_i32 = arith.constant 0 : i32
    %c0_i32_0 = arith.constant 0 : i32
    %c0_i32_1 = arith.constant 0 : i32
    return %c0_i32, %c0_i32_0 : i32, i32
  }
  func.func @transform_8(%arg0: i32) -> (i32, i32) {
    %c0_i32 = arith.constant 0 : i32
    %c0_i32_0 = arith.constant 0 : i32
    %c0_i32_1 = arith.constant 0 : i32
    return %c0_i32, %c0_i32_0 : i32, i32
  }
  func.func @transform_9(%arg0: i32) -> (i32, i32) {
    %c0_i32 = arith.constant 0 : i32
    %c0_i32_0 = arith.constant 0 : i32
    return %arg0, %c0_i32 : i32, i32
  }
}

</mosaic_0001>

<bundles_post_ra>
// kernel: tpu_custom_call.1
= control target key start
LH: loop header
LB: loop body
LE: loop exit
PB: predicated region body
PF: predicated region fallthrough
CT: control target
= control target key end

     0   :  { %14 = vsyncpa [#allocation3], 0  ;;  %s6061_s0 = inlined_call_operand.hbm [shape: f32[16,675], index: 0, kind: input, shape index: {}]   ;;  %s6062_s1 = inlined_call_operand.hbm [shape: bf16[675,1024], index: 1, kind: input, shape index: {}]   ;;  %s6063_s2 = inlined_call_operand.hbm [shape: f32[1,1024], index: 2, kind: input, shape index: {}]   ;;  %s6064_s3 = inlined_call_operand.vmem [shape: f32[1024,32], index: 3, kind: input, shape index: {}]   ;;  %s6065_s4 = inlined_call_operand.hbm [shape: f32[1,32], index: 4, kind: input, shape index: {}]   ;;  %s6066_s5 = inlined_call_operand.hbm [shape: f32[32,32], index: 5, kind: input, shape index: {}]   ;;  %s6067_s6 = inlined_call_operand.hbm [shape: f32[1,32], index: 6, kind: input, shape index: {}]   ;;  %s6068_s7 = inlined_call_operand.vmem [shape: f32[32,5], index: 7, kind: input, shape index: {}]   ;;  %s6069_s8 = inlined_call_operand.hbm [shape: f32[1,5], index: 8, kind: input, shape index: {}]   ;;  %s6070_s9 = inlined_call_operand.vmem [shape: f32[16,5], index: 9, kind: output, shape index: {}]  }
   0x1   :  { %15 = vsyncpa [#allocation5], 0 }
   0x2   :  { %16 = vsyncpa [#allocation8], 0  ;;  %s35_s11 = sshll.u32 %s6062_s1, 4  ;;  %s36_s11 = int_to_ptr.hbm [resolvable:$true] %s35_s11 }
   0x3   :  { %17 = vsyncpa [#allocation11], 0  ;;  %s5292_s12 = smov [#allocation4]   ;;  %s62_s16 = sshll.u32 %s6065_s4, 4  ;;  %s63_s16 = int_to_ptr.hbm [resolvable:$true] %s62_s16 }
   0x4   :  { %s37_s13 = sshll.u32 %s5292_s12, 4  ;;  %s5293_s17 = smov 512   ;;  %s38_s13 = int_to_ptr.vmem [resolvable:$true] %s37_s13 }
   0x5   :  { %s5294_s18 = smov 32   ;;  %s5295_s19 = smov [#allocation7]  }
   0x6   :  { %43 = dma.hbm_to_vmem [thread:$0]  %s36_s11, 43520, %s38_s13, [#allocation5], %s5293_s17, %s5293_s17, %s5294_s18  }
   0x7   :  { %s64_s20 = sshll.u32 %s5295_s19, 4  ;;  %s86_s23 = sshll.u32 %s6067_s6, 4  ;;  %s65_s20 = int_to_ptr.vmem [resolvable:$true] %s64_s20  ;;  %s87_s23 = int_to_ptr.hbm [resolvable:$true] %s86_s23 }
   0x8   :  { %67 = dma.hbm_to_vmem [thread:$0]  %s63_s16, 16, %s65_s20, [#allocation8]  }
   0x9   :  { %s22_s25 = sshll.u32 %s6061_s0, 4  ;;  %s5296_s26 = smov [#allocation10]   ;;  %s23_s25 = int_to_ptr.hbm [resolvable:$true] %s22_s25 }
   0xa   :  { %s88_s27 = sshll.u32 %s5296_s26, 4  ;;  %s5297_s4 = smov [#allocation2]   ;;  %s89_s27 = int_to_ptr.vmem [resolvable:$true] %s88_s27 }
   0xb   :  { %91 = dma.hbm_to_vmem [thread:$0]  %s87_s23, 16, %s89_s27, [#allocation11]  }
   0xc   :  { %s24_s28 = sshll.u32 %s5297_s4, 4  ;;  %s5298_s29 = smov 768   ;;  %s25_s28 = int_to_ptr.vmem [resolvable:$true] %s24_s28 }
   0xd   :  { %s5299_s30 = smov 48   ;;  %s49_s11 = sshll.u32 %s6063_s2, 4  ;;  %s50_s11 = int_to_ptr.hbm [resolvable:$true] %s49_s11 }
   0xe   :  { %30 = dma.hbm_to_vmem [thread:$0]  %s23_s25, 1536, %s25_s28, [#allocation3], %s5298_s29, %s5298_s29, %s5299_s30  }
   0xf   :  { %s5300_s12 = smov [#allocation6]   ;;  %s72_s15 = sshll.u32 %s6066_s5, 4  ;;  %s73_s15 = int_to_ptr.hbm [resolvable:$true] %s72_s15 }
  0x10   :  { %s51_s13 = sshll.u32 %s5300_s12, 4  ;;  %s5301_s16 = smov [#allocation9]   ;;  %s52_s13 = int_to_ptr.vmem [resolvable:$true] %s51_s13 }
  0x11   :  { %54 = dma.hbm_to_vmem [thread:$0]  %s50_s11, 128, %s52_s13, [#allocation5]  }
  0x12   :  { %s74_s17 = sshll.u32 %s5301_s16, 4  ;;  %s5302_s18 = smov 128   ;;  %s75_s17 = int_to_ptr.vmem [resolvable:$true] %s74_s17 }
  0x13   :  { %s5303_s19 = smov 8   ;;  %s99_s2 = sshll.u32 %s6069_s8, 4  ;;  %s100_s2 = int_to_ptr.hbm [resolvable:$true] %s99_s2 }
  0x14   :  { %80 = dma.hbm_to_vmem [thread:$0]  %s73_s15, 512, %s75_s17, [#allocation8], %s5302_s18, %s5302_s18, %s5303_s19  }
  0x15   :  { %s5304_s22 = smov [#allocation12]  }
  0x16   :  { %s101_s23 = sshll.u32 %s5304_s22, 4  ;;  %s102_s23 = int_to_ptr.vmem [resolvable:$true] %s101_s23 }
  0x17   :  { %104 = dma.hbm_to_vmem [thread:$0]  %s100_s2, 16, %s102_s23, [#allocation11]  }
  0x18   :  { %5284 = dma.done.wait [#allocation3], 1536  }
  0x19   :  { %5285 = vsyncadd [#allocation3], 4294965760 }
  0x1a   :  { %5286 = dma.done.wait [#allocation5], 43648  }
  0x1b   :  { %5287 = vsyncadd [#allocation5], 4294923648 }
  0x1c   :  { %5288 = dma.done.wait [#allocation8], 528  }
  0x1d   :  { %5289 = vsyncadd [#allocation8], 4294966768 }
  0x1e   :  { %5290 = dma.done.wait [#allocation11], 32  }
  0x1f   :  { %5291 = vsyncadd [#allocation11], 4294967264  ;;  %v3624_v0 = vld [vmem:[#allocation4 + $0x1c0] sm:$0xf]  ;;  %vm2214_vm0 = vcmask 1040384   ;;  %vm2215_vm1 = vcmask 1041408  }
  0x20   :  { %v4814_v1 = vld [vmem:[#allocation4 + $0x1dc] sm:$0xf0]  ;;  %vm2210_vm2 = vcmask 285696  }
  0x21   :  { %v3880_v2 = vld [vmem:[#allocation4 + $0x3c0] sm:$0xf]  ;;  %v3625_v3 = vor.u32 %v4814_v1, %v3624_v0 }
  0x22   :  { %v4878_v4 = vld [vmem:[#allocation4 + $0x3dc] sm:$0xf0] }
  0x23   :  { %v4136_v5 = vld [vmem:[#allocation4 + $0x5c0] sm:$0xf]  ;;  %v3881_v7 = vor.u32 %v4878_v4, %v3880_v2  ;;  %2242 = vmatpush.bf16.msra.mxu0 %v3625_v3 }
  0x24   :  { %v4942_v6 = vld [vmem:[#allocation4 + $0x5dc] sm:$0xf0] }
  0x25   :  { %v4137_v8 = vor.u32 %v4942_v6, %v4136_v5  ;;  %v4392_v9 = vld [vmem:[#allocation4 + $0x7c0] sm:$0xf]  ;;  %2256 = vmatpush.bf16.msra.mxu1 %v3881_v7 }
  0x26   :  { %v5006_v10 = vld [vmem:[#allocation4 + $0x7dc] sm:$0xf0] }
  0x27   :  { %v3592_v11 = vld [vmem:[#allocation4 + $0x180] sm:$0xf]  ;;  %v4393_v12 = vor.u32 %v5006_v10, %v4392_v9  ;;  %2270 = vmatpush.bf16.msra.mxu2 %v4137_v8 }
  0x28   :  { %v4806_v13 = vld [vmem:[#allocation4 + $0x19c] sm:$0xf0] }
  0x29   :  { %v3848_v14 = vld [vmem:[#allocation4 + $0x380] sm:$0xf]  ;;  %v3593_v16 = vor.u32 %v4806_v13, %v3592_v11  ;;  %2284 = vmatpush.bf16.msra.mxu3 %v4393_v12 }
  0x2a   :  { %v4870_v15 = vld [vmem:[#allocation4 + $0x39c] sm:$0xf0] }
  0x2b   :  { %v3849_v17 = vor.u32 %v4870_v15, %v3848_v14  ;;  %v4104_v18 = vld [vmem:[#allocation4 + $0x580] sm:$0xf]  ;;  %2243 = vmatpush.bf16.msra.mxu0 %v3593_v16 }
  0x2c   :  { %v4934_v19 = vld [vmem:[#allocation4 + $0x59c] sm:$0xf0] }
  0x2d   :  { %v4360_v20 = vld [vmem:[#allocation4 + $0x780] sm:$0xf]  ;;  %v4105_v21 = vor.u32 %v4934_v19, %v4104_v18  ;;  %2257 = vmatpush.bf16.msra.mxu1 %v3849_v17 }
  0x2e   :  { %v4998_v22 = vld [vmem:[#allocation4 + $0x79c] sm:$0xf0] }
  0x2f   :  { %v3560_v23 = vld [vmem:[#allocation4 + $0x140] sm:$0xf]  ;;  %v4361_v25 = vor.u32 %v4998_v22, %v4360_v20  ;;  %2271 = vmatpush.bf16.msra.mxu2 %v4105_v21  ;;  %v5305_v20 = vmov 65535  }
  0x30   :  { %v4798_v24 = vld [vmem:[#allocation4 + $0x15c] sm:$0xf0]  ;;  %v2216_v21 = vsel %vm2214_vm0, 4294967295, %v5305_v20 }
  0x31   :  { %v3816_v26 = vld [vmem:[#allocation4 + $0x340] sm:$0xf]  ;;  %v3561_v29 = vor.u32 %v4798_v24, %v3560_v23  ;;  %2285 = vmatpush.bf16.msra.mxu3 %v4361_v25 }
  0x32   :  { %v4862_v27 = vld [vmem:[#allocation4 + $0x35c] sm:$0xf0] }
  0x33   :  { %v4072_v28 = vld [vmem:[#allocation4 + $0x540] sm:$0xf]  ;;  %v3817_v33 = vor.u32 %v4862_v27, %v3816_v26  ;;  %2244 = vmatpush.bf16.msra.mxu0 %v3561_v29 }
  0x34   :  { %v4926_v30 = vld [vmem:[#allocation4 + $0x55c] sm:$0xf0] }
  0x35   :  { %v4328_v31 = vld [vmem:[#allocation4 + $0x740] sm:$0xf]  ;;  %v4073_v34 = vor.u32 %v4926_v30, %v4072_v28  ;;  %2258 = vmatpush.bf16.msra.mxu1 %v3817_v33 }
  0x36   :  { %v4990_v32 = vld [vmem:[#allocation4 + $0x75c] sm:$0xf0] }
  0x37   :  { %v3528_v35 = vld [vmem:[#allocation4 + $0x100] sm:$0xf]  ;;  %v4329_v38 = vor.u32 %v4990_v32, %v4328_v31  ;;  %2272 = vmatpush.bf16.msra.mxu2 %v4073_v34 }
  0x38   :  { %v4790_v36 = vld [vmem:[#allocation4 + $0x11c] sm:$0xf0] }
  0x39   :  { %v3784_v37 = vld [vmem:[#allocation4 + $0x300] sm:$0xf]  ;;  %v3529_v44 = vor.u32 %v4790_v36, %v3528_v35  ;;  %2286 = vmatpush.bf16.msra.mxu3 %v4329_v38  ;;  %v5382_v36 = vsel %vm2215_vm1, %v2216_v21, 0  ;;  %v3626_v38 = vld [vmem:[#allocation4 + $0x1e0] sm:$0xf0] }
  0x3a   :  { %v4854_v39 = vld [vmem:[#allocation4 + $0x31c] sm:$0xf0] }
  0x3b   :  { %v4040_v40 = vld [vmem:[#allocation4 + $0x500] sm:$0xf]  ;;  %v3785_v45 = vor.u32 %v4854_v39, %v3784_v37  ;;  %2245 = vmatpush.bf16.msra.mxu0 %v3529_v44  ;;  %v4810_v37 = vld [vmem:[#allocation4 + $0x1c4] sm:$0xf] }
  0x3c   :  { %v4918_v41 = vld [vmem:[#allocation4 + $0x51c] sm:$0xf0] }
  0x3d   :  { %v4296_v42 = vld [vmem:[#allocation4 + $0x700] sm:$0xf]  ;;  %v4041_v46 = vor.u32 %v4918_v41, %v4040_v40  ;;  %2259 = vmatpush.bf16.msra.mxu1 %v3785_v45  ;;  %v4874_v41 = vld [vmem:[#allocation4 + $0x3c4] sm:$0xf] }
  0x3e   :  { %v4982_v43 = vld [vmem:[#allocation4 + $0x71c] sm:$0xf0] }
  0x3f   :  { %v3496_v47 = vld [vmem:[#allocation4 + $0xc0] sm:$0xf]  ;;  %v4297_v50 = vor.u32 %v4982_v43, %v4296_v42  ;;  %2273 = vmatpush.bf16.msra.mxu2 %v4041_v46  ;;  %v3882_v42 = vld [vmem:[#allocation4 + $0x3e0] sm:$0xf0]  ;;  %v135_v46 = vld [vmem:[#allocation2 + $0x8] sm:$0xff] }
  0x40   :  { %v4782_v48 = vld [vmem:[#allocation4 + $0xdc] sm:$0xf0] }
  0x41   :  { %v3752_v49 = vld [vmem:[#allocation4 + $0x2c0] sm:$0xf]  ;;  %v3497_v56 = vor.u32 %v4782_v48, %v3496_v47  ;;  %2287 = vmatpush.bf16.msra.mxu3 %v4297_v50  ;;  %v141_v47 = vld [vmem:[#allocation2 + $0x38] sm:$0xff] }
  0x42   :  { %v4846_v51 = vld [vmem:[#allocation4 + $0x2dc] sm:$0xf0] }
  0x43   :  { %v4008_v52 = vld [vmem:[#allocation4 + $0x4c0] sm:$0xf]  ;;  %v3753_v57 = vor.u32 %v4846_v51, %v3752_v49  ;;  %2246 = vmatpush.bf16.msra.mxu0 %v3497_v56  ;;  %v3629_v49 = vor.u32 %v4810_v37, %v3626_v38  ;;  %v4866_v56 = vld [vmem:[#allocation4 + $0x384] sm:$0xf] }
  0x44   :  { %v4910_v53 = vld [vmem:[#allocation4 + $0x4dc] sm:$0xf0] }
  0x45   :  { %v4264_v54 = vld [vmem:[#allocation4 + $0x6c0] sm:$0xf]  ;;  %v4009_v58 = vor.u32 %v4910_v53, %v4008_v52  ;;  %2260 = vmatpush.bf16.msra.mxu1 %v3753_v57  ;;  %v3885_v53 = vor.u32 %v4874_v41, %v3882_v42  ;;  %v5385_v57 = vpack.c.bf16 %v141_v47, %v135_v46  ;;  %v4842_v41 = vld [vmem:[#allocation4 + $0x2c4] sm:$0xf] }
  0x46   :  { %v4974_v55 = vld [vmem:[#allocation4 + $0x6dc] sm:$0xf0]  ;;  %v3754_v42 = vld [vmem:[#allocation4 + $0x2e0] sm:$0xf0] }
  0x47   :  { %v3464_v59 = vld [vmem:[#allocation4 + $0x80] sm:$0xf]  ;;  %v4265_v62 = vor.u32 %v4974_v55, %v4264_v54  ;;  %2274 = vmatpush.bf16.msra.mxu2 %v4009_v58  ;;  %v4802_v54 = vld [vmem:[#allocation4 + $0x184] sm:$0xf] }
  0x48   :  { %v4774_v60 = vld [vmem:[#allocation4 + $0x9c] sm:$0xf0]  ;;  %v3594_v55 = vld [vmem:[#allocation4 + $0x1a0] sm:$0xf0] }
  0x49   :  { %v3720_v61 = vld [vmem:[#allocation4 + $0x280] sm:$0xf]  ;;  %v3465_v4 = vor.u32 %v4774_v60, %v3464_v59  ;;  %2288 = vmatpush.bf16.msra.mxu3 %v4265_v62  ;;  %v3850_v58 = vld [vmem:[#allocation4 + $0x3a0] sm:$0xf0] }
  0x4a   :  { %v4838_v63 = vld [vmem:[#allocation4 + $0x29c] sm:$0xf0] }
  0x4b   :  { %v3976_v0 = vld [vmem:[#allocation4 + $0x480] sm:$0xf]  ;;  %v3721_v5 = vor.u32 %v4838_v63, %v3720_v61  ;;  %2247 = vmatpush.bf16.msra.mxu0 %v3465_v4  ;;  %v3597_v4 = vor.u32 %v4802_v54, %v3594_v55  ;;  %v3722_v54 = vld [vmem:[#allocation4 + $0x2a0] sm:$0xf0]  ;;  %v139_v55 = vld [vmem:[#allocation2 + $0x28] sm:$0xff] }
  0x4c   :  { %v4902_v1 = vld [vmem:[#allocation4 + $0x49c] sm:$0xf0] }
  0x4d   :  { %v4232_v2 = vld [vmem:[#allocation4 + $0x680] sm:$0xf]  ;;  %v3977_v6 = vor.u32 %v4902_v1, %v3976_v0  ;;  %2261 = vmatpush.bf16.msra.mxu1 %v3721_v5  ;;  %v140_v1 = vld [vmem:[#allocation2 + $0x30] sm:$0xff]  ;;  %v4794_v5 = vld [vmem:[#allocation4 + $0x144] sm:$0xf] }
  0x4e   :  { %v4966_v3 = vld [vmem:[#allocation4 + $0x69c] sm:$0xf0] }
  0x4f   :  { %v3432_v7 = vld [vmem:[#allocation4 + $0x40] sm:$0xf]  ;;  %v4233_v10 = vor.u32 %v4966_v3, %v4232_v2  ;;  %2275 = vmatpush.bf16.msra.mxu2 %v3977_v6  ;;  %v136_v2 = vld [vmem:[#allocation2 + $0x10] sm:$0xff]  ;;  %v3562_v6 = vld [vmem:[#allocation4 + $0x160] sm:$0xf0] }
  0x50   :  { %v4766_v8 = vld [vmem:[#allocation4 + $0x5c] sm:$0xf0]  ;;  %v3565_v21 = vor.u32 %v4794_v5, %v3562_v6  ;;  %v4826_v5 = vld [vmem:[#allocation4 + $0x244] sm:$0xf] }
  0x51   :  { %v3688_v9 = vld [vmem:[#allocation4 + $0x240] sm:$0xf]  ;;  %v3433_v17 = vor.u32 %v4766_v8, %v3432_v7  ;;  %2289 = vmatpush.bf16.msra.mxu3 %v4233_v10  ;;  %v4858_v10 = vld [vmem:[#allocation4 + $0x344] sm:$0xf] }
  0x52   :  { %v4830_v11 = vld [vmem:[#allocation4 + $0x25c] sm:$0xf0] }
  0x53   :  { %v3944_v12 = vld [vmem:[#allocation4 + $0x440] sm:$0xf]  ;;  %v3689_v22 = vor.u32 %v4830_v11, %v3688_v9  ;;  %2248 = vmatpush.bf16.msra.mxu0 %v3433_v17  ;;  %v3853_v9 = vor.u32 %v4866_v56, %v3850_v58  ;;  %v3818_v11 = vld [vmem:[#allocation4 + $0x360] sm:$0xf0]  ;;  %v143_v17 = vld [vmem:[#allocation2 + $0x48] sm:$0xff] }
  0x54   :  { %v4894_v13 = vld [vmem:[#allocation4 + $0x45c] sm:$0xf0]  ;;  %v4914_v56 = vld [vmem:[#allocation4 + $0x504] sm:$0xf] }
  0x55   :  { %v4200_v14 = vld [vmem:[#allocation4 + $0x640] sm:$0xf]  ;;  %v3945_v23 = vor.u32 %v4894_v13, %v3944_v12  ;;  %2262 = vmatpush.bf16.msra.mxu1 %v3689_v22  ;;  %v4938_v12 = vld [vmem:[#allocation4 + $0x5c4] sm:$0xf] }
  0x56   :  { %v4958_v15 = vld [vmem:[#allocation4 + $0x65c] sm:$0xf0]  ;;  %v4042_v58 = vld [vmem:[#allocation4 + $0x520] sm:$0xf0] }
  0x57   :  { %v5377_v16 = vld [vmem:[#allocation4 + $0xa80] sm:$0x33]  ;;  %v4201_v27 = vor.u32 %v4958_v15, %v4200_v14  ;;  %2276 = vmatpush.bf16.msra.mxu2 %v3945_v23  ;;  %v137_v15 = vld [vmem:[#allocation2 + $0x18] sm:$0xff] }
  0x58   :  { %v3400_v18 = vld [vmem:[#allocation4] sm:$0xf]  ;;  %v1522_v19 = vunpack.c.l.b16 %v5377_v16  ;;  %v4138_v14 = vld [vmem:[#allocation4 + $0x5e0] sm:$0xf0]  ;;  %v1523_v6 = vunpack.c.h.b16 %v5377_v16 }
  0x59   :  { %v4758_v24 = vld [vmem:[#allocation4 + $0x1c] sm:$0xf0]  ;;  %2290 = vmatpush.bf16.msra.mxu3 %v4201_v27  ;;  %v3530_v27 = vld [vmem:[#allocation4 + $0x120] sm:$0xf0] }
  0x5a   :  { %v3656_v25 = vld [vmem:[#allocation4 + $0x200] sm:$0xf]  ;;  %v1866_v34 = vpack.c.b16 %v1522_v19, %v1522_v19  ;;  %v3401_v35 = vor.u32 %v4758_v24, %v3400_v18  ;;  %v5394_v19 = vpack.c.bf16 %v143_v17, %v137_v15  ;;  %v3821_v24 = vor.u32 %v4858_v10, %v3818_v11  ;;  %v4010_v10 = vld [vmem:[#allocation4 + $0x4e0] sm:$0xf0] }
  0x5b   :  { %v4822_v26 = vld [vmem:[#allocation4 + $0x21c] sm:$0xf0]  ;;  %v4754_v17 = vld [vmem:[#allocation4 + $0x4] sm:$0xf] }
  0x5c   :  { %v3912_v28 = vld [vmem:[#allocation4 + $0x400] sm:$0xf]  ;;  %v3657_v39 = vor.u32 %v4822_v26, %v3656_v25  ;;  %v2219_v48 = vand.u32 %v5382_v36, %v1866_v34  ;;  %2249 = vmatpush.bf16.msra.mxu0 %v3401_v35  ;;  %v4141_v25 = vor.u32 %v4938_v12, %v4138_v14  ;;  %v4786_v26 = vld [vmem:[#allocation4 + $0x104] sm:$0xf] }
  0x5d   :  { %v4886_v29 = vld [vmem:[#allocation4 + $0x41c] sm:$0xf0]  ;;  %v5002_v16 = vld [vmem:[#allocation4 + $0x7c4] sm:$0xf] }
  0x5e   :  { %v4168_v30 = vld [vmem:[#allocation4 + $0x600] sm:$0xf]  ;;  %v3913_v40 = vor.u32 %v4886_v29, %v3912_v28  ;;  %2263 = vmatpush.bf16.msra.mxu1 %v3657_v39  ;;  %v4850_v28 = vld [vmem:[#allocation4 + $0x304] sm:$0xf] }
  0x5f   :  { %v4950_v31 = vld [vmem:[#allocation4 + $0x61c] sm:$0xf0]  ;;  %v3786_v29 = vld [vmem:[#allocation4 + $0x320] sm:$0xf0] }
  0x60   :  { %v4648_v32 = vld [vmem:[#allocation4 + $0x9c0] sm:$0xf]  ;;  %v4169_v43 = vor.u32 %v4950_v31, %v4168_v30  ;;  %2277 = vmatpush.bf16.msra.mxu2 %v3913_v40  ;;  %v4930_v30 = vld [vmem:[#allocation4 + $0x584] sm:$0xf]  ;;  %v3789_v37 = vor.u32 %v4850_v28, %v3786_v29 }
  0x61   :  { %v5070_v33 = vld [vmem:[#allocation4 + $0x9dc] sm:$0xf0]  ;;  %2264 = vmatmul.bf16.vlgmr.msra.gmra.mxu1 %v5385_v57  ;;  %v4106_v31 = vld [vmem:[#allocation4 + $0x5a0] sm:$0xf0] }
  0x62   :  { %v4649_v44 = vor.u32 %v5070_v33, %v4648_v32  ;;  %v4616_v45 = vld [vmem:[#allocation4 + $0x980] sm:$0xf]  ;;  %2291 = vmatpush.bf16.msra.mxu3 %v4169_v43  ;;  %2317 = vmatpush.bf16.msrb.mxu1 %v2219_v48  ;;  %v3533_v33 = vor.u32 %v4786_v26, %v3530_v27  ;;  %v4109_v38 = vor.u32 %v4930_v30, %v4106_v31  ;;  %v4778_v39 = vld [vmem:[#allocation4 + $0xc4] sm:$0xf] }
  0x63   :  { %v5062_v50 = vld [vmem:[#allocation4 + $0x99c] sm:$0xf0]  ;;  %v3498_v40 = vld [vmem:[#allocation4 + $0xe0] sm:$0xf0] }
  0x64   :  { %v4712_v51 = vld [vmem:[#allocation4 + $0xa40] sm:$0xf]  ;;  %2298 = vmatpush.bf16.msrb.mxu0 %v4649_v44  ;;  %v4617_v61 = vor.u32 %v5062_v50, %v4616_v45  ;;  %2326 = vmatpush.bf16.msrb.mxu2 %v3629_v49  ;;  %v4922_v43 = vld [vmem:[#allocation4 + $0x544] sm:$0xf]  ;;  %v3501_v47 = vor.u32 %v4778_v39, %v3498_v40 }
  0x65   :  { %v5086_v52 = vld [vmem:[#allocation4 + $0xa5c] sm:$0xf0]  ;;  %2292 = vmatmul.bf16.vlgmr.msra.gmra.mxu3 %v5394_v19  ;;  %v4074_v44 = vld [vmem:[#allocation4 + $0x560] sm:$0xf0] }
  0x66   :  { %v4584_v59 = vld [vmem:[#allocation4 + $0x940] sm:$0xf]  ;;  %v4713_v3 = vor.u32 %v5086_v52, %v4712_v51  ;;  %2340 = vmatpush.bf16.msrb.mxu3 %v3885_v53  ;;  %v4770_v49 = vld [vmem:[#allocation4 + $0x84] sm:$0xf]  ;;  %v3757_v51 = vor.u32 %v4842_v41, %v3754_v42  ;;  %v4077_v52 = vor.u32 %v4922_v43, %v4074_v44 }
  0x67   :  { %v5054_v60 = vld [vmem:[#allocation4 + $0x95c] sm:$0xf0]  ;;  %v3466_v50 = vld [vmem:[#allocation4 + $0xa0] sm:$0xf0] }
  0x68   :  { %v4680_v62 = vld [vmem:[#allocation4 + $0xa00] sm:$0xf]  ;;  %2299 = vmatpush.bf16.msrb.mxu0 %v4617_v61  ;;  %v4585_v18 = vor.u32 %v5054_v60, %v4584_v59  ;;  %2318 = vmatpush.bf16.msrb.mxu1 %v4713_v3  ;;  %v4834_v53 = vld [vmem:[#allocation4 + $0x284] sm:$0xf]  ;;  %v145_v59 = vld [vmem:[#allocation2 + $0x58] sm:$0xff] }
  0x69   :  { %v5078_v63 = vld [vmem:[#allocation4 + $0xa1c] sm:$0xf0]  ;;  %2327 = vmatpush.bf16.msrb.mxu2 %v3597_v4  ;;  %v5397_v61 = vpack.c.bf16 %v145_v59, %v139_v55  ;;  %v4762_v3 = vld [vmem:[#allocation4 + $0x44] sm:$0xf] }
  0x6a   :  { %v134_v0 = vld [vmem:[#allocation2] sm:$0xff]  ;;  %v4681_v20 = vor.u32 %v5078_v63, %v4680_v62  ;;  %2341 = vmatpush.bf16.msrb.mxu3 %v3853_v9  ;;  %v3469_v62 = vor.u32 %v4770_v49, %v3466_v50 }
  0x6b   :  { %v5387_v7 = vpack.c.bf16 %v140_v1, %v134_v0  ;;  %v142_v8 = vld [vmem:[#allocation2 + $0x40] sm:$0xff]  ;;  %v3725_v1 = vor.u32 %v4834_v53, %v3722_v54 }
  0x6c   :  { %v5390_v13 = vpack.c.bf16 %v142_v8, %v136_v2  ;;  %v4552_v22 = vld [vmem:[#allocation4 + $0x900] sm:$0xf]  ;;  %2300 = vmatpush.bf16.msrb.mxu0 %v4585_v18  ;;  %2319 = vmatpush.bf16.msrb.mxu1 %v4681_v20  ;;  %v4045_v2 = vor.u32 %v4914_v56, %v4042_v58  ;;  %v3434_v4 = vld [vmem:[#allocation4 + $0x60] sm:$0xf0] }
  0x6d   :  { %2250 = vmatmul.bf16.vlgmr.msra.gmra.mxu0 %v5387_v7  ;;  %v5046_v23 = vld [vmem:[#allocation4 + $0x91c] sm:$0xf0]  ;;  %2328 = vmatpush.bf16.msrb.mxu2 %v3565_v21  ;;  %v3690_v8 = vld [vmem:[#allocation4 + $0x260] sm:$0xf0]  ;;  %v3437_v14 = vor.u32 %v4762_v3, %v3434_v4  ;;  %v4879_v3 = vld [vmem:[#allocation4 + $0x3e4] sm:$0xf0] }
  0x6e   :  { %2278 = vmatmul.bf16.vlgmr.msra.gmra.mxu2 %v5390_v13  ;;  %v4553_v32 = vor.u32 %v5046_v23, %v4552_v22  ;;  %v4520_v34 = vld [vmem:[#allocation4 + $0x8c0] sm:$0xf]  ;;  %2342 = vmatpush.bf16.msrb.mxu3 %v3821_v24  ;;  %v4906_v9 = vld [vmem:[#allocation4 + $0x4c4] sm:$0xf]  ;;  %v3693_v20 = vor.u32 %v4826_v5, %v3690_v8  ;;  %v1867_v24 = vpack.c.b16 %v1523_v6, %v1523_v6 }
  0x6f   :  { %v5038_v35 = vld [vmem:[#allocation4 + $0x8dc] sm:$0xf0]  ;;  %v3402_v18 = vld [vmem:[#allocation4 + $0x20] sm:$0xf0]  ;;  %v4013_v21 = vor.u32 %v4906_v9, %v4010_v10 }
  0x70   :  { %2354 = vmatpush.bf16.msra.mxu1 %v4141_v25  ;;  %2301 = vmatpush.bf16.msrb.mxu0 %v4553_v32  ;;  %v4521_v45 = vor.u32 %v5038_v35, %v4520_v34  ;;  %v4488_v46 = vld [vmem:[#allocation4 + $0x880] sm:$0xf]  ;;  %v4818_v22 = vld [vmem:[#allocation4 + $0x204] sm:$0xf]  ;;  %v3405_v31 = vor.u32 %v4754_v17, %v3402_v18  ;;  %v144_v34 = vld [vmem:[#allocation2 + $0x50] sm:$0xff]  ;;  %v2222_v41 = vand.u32 %v5382_v36, %v1867_v24 }
  0x71   :  { %2329 = vmatpush.bf16.msrb.mxu2 %v3533_v33  ;;  %v5030_v48 = vld [vmem:[#allocation4 + $0x89c] sm:$0xf0]  ;;  %4742 = vmatmul.msk.bf16.vlgmr.msrb.gmra.mxu1 %vm2210_vm2, %v5397_v61  ;;  %v4394_v23 = vld [vmem:[#allocation4 + $0x7e0] sm:$0xf0]  ;;  %v4807_v18 = vld [vmem:[#allocation4 + $0x1a4] sm:$0xf0] }
  0x72   :  { %2343 = vmatpush.bf16.msrb.mxu3 %v3789_v37  ;;  %v4489_v60 = vor.u32 %v5030_v48, %v4488_v46  ;;  %v4456_v63 = vld [vmem:[#allocation4 + $0x840] sm:$0xf]  ;;  %v3658_v25 = vld [vmem:[#allocation4 + $0x220] sm:$0xf0]  ;;  %v4397_v32 = vor.u32 %v5002_v16, %v4394_v23 }
  0x73   :  { %v5022_v0 = vld [vmem:[#allocation4 + $0x85c] sm:$0xf0]  ;;  %v4898_v26 = vld [vmem:[#allocation4 + $0x484] sm:$0xf]  ;;  %v3661_v35 = vor.u32 %v4818_v22, %v3658_v25 }
  0x74   :  { %2355 = vmatpush.bf16.msra.mxu1 %v4109_v38  ;;  %2302 = vmatpush.bf16.msrb.mxu0 %v4521_v45  ;;  %v4457_v11 = vor.u32 %v5022_v0, %v4456_v63  ;;  %v4424_v12 = vld [vmem:[#allocation4 + $0x800] sm:$0xf]  ;;  %v3978_v27 = vld [vmem:[#allocation4 + $0x4a0] sm:$0xf0]  ;;  %v3632_v63 = vld [vmem:[#allocation4 + $0x1c8] sm:$0xf] }
  0x75   :  { %2330 = vmatpush.bf16.msrb.mxu2 %v3501_v47  ;;  %v5014_v15 = vld [vmem:[#allocation4 + $0x81c] sm:$0xf0]  ;;  %v5066_v29 = vld [vmem:[#allocation4 + $0x9c4] sm:$0xf]  ;;  %v3981_v37 = vor.u32 %v4898_v26, %v3978_v27 }
  0x76   :  { %2344 = vmatpush.bf16.msrb.mxu3 %v3757_v51  ;;  %v4425_v28 = vor.u32 %v5014_v15, %v4424_v12  ;;  %v4650_v30 = vld [vmem:[#allocation4 + $0x9e0] sm:$0xf0]  ;;  %v3600_v15 = vld [vmem:[#allocation4 + $0x188] sm:$0xf] }
  0x77   :  { %v138_v33 = vld [vmem:[#allocation2 + $0x20] sm:$0xff]  ;;  %v4653_v40 = vor.u32 %v5066_v29, %v4650_v30  ;;  %v3601_v24 = vor.u32 %v4807_v18, %v3600_v15  ;;  %v4799_v30 = vld [vmem:[#allocation4 + $0x164] sm:$0xf0] }
  0x78   :  { %2356 = vmatpush.bf16.msra.mxu1 %v4077_v52  ;;  %2303 = vmatpush.bf16.msrb.mxu0 %v4489_v60  ;;  %v4994_v38 = vld [vmem:[#allocation4 + $0x784] sm:$0xf]  ;;  %v5403_v45 = vpack.c.bf16 %v144_v34, %v138_v33  ;;  %v5007_v15 = vld [vmem:[#allocation4 + $0x7e4] sm:$0xf0] }
  0x79   :  { %2331 = vmatpush.bf16.msrb.mxu2 %v3469_v62  ;;  %v4362_v39 = vld [vmem:[#allocation4 + $0x7a0] sm:$0xf0]  ;;  %v4112_v18 = vld [vmem:[#allocation4 + $0x588] sm:$0xf] }
  0x7a   :  { %2345 = vmatpush.bf16.msrb.mxu3 %v3725_v1  ;;  %v4890_v42 = vld [vmem:[#allocation4 + $0x444] sm:$0xf]  ;;  %v4365_v49 = vor.u32 %v4994_v38, %v4362_v39  ;;  %v4815_v1 = vld [vmem:[#allocation4 + $0x1e4] sm:$0xf0] }
  0x7b   :  { %v3946_v43 = vld [vmem:[#allocation4 + $0x460] sm:$0xf0]  ;;  %v3633_v10 = vor.u32 %v4815_v1, %v3632_v63  ;;  %v4943_v1 = vld [vmem:[#allocation4 + $0x5e4] sm:$0xf0] }
  0x7c   :  { %2357 = vmatpush.bf16.msra.mxu1 %v4045_v2  ;;  %2304 = vmatpush.bf16.msrb.mxu0 %v4457_v11  ;;  %v5058_v44 = vld [vmem:[#allocation4 + $0x984] sm:$0xf]  ;;  %v3949_v50 = vor.u32 %v4890_v42, %v3946_v43  ;;  %v3888_v2 = vld [vmem:[#allocation4 + $0x3c8] sm:$0xf] }
  0x7d   :  { %2332 = vmatpush.bf16.msrb.mxu2 %v3437_v14  ;;  %v4618_v46 = vld [vmem:[#allocation4 + $0x9a0] sm:$0xf0]  ;;  %v3889_v11 = vor.u32 %v4879_v3, %v3888_v2  ;;  %v4791_v43 = vld [vmem:[#allocation4 + $0x124] sm:$0xf0] }
  0x7e   :  { %2346 = vmatpush.bf16.msrb.mxu3 %v3693_v20  ;;  %v5082_v47 = vld [vmem:[#allocation4 + $0xa44] sm:$0xf]  ;;  %v4621_v54 = vor.u32 %v5058_v44, %v4618_v46  ;;  %v3856_v20 = vld [vmem:[#allocation4 + $0x388] sm:$0xf] }
  0x7f   :  { %v4714_v48 = vld [vmem:[#allocation4 + $0xa60] sm:$0xf0]  ;;  %v3792_v44 = vld [vmem:[#allocation4 + $0x308] sm:$0xf] }
  0x80   :  { %2358 = vmatpush.bf16.msra.mxu1 %v4013_v21  ;;  %2305 = vmatpush.bf16.msrb.mxu0 %v4425_v28  ;;  %v4882_v51 = vld [vmem:[#allocation4 + $0x404] sm:$0xf]  ;;  %v4717_v55 = vor.u32 %v5082_v47, %v4714_v48  ;;  %v4871_v21 = vld [vmem:[#allocation4 + $0x3a4] sm:$0xf0] }
  0x81   :  { %2333 = vmatpush.bf16.msrb.mxu2 %v3405_v31  ;;  %v4986_v52 = vld [vmem:[#allocation4 + $0x744] sm:$0xf]  ;;  %v3857_v25 = vor.u32 %v4871_v21, %v3856_v20  ;;  %v3568_v28 = vld [vmem:[#allocation4 + $0x148] sm:$0xf] }
  0x82   :  { %2347 = vmatpush.bf16.msrb.mxu3 %v3661_v35  ;;  %v4330_v53 = vld [vmem:[#allocation4 + $0x760] sm:$0xf0]  ;;  %v3824_v31 = vld [vmem:[#allocation4 + $0x348] sm:$0xf] }
  0x83   :  { %v3914_v56 = vld [vmem:[#allocation4 + $0x420] sm:$0xf0]  ;;  %2306 = vmatmul.bf16.vlgmr.msrb.gmra.mxu0 %v5403_v45  ;;  %v4333_v0 = vor.u32 %v4986_v52, %v4330_v53  ;;  %v4855_v46 = vld [vmem:[#allocation4 + $0x324] sm:$0xf0] }
  0x84   :  { %2368 = vmatpush.bf16.msra.mxu0 %v4397_v32  ;;  %2359 = vmatpush.bf16.msra.mxu1 %v3981_v37  ;;  %v5050_v58 = vld [vmem:[#allocation4 + $0x944] sm:$0xf]  ;;  %v3917_v4 = vor.u32 %v4882_v51, %v3914_v56  ;;  %v4863_v32 = vld [vmem:[#allocation4 + $0x364] sm:$0xf0]  ;;  %v3569_v37 = vor.u32 %v4799_v30, %v3568_v28  ;;  %v3793_v51 = vor.u32 %v4855_v46, %v3792_v44 }
  0x85   :  { %2382 = vmatpush.bf16.msra.mxu2 %v4653_v40  ;;  %v4586_v59 = vld [vmem:[#allocation4 + $0x960] sm:$0xf0]  ;;  %2348 = vmatmul.bf16.vlgmr.msrb.gmra.mxu3 %v5385_v57  ;;  %v3825_v38 = vor.u32 %v4863_v32, %v3824_v31  ;;  %v4783_v56 = vld [vmem:[#allocation4 + $0xe4] sm:$0xf0] }
  0x86   :  { %2401 = vmatpush.bf16.msra.mxu3 %v2222_v41  ;;  %v5074_v60 = vld [vmem:[#allocation4 + $0xa04] sm:$0xf]  ;;  %2334 = vmatmul.bf16.vlgmr.msrb.gmra.mxu2 %v5387_v7  ;;  %v4589_v8 = vor.u32 %v5050_v58, %v4586_v59  ;;  %v3536_v41 = vld [vmem:[#allocation4 + $0x108] sm:$0xf] }
  0x87   :  { %v4682_v62 = vld [vmem:[#allocation4 + $0xa20] sm:$0xf0]  ;;  %v3760_v58 = vld [vmem:[#allocation4 + $0x2c8] sm:$0xf] }
  0x88   :  { %2369 = vmatpush.bf16.msra.mxu0 %v4365_v49  ;;  %2360 = vmatpush.bf16.msra.mxu1 %v3949_v50  ;;  %v4978_v5 = vld [vmem:[#allocation4 + $0x704] sm:$0xf]  ;;  %v4685_v9 = vor.u32 %v5074_v60, %v4682_v62  ;;  %v3537_v50 = vor.u32 %v4791_v43, %v3536_v41  ;;  %v4847_v59 = vld [vmem:[#allocation4 + $0x2e4] sm:$0xf0] }
  0x89   :  { %v4298_v6 = vld [vmem:[#allocation4 + $0x720] sm:$0xf0]  ;;  %2383 = vmatpush.bf16.msra.mxu2 %v4621_v54  ;;  %v3504_v54 = vld [vmem:[#allocation4 + $0xc8] sm:$0xf]  ;;  %v3761_v3 = vor.u32 %v4847_v59, %v3760_v58 }
  0x8a   :  { %2402 = vmatpush.bf16.msra.mxu3 %v4717_v55  ;;  %v5042_v12 = vld [vmem:[#allocation4 + $0x904] sm:$0xf]  ;;  %v4301_v17 = vor.u32 %v4978_v5, %v4298_v6  ;;  %v3505_v2 = vor.u32 %v4783_v56, %v3504_v54  ;;  %v3472_v6 = vld [vmem:[#allocation4 + $0x88] sm:$0xf] }
  0x8b   :  { %v4554_v14 = vld [vmem:[#allocation4 + $0x920] sm:$0xf0]  ;;  %v4935_v20 = vld [vmem:[#allocation4 + $0x5a4] sm:$0xf0] }
  0x8c   :  { %2370 = vmatpush.bf16.msra.mxu0 %v4333_v0  ;;  %2361 = vmatpush.bf16.msra.mxu1 %v3917_v4  ;;  %v4970_v22 = vld [vmem:[#allocation4 + $0x6c4] sm:$0xf]  ;;  %v4557_v23 = vor.u32 %v5042_v12, %v4554_v14  ;;  %v4144_v0 = vld [vmem:[#allocation4 + $0x5c8] sm:$0xf] }
  0x8d   :  { %v4266_v16 = vld [vmem:[#allocation4 + $0x6e0] sm:$0xf0]  ;;  %2384 = vmatpush.bf16.msra.mxu2 %v4589_v8  ;;  %v4145_v12 = vor.u32 %v4943_v1, %v4144_v0  ;;  %v4400_v14 = vld [vmem:[#allocation4 + $0x7c8] sm:$0xf] }
  0x8e   :  { %2403 = vmatpush.bf16.msra.mxu3 %v4685_v9  ;;  %v5034_v26 = vld [vmem:[#allocation4 + $0x8c4] sm:$0xf]  ;;  %v4269_v29 = vor.u32 %v4970_v22, %v4266_v16  ;;  %v4775_v9 = vld [vmem:[#allocation4 + $0xa4] sm:$0xf0] }
  0x8f   :  { %v4522_v27 = vld [vmem:[#allocation4 + $0x8e0] sm:$0xf0]  ;;  %2362 = vmatmul.bf16.vlgmr.msra.gmra.mxu1 %v5390_v13  ;;  %v5411_v21 = vld [vmem:[#allocation4 + $0xa88] sm:$0x33]  ;;  %v3473_v22 = vor.u32 %v4775_v9, %v3472_v6 }
  0x90   :  { %2410 = vmatpush.bf16.msrb.mxu1 %v3633_v10  ;;  %2371 = vmatpush.bf16.msra.mxu0 %v4301_v17  ;;  %v4962_v33 = vld [vmem:[#allocation4 + $0x684] sm:$0xf]  ;;  %v4525_v35 = vor.u32 %v5034_v26, %v4522_v27  ;;  %v3728_v10 = vld [vmem:[#allocation4 + $0x288] sm:$0xf]  ;;  %v1524_v31 = vunpack.c.l.b16 %v5411_v21 }
  0x91   :  { %v4234_v34 = vld [vmem:[#allocation4 + $0x6a0] sm:$0xf0]  ;;  %2385 = vmatpush.bf16.msra.mxu2 %v4557_v23  ;;  %v3440_v23 = vld [vmem:[#allocation4 + $0x48] sm:$0xf] }
  0x92   :  { %2424 = vmatpush.bf16.msrb.mxu3 %v3889_v11  ;;  %v5026_v39 = vld [vmem:[#allocation4 + $0x884] sm:$0xf]  ;;  %v4237_v42 = vor.u32 %v4962_v33, %v4234_v34  ;;  %v4839_v11 = vld [vmem:[#allocation4 + $0x2a4] sm:$0xf0] }
  0x93   :  { %v4490_v40 = vld [vmem:[#allocation4 + $0x8a0] sm:$0xf0]  ;;  %v3729_v16 = vor.u32 %v4839_v11, %v3728_v10  ;;  %v3696_v26 = vld [vmem:[#allocation4 + $0x248] sm:$0xf] }
  0x94   :  { %2411 = vmatpush.bf16.msrb.mxu1 %v3601_v24  ;;  %2372 = vmatpush.bf16.msra.mxu0 %v4269_v29  ;;  %v4954_v47 = vld [vmem:[#allocation4 + $0x644] sm:$0xf]  ;;  %v4493_v49 = vor.u32 %v5026_v39, %v4490_v40  ;;  %v4767_v24 = vld [vmem:[#allocation4 + $0x64] sm:$0xf0]  ;;  %v4113_v29 = vor.u32 %v4935_v20, %v4112_v18  ;;  %v4939_v18 = vld [vmem:[#allocation4 + $0x5cc] sm:$0xf] }
  0x95   :  { %v4202_v48 = vld [vmem:[#allocation4 + $0x660] sm:$0xf0]  ;;  %2386 = vmatpush.bf16.msra.mxu2 %v4525_v35  ;;  %4743 = vmatmul.msk.bf16.vlgmr.msra.gmra.mxu3 %vm2210_vm2, %v5397_v61  ;;  %v4831_v27 = vld [vmem:[#allocation4 + $0x264] sm:$0xf0]  ;;  %v3441_v34 = vor.u32 %v4767_v24, %v3440_v23  ;;  %v4146_v20 = vld [vmem:[#allocation4 + $0x5e8] sm:$0xf0] }
  0x96   :  { %2425 = vmatpush.bf16.msrb.mxu3 %v3857_v25  ;;  %v5018_v52 = vld [vmem:[#allocation4 + $0x844] sm:$0xf]  ;;  %v4205_v55 = vor.u32 %v4954_v47, %v4202_v48  ;;  %v4401_v25 = vor.u32 %v5007_v15, %v4400_v14  ;;  %v4368_v28 = vld [vmem:[#allocation4 + $0x788] sm:$0xf]  ;;  %v3697_v35 = vor.u32 %v4831_v27, %v3696_v26  ;;  %v1868_v48 = vpack.c.b16 %v1524_v31, %v1524_v31 }
  0x97   :  { %v4458_v53 = vld [vmem:[#allocation4 + $0x860] sm:$0xf0]  ;;  %v4999_v30 = vld [vmem:[#allocation4 + $0x7a4] sm:$0xf0] }
  0x98   :  { %2412 = vmatpush.bf16.msrb.mxu1 %v3569_v37  ;;  %2373 = vmatpush.bf16.msra.mxu0 %v4237_v42  ;;  %v4946_v60 = vld [vmem:[#allocation4 + $0x604] sm:$0xf]  ;;  %v4461_v63 = vor.u32 %v5018_v52, %v4458_v53  ;;  %v4080_v32 = vld [vmem:[#allocation4 + $0x548] sm:$0xf]  ;;  %v4369_v40 = vor.u32 %v4999_v30, %v4368_v28  ;;  %v2225_v58 = vand.u32 %v5382_v36, %v1868_v48  ;;  %v4811_v48 = vld [vmem:[#allocation4 + $0x1cc] sm:$0xf] }
  0x99   :  { %v4170_v62 = vld [vmem:[#allocation4 + $0x620] sm:$0xf0]  ;;  %2387 = vmatpush.bf16.msra.mxu2 %v4493_v49  ;;  %v4927_v33 = vld [vmem:[#allocation4 + $0x564] sm:$0xf0] }
  0x9a   :  { %2426 = vmatpush.bf16.msrb.mxu3 %v3825_v38  ;;  %v5010_v4 = vld [vmem:[#allocation4 + $0x804] sm:$0xf]  ;;  %v4173_v8 = vor.u32 %v4946_v60, %v4170_v62  ;;  %v3408_v37 = vld [vmem:[#allocation4 + $0x8] sm:$0xf]  ;;  %v4081_v43 = vor.u32 %v4927_v33, %v4080_v32  ;;  %v4931_v32 = vld [vmem:[#allocation4 + $0x58c] sm:$0xf] }
  0x9b   :  { %v4426_v5 = vld [vmem:[#allocation4 + $0x820] sm:$0xf0]  ;;  %v4759_v38 = vld [vmem:[#allocation4 + $0x24] sm:$0xf0]  ;;  %v4114_v33 = vld [vmem:[#allocation4 + $0x5a8] sm:$0xf0] }
  0x9c   :  { %2413 = vmatpush.bf16.msrb.mxu1 %v3537_v50  ;;  %2374 = vmatpush.bf16.msra.mxu0 %v4205_v55  ;;  %v4429_v17 = vor.u32 %v5010_v4, %v4426_v5  ;;  %v3664_v39 = vld [vmem:[#allocation4 + $0x208] sm:$0xf] }
  0x9d   :  { %2388 = vmatpush.bf16.msra.mxu2 %v4461_v63  ;;  %v4823_v41 = vld [vmem:[#allocation4 + $0x224] sm:$0xf0] }
  0x9e   :  { %2427 = vmatpush.bf16.msrb.mxu3 %v3793_v51  ;;  %v4336_v42 = vld [vmem:[#allocation4 + $0x748] sm:$0xf]  ;;  %v3409_v51 = vor.u32 %v4759_v38, %v3408_v37  ;;  %v3665_v52 = vor.u32 %v4823_v41, %v3664_v39 }
  0x9f   :  { %v4991_v44 = vld [vmem:[#allocation4 + $0x764] sm:$0xf0] }
  0xa0   :  { %2414 = vmatpush.bf16.msrb.mxu1 %v3505_v2  ;;  %2375 = vmatpush.bf16.msra.mxu0 %v4173_v8  ;;  %v4656_v46 = vld [vmem:[#allocation4 + $0x9c8] sm:$0xf]  ;;  %v4337_v53 = vor.u32 %v4991_v44, %v4336_v42  ;;  %v4117_v42 = vor.u32 %v4931_v32, %v4114_v33  ;;  %v4787_v32 = vld [vmem:[#allocation4 + $0x10c] sm:$0xf] }
  0xa1   :  { %2389 = vmatpush.bf16.msra.mxu2 %v4429_v17  ;;  %v5071_v47 = vld [vmem:[#allocation4 + $0x9e4] sm:$0xf0]  ;;  %v3538_v33 = vld [vmem:[#allocation4 + $0x128] sm:$0xf0] }
  0xa2   :  { %2428 = vmatpush.bf16.msrb.mxu3 %v3761_v3  ;;  %v4048_v49 = vld [vmem:[#allocation4 + $0x508] sm:$0xf]  ;;  %v4657_v54 = vor.u32 %v5071_v47, %v4656_v46  ;;  %v4082_v47 = vld [vmem:[#allocation4 + $0x568] sm:$0xf0] }
  0xa3   :  { %2376 = vmatmul.bf16.vlgmr.msra.gmra.mxu0 %v5394_v19  ;;  %v4919_v50 = vld [vmem:[#allocation4 + $0x524] sm:$0xf0] }
  0xa4   :  { %2438 = vmatpush.bf16.msrb.mxu0 %v4145_v12  ;;  %2415 = vmatpush.bf16.msrb.mxu1 %v3473_v22  ;;  %v4304_v55 = vld [vmem:[#allocation4 + $0x708] sm:$0xf]  ;;  %v4049_v59 = vor.u32 %v4919_v50, %v4048_v49  ;;  %v3634_v49 = vld [vmem:[#allocation4 + $0x1e8] sm:$0xf0] }
  0xa5   :  { %2452 = vmatpush.bf16.msrb.mxu2 %v4401_v25  ;;  %v4983_v56 = vld [vmem:[#allocation4 + $0x724] sm:$0xf0] }
  0xa6   :  { %2429 = vmatpush.bf16.msrb.mxu3 %v3729_v16  ;;  %2390 = vmatmul.bf16.vlgmr.msra.gmra.mxu2 %v5403_v45  ;;  %v4624_v60 = vld [vmem:[#allocation4 + $0x988] sm:$0xf]  ;;  %v4305_v3 = vor.u32 %v4983_v56, %v4304_v55 }
  0xa7   :  { %v5063_v62 = vld [vmem:[#allocation4 + $0x9a4] sm:$0xf0] }
  0xa8   :  { %2439 = vmatpush.bf16.msrb.mxu0 %v4113_v29  ;;  %2416 = vmatpush.bf16.msrb.mxu1 %v3441_v34  ;;  %v4720_v63 = vld [vmem:[#allocation4 + $0xa48] sm:$0xf]  ;;  %v4625_v4 = vor.u32 %v5063_v62, %v4624_v60  ;;  %v4149_v29 = vor.u32 %v4939_v18, %v4146_v20  ;;  %v4875_v60 = vld [vmem:[#allocation4 + $0x3cc] sm:$0xf] }
  0xa9   :  { %2453 = vmatpush.bf16.msrb.mxu2 %v4369_v40  ;;  %v5087_v0 = vld [vmem:[#allocation4 + $0xa64] sm:$0xf0]  ;;  %v3890_v62 = vld [vmem:[#allocation4 + $0x3e8] sm:$0xf0] }
  0xaa   :  { %2430 = vmatpush.bf16.msrb.mxu3 %v3697_v35  ;;  %v4016_v1 = vld [vmem:[#allocation4 + $0x4c8] sm:$0xf]  ;;  %v4721_v8 = vor.u32 %v5087_v0, %v4720_v63  ;;  %v4915_v63 = vld [vmem:[#allocation4 + $0x50c] sm:$0xf] }
  0xab   :  { %v4911_v2 = vld [vmem:[#allocation4 + $0x4e4] sm:$0xf0]  ;;  %v4050_v0 = vld [vmem:[#allocation4 + $0x528] sm:$0xf0] }
  0xac   :  { %2440 = vmatpush.bf16.msrb.mxu0 %v4081_v43  ;;  %2417 = vmatpush.bf16.msrb.mxu1 %v3409_v51  ;;  %v4272_v5 = vld [vmem:[#allocation4 + $0x6c8] sm:$0xf]  ;;  %v4017_v9 = vor.u32 %v4911_v2, %v4016_v1  ;;  %v4923_v43 = vld [vmem:[#allocation4 + $0x54c] sm:$0xf] }
  0xad   :  { %2454 = vmatpush.bf16.msrb.mxu2 %v4337_v53  ;;  %v4975_v6 = vld [vmem:[#allocation4 + $0x6e4] sm:$0xf0]  ;;  %v4803_v1 = vld [vmem:[#allocation4 + $0x18c] sm:$0xf] }
  0xae   :  { %2431 = vmatpush.bf16.msrb.mxu3 %v3665_v52  ;;  %v4592_v10 = vld [vmem:[#allocation4 + $0x948] sm:$0xf]  ;;  %v4273_v22 = vor.u32 %v4975_v6, %v4272_v5  ;;  %v3602_v2 = vld [vmem:[#allocation4 + $0x1a8] sm:$0xf0]  ;;  %v3893_v5 = vor.u32 %v4875_v60, %v3890_v62 }
  0xaf   :  { %v5055_v11 = vld [vmem:[#allocation4 + $0x964] sm:$0xf0]  ;;  %2418 = vmatmul.bf16.vlgmr.msrb.gmra.mxu1 %v5387_v7  ;;  %v3570_v18 = vld [vmem:[#allocation4 + $0x168] sm:$0xf0] }
  0xb0   :  { %2466 = vmatpush.bf16.msra.mxu1 %v4657_v54  ;;  %2441 = vmatpush.bf16.msrb.mxu0 %v4049_v59  ;;  %v4688_v12 = vld [vmem:[#allocation4 + $0xa08] sm:$0xf]  ;;  %v4593_v16 = vor.u32 %v5055_v11, %v4592_v10  ;;  %v3637_v59 = vor.u32 %v4811_v48, %v3634_v49  ;;  %v3605_v10 = vor.u32 %v4803_v1, %v3602_v2  ;;  %v4867_v11 = vld [vmem:[#allocation4 + $0x38c] sm:$0xf] }
  0xb1   :  { %v5079_v14 = vld [vmem:[#allocation4 + $0xa24] sm:$0xf0]  ;;  %2432 = vmatmul.bf16.vlgmr.msrb.gmra.mxu3 %v5385_v57  ;;  %2455 = vmatpush.bf16.msrb.mxu2 %v4305_v3  ;;  %v3506_v48 = vld [vmem:[#allocation4 + $0xe8] sm:$0xf0] }
  0xb2   :  { %2485 = vmatpush.bf16.msra.mxu3 %v2225_v58  ;;  %v3984_v15 = vld [vmem:[#allocation4 + $0x488] sm:$0xf]  ;;  %v4689_v24 = vor.u32 %v5079_v14, %v4688_v12  ;;  %v4085_v58 = vor.u32 %v4923_v43, %v4082_v47  ;;  %v3858_v12 = vld [vmem:[#allocation4 + $0x3a8] sm:$0xf0] }
  0xb3   :  { %v4903_v17 = vld [vmem:[#allocation4 + $0x4a4] sm:$0xf0]  ;;  %v4907_v14 = vld [vmem:[#allocation4 + $0x4cc] sm:$0xf] }
  0xb4   :  { %2467 = vmatpush.bf16.msra.mxu1 %v4625_v4  ;;  %v4240_v23 = vld [vmem:[#allocation4 + $0x688] sm:$0xf]  ;;  %2442 = vmatpush.bf16.msrb.mxu0 %v4017_v9  ;;  %v3985_v25 = vor.u32 %v4903_v17, %v3984_v15  ;;  %v4053_v9 = vor.u32 %v4915_v63, %v4050_v0  ;;  %v4018_v15 = vld [vmem:[#allocation4 + $0x4e8] sm:$0xf0]  ;;  %v3640_v63 = vld [vmem:[#allocation4 + $0x1d0] sm:$0xf] }
  0xb5   :  { %v4967_v26 = vld [vmem:[#allocation4 + $0x6a4] sm:$0xf0]  ;;  %2456 = vmatpush.bf16.msrb.mxu2 %v4273_v22  ;;  %v4795_v17 = vld [vmem:[#allocation4 + $0x14c] sm:$0xf]  ;;  %v4816_v0 = vld [vmem:[#allocation4 + $0x1ec] sm:$0xf0] }
  0xb6   :  { %2486 = vmatpush.bf16.msra.mxu3 %v4721_v8  ;;  %v4560_v27 = vld [vmem:[#allocation4 + $0x908] sm:$0xf]  ;;  %v4241_v34 = vor.u32 %v4967_v26, %v4240_v23  ;;  %v4021_v26 = vor.u32 %v4907_v14, %v4018_v15  ;;  %v4995_v43 = vld [vmem:[#allocation4 + $0x78c] sm:$0xf]  ;;  %v3608_v14 = vld [vmem:[#allocation4 + $0x190] sm:$0xf] }
  0xb7   :  { %v5047_v28 = vld [vmem:[#allocation4 + $0x924] sm:$0xf0]  ;;  %v4779_v47 = vld [vmem:[#allocation4 + $0xcc] sm:$0xf]  ;;  %v4808_v15 = vld [vmem:[#allocation4 + $0x1ac] sm:$0xf0] }
  0xb8   :  { %v3952_v30 = vld [vmem:[#allocation4 + $0x448] sm:$0xf]  ;;  %2468 = vmatpush.bf16.msra.mxu1 %v4593_v16  ;;  %v4561_v35 = vor.u32 %v5047_v28, %v4560_v27  ;;  %2443 = vmatpush.bf16.msrb.mxu0 %v3985_v25  ;;  %v3861_v16 = vor.u32 %v4867_v11, %v3858_v12  ;;  %v3826_v25 = vld [vmem:[#allocation4 + $0x368] sm:$0xf0]  ;;  %v3573_v27 = vor.u32 %v4795_v17, %v3570_v18 }
  0xb9   :  { %v4895_v31 = vld [vmem:[#allocation4 + $0x464] sm:$0xf0]  ;;  %2457 = vmatpush.bf16.msrb.mxu2 %v4241_v34  ;;  %v4899_v28 = vld [vmem:[#allocation4 + $0x48c] sm:$0xf] }
  0xba   :  { %v4208_v37 = vld [vmem:[#allocation4 + $0x648] sm:$0xf]  ;;  %2487 = vmatpush.bf16.msra.mxu3 %v4689_v24  ;;  %v3953_v38 = vor.u32 %v4895_v31, %v3952_v30  ;;  %v4859_v24 = vld [vmem:[#allocation4 + $0x34c] sm:$0xf] }
  0xbb   :  { %v4959_v39 = vld [vmem:[#allocation4 + $0x664] sm:$0xf0]  ;;  %v4402_v30 = vld [vmem:[#allocation4 + $0x7e8] sm:$0xf0] }
  0xbc   :  { %v4528_v40 = vld [vmem:[#allocation4 + $0x8c8] sm:$0xf]  ;;  %2469 = vmatpush.bf16.msra.mxu1 %v4561_v35  ;;  %v4209_v50 = vor.u32 %v4959_v39, %v4208_v37  ;;  %2444 = vmatpush.bf16.msrb.mxu0 %v3953_v38  ;;  %v3986_v31 = vld [vmem:[#allocation4 + $0x4a8] sm:$0xf0]  ;;  %v3829_v35 = vor.u32 %v4859_v24, %v3826_v25  ;;  %v1525_v25 = vunpack.c.h.b16 %v5411_v21 }
  0xbd   :  { %v5039_v41 = vld [vmem:[#allocation4 + $0x8e4] sm:$0xf0]  ;;  %v4851_v38 = vld [vmem:[#allocation4 + $0x30c] sm:$0xf] }
  0xbe   :  { %2522 = vmatpush.bf16.msrb.mxu3 %v4149_v29  ;;  %v3920_v44 = vld [vmem:[#allocation4 + $0x408] sm:$0xf]  ;;  %v4529_v51 = vor.u32 %v5039_v41, %v4528_v40  ;;  %2458 = vmatpush.bf16.msrb.mxu2 %v4209_v50  ;;  %v5003_v29 = vld [vmem:[#allocation4 + $0x7cc] sm:$0xf]  ;;  %v3989_v40 = vor.u32 %v4899_v28, %v3986_v31  ;;  %v3541_v41 = vor.u32 %v4787_v32, %v3538_v33 }
  0xbf   :  { %v4887_v46 = vld [vmem:[#allocation4 + $0x424] sm:$0xf0]  ;;  %v4405_v37 = vor.u32 %v5003_v29, %v4402_v30  ;;  %v3794_v39 = vld [vmem:[#allocation4 + $0x328] sm:$0xf0]  ;;  %v4800_v30 = vld [vmem:[#allocation4 + $0x16c] sm:$0xf0] }
  0xc0   :  { %v4176_v52 = vld [vmem:[#allocation4 + $0x608] sm:$0xf]  ;;  %v3921_v53 = vor.u32 %v4887_v46, %v3920_v44  ;;  %2470 = vmatpush.bf16.msra.mxu1 %v4529_v51  ;;  %v4370_v44 = vld [vmem:[#allocation4 + $0x7a8] sm:$0xf0]  ;;  %v3797_v49 = vor.u32 %v4851_v38, %v3794_v39 }
  0xc1   :  { %v4951_v54 = vld [vmem:[#allocation4 + $0x624] sm:$0xf0]  ;;  %4744 = vmatmul.msk.bf16.vlgmr.msra.gmra.mxu3 %vm2210_vm2, %v5397_v61  ;;  %v3954_v46 = vld [vmem:[#allocation4 + $0x468] sm:$0xf0]  ;;  %v4373_v50 = vor.u32 %v4995_v43, %v4370_v44  ;;  %v3544_v43 = vld [vmem:[#allocation4 + $0x110] sm:$0xf] }
  0xc2   :  { %v4496_v55 = vld [vmem:[#allocation4 + $0x888] sm:$0xf]  ;;  %2523 = vmatpush.bf16.msrb.mxu3 %v4117_v42  ;;  %v4177_v3 = vor.u32 %v4951_v54, %v4176_v52  ;;  %2445 = vmatpush.bf16.msrb.mxu0 %v3921_v53  ;;  %v4891_v42 = vld [vmem:[#allocation4 + $0x44c] sm:$0xf]  ;;  %v3509_v54 = vor.u32 %v4779_v47, %v3506_v48  ;;  %v4792_v44 = vld [vmem:[#allocation4 + $0x12c] sm:$0xf0] }
  0xc3   :  { %v5031_v56 = vld [vmem:[#allocation4 + $0x8a4] sm:$0xf0]  ;;  %v4843_v51 = vld [vmem:[#allocation4 + $0x2cc] sm:$0xf]  ;;  %v3957_v53 = vor.u32 %v4891_v42, %v3954_v46 }
  0xc4   :  { %v4497_v4 = vor.u32 %v5031_v56, %v4496_v55  ;;  %v4464_v6 = vld [vmem:[#allocation4 + $0x848] sm:$0xf]  ;;  %2459 = vmatpush.bf16.msrb.mxu2 %v4177_v3  ;;  %v3762_v52 = vld [vmem:[#allocation4 + $0x2e8] sm:$0xf0] }
  0xc5   :  { %v5023_v8 = vld [vmem:[#allocation4 + $0x864] sm:$0xf0]  ;;  %2446 = vmatmul.bf16.vlgmr.msrb.gmra.mxu0 %v5390_v13  ;;  %v4883_v55 = vld [vmem:[#allocation4 + $0x40c] sm:$0xf]  ;;  %v3765_v1 = vor.u32 %v4843_v51, %v3762_v52 }
  0xc6   :  { %2524 = vmatpush.bf16.msrb.mxu3 %v4085_v58  ;;  %2494 = vmatpush.bf16.msra.mxu0 %v3637_v59  ;;  %v4465_v20 = vor.u32 %v5023_v8, %v4464_v6  ;;  %v4432_v22 = vld [vmem:[#allocation4 + $0x808] sm:$0xf]  ;;  %v4987_v56 = vld [vmem:[#allocation4 + $0x74c] sm:$0xf] }
  0xc7   :  { %2471 = vmatpush.bf16.msra.mxu1 %v4497_v4  ;;  %v5015_v23 = vld [vmem:[#allocation4 + $0x824] sm:$0xf0]  ;;  %2460 = vmatmul.bf16.vlgmr.msrb.gmra.mxu2 %v5394_v19  ;;  %v4338_v58 = vld [vmem:[#allocation4 + $0x768] sm:$0xf0] }
  0xc8   :  { %2508 = vmatpush.bf16.msra.mxu2 %v3893_v5  ;;  %v4433_v34 = vor.u32 %v5015_v23, %v4432_v22  ;;  %v3922_v59 = vld [vmem:[#allocation4 + $0x428] sm:$0xf0]  ;;  %v4341_v2 = vor.u32 %v4987_v56, %v4338_v58  ;;  %v3512_v58 = vld [vmem:[#allocation4 + $0xd0] sm:$0xf] }
  0xc9   :  { %v4771_v60 = vld [vmem:[#allocation4 + $0x8c] sm:$0xf]  ;;  %v3925_v4 = vor.u32 %v4883_v55, %v3922_v59  ;;  %v4784_v59 = vld [vmem:[#allocation4 + $0xec] sm:$0xf0] }
  0xca   :  { %2525 = vmatpush.bf16.msrb.mxu3 %v4053_v9  ;;  %2495 = vmatpush.bf16.msra.mxu0 %v3605_v10  ;;  %v3474_v62 = vld [vmem:[#allocation4 + $0xa8] sm:$0xf0]  ;;  %v3641_v10 = vor.u32 %v4816_v0, %v3640_v63 }
  0xcb   :  { %2472 = vmatpush.bf16.msra.mxu1 %v4465_v20  ;;  %v4835_v3 = vld [vmem:[#allocation4 + $0x28c] sm:$0xf]  ;;  %v3477_v5 = vor.u32 %v4771_v60, %v3474_v62 }
  0xcc   :  { %2509 = vmatpush.bf16.msra.mxu2 %v3861_v16  ;;  %v3730_v6 = vld [vmem:[#allocation4 + $0x2a8] sm:$0xf0] }
  0xcd   :  { %v4979_v8 = vld [vmem:[#allocation4 + $0x70c] sm:$0xf]  ;;  %v3733_v17 = vor.u32 %v4835_v3, %v3730_v6 }
  0xce   :  { %2526 = vmatpush.bf16.msrb.mxu3 %v4021_v26  ;;  %2496 = vmatpush.bf16.msra.mxu0 %v3573_v27  ;;  %v4306_v9 = vld [vmem:[#allocation4 + $0x728] sm:$0xf0]  ;;  %v3609_v26 = vor.u32 %v4808_v15, %v3608_v14  ;;  %v3576_v27 = vld [vmem:[#allocation4 + $0x150] sm:$0xf] }
  0xcf   :  { %2473 = vmatpush.bf16.msra.mxu1 %v4433_v34  ;;  %v4763_v11 = vld [vmem:[#allocation4 + $0x4c] sm:$0xf]  ;;  %v4309_v18 = vor.u32 %v4979_v8, %v4306_v9  ;;  %v3577_v21 = vor.u32 %v4800_v30, %v3576_v27  ;;  %v3480_v8 = vld [vmem:[#allocation4 + $0x90] sm:$0xf] }
  0xd0   :  { %2510 = vmatpush.bf16.msra.mxu2 %v3829_v35  ;;  %v3442_v12 = vld [vmem:[#allocation4 + $0x68] sm:$0xf0]  ;;  %v3896_v9 = vld [vmem:[#allocation4 + $0x3d0] sm:$0xf] }
  0xd1   :  { %v4827_v20 = vld [vmem:[#allocation4 + $0x24c] sm:$0xf]  ;;  %v3445_v22 = vor.u32 %v4763_v11, %v3442_v12  ;;  %v4776_v11 = vld [vmem:[#allocation4 + $0xac] sm:$0xf0] }
  0xd2   :  { %2527 = vmatpush.bf16.msrb.mxu3 %v3989_v40  ;;  %2497 = vmatpush.bf16.msra.mxu0 %v3541_v41  ;;  %v3698_v16 = vld [vmem:[#allocation4 + $0x268] sm:$0xf0]  ;;  %v1869_v41 = vpack.c.b16 %v1525_v25, %v1525_v25  ;;  %v4152_v12 = vld [vmem:[#allocation4 + $0x5d0] sm:$0xf] }
  0xd3   :  { %2536 = vmatpush.bf16.msrb.mxu1 %v4405_v37  ;;  %v4971_v23 = vld [vmem:[#allocation4 + $0x6cc] sm:$0xf]  ;;  %v3701_v33 = vor.u32 %v4827_v20, %v3698_v16  ;;  %v4944_v14 = vld [vmem:[#allocation4 + $0x5ec] sm:$0xf0]  ;;  %v3481_v16 = vor.u32 %v4776_v11, %v3480_v8 }
  0xd4   :  { %2474 = vmatmul.bf16.vlgmr.msra.gmra.mxu1 %v5403_v45  ;;  %2511 = vmatpush.bf16.msra.mxu2 %v3797_v49  ;;  %v4274_v24 = vld [vmem:[#allocation4 + $0x6e8] sm:$0xf0]  ;;  %v3864_v25 = vld [vmem:[#allocation4 + $0x390] sm:$0xf] }
  0xd5   :  { %v4755_v28 = vld [vmem:[#allocation4 + $0xc] sm:$0xf]  ;;  %v4277_v34 = vor.u32 %v4971_v23, %v4274_v24  ;;  %v4153_v23 = vor.u32 %v4944_v14, %v4152_v12  ;;  %v3448_v24 = vld [vmem:[#allocation4 + $0x50] sm:$0xf] }
  0xd6   :  { %2528 = vmatpush.bf16.msrb.mxu3 %v3957_v53  ;;  %2498 = vmatpush.bf16.msra.mxu0 %v3509_v54  ;;  %v3410_v29 = vld [vmem:[#allocation4 + $0x28] sm:$0xf0]  ;;  %v3545_v53 = vor.u32 %v4792_v44, %v3544_v43  ;;  %v4936_v30 = vld [vmem:[#allocation4 + $0x5ac] sm:$0xf0] }
  0xd7   :  { %2537 = vmatpush.bf16.msrb.mxu1 %v4373_v50  ;;  %v5067_v31 = vld [vmem:[#allocation4 + $0x9cc] sm:$0xf]  ;;  %v3413_v37 = vor.u32 %v4755_v28, %v3410_v29  ;;  %v2228_v50 = vand.u32 %v5382_v36, %v1869_v41  ;;  %v4768_v28 = vld [vmem:[#allocation4 + $0x6c] sm:$0xf0] }
  0xd8   :  { %2512 = vmatpush.bf16.msra.mxu2 %v3765_v1  ;;  %v4658_v32 = vld [vmem:[#allocation4 + $0x9e8] sm:$0xf0]  ;;  %v4120_v29 = vld [vmem:[#allocation4 + $0x590] sm:$0xf] }
  0xd9   :  { %v4819_v35 = vld [vmem:[#allocation4 + $0x20c] sm:$0xf]  ;;  %v4661_v42 = vor.u32 %v5067_v31, %v4658_v32  ;;  %v4664_v43 = vld [vmem:[#allocation4 + $0x9d0] sm:$0xf] }
  0xda   :  { %2529 = vmatpush.bf16.msrb.mxu3 %v3925_v4  ;;  %2499 = vmatpush.bf16.msra.mxu0 %v3477_v5  ;;  %v3666_v38 = vld [vmem:[#allocation4 + $0x228] sm:$0xf0]  ;;  %v3513_v5 = vor.u32 %v4784_v59, %v3512_v58  ;;  %v5072_v44 = vld [vmem:[#allocation4 + $0x9ec] sm:$0xf0] }
  0xdb   :  { %2538 = vmatpush.bf16.msrb.mxu1 %v4341_v2  ;;  %v4963_v39 = vld [vmem:[#allocation4 + $0x68c] sm:$0xf]  ;;  %v3669_v48 = vor.u32 %v4819_v35, %v3666_v38  ;;  %v3449_v35 = vor.u32 %v4768_v28, %v3448_v24  ;;  %v4760_v38 = vld [vmem:[#allocation4 + $0x2c] sm:$0xf0] }
  0xdc   :  { %2513 = vmatpush.bf16.msra.mxu2 %v3733_v17  ;;  %v4242_v40 = vld [vmem:[#allocation4 + $0x6a8] sm:$0xf0]  ;;  %v4632_v58 = vld [vmem:[#allocation4 + $0x990] sm:$0xf] }
  0xdd   :  { %2530 = vmatmul.bf16.vlgmr.msrb.gmra.mxu3 %v5390_v13  ;;  %v5059_v46 = vld [vmem:[#allocation4 + $0x98c] sm:$0xf]  ;;  %v4245_v49 = vor.u32 %v4963_v39, %v4242_v40  ;;  %v3832_v39 = vld [vmem:[#allocation4 + $0x350] sm:$0xf] }
  0xde   :  { %2578 = vmatpush.bf16.msra.mxu3 %v3641_v10  ;;  %2500 = vmatpush.bf16.msra.mxu0 %v3445_v22  ;;  %v4626_v47 = vld [vmem:[#allocation4 + $0x9a8] sm:$0xf0]  ;;  %v4880_v10 = vld [vmem:[#allocation4 + $0x3ec] sm:$0xf0] }
  0xdf   :  { %2539 = vmatpush.bf16.msrb.mxu1 %v4309_v18  ;;  %v4955_v51 = vld [vmem:[#allocation4 + $0x64c] sm:$0xf]  ;;  %v4629_v54 = vor.u32 %v5059_v46, %v4626_v47  ;;  %v3897_v22 = vor.u32 %v4880_v10, %v3896_v9  ;;  %v4864_v40 = vld [vmem:[#allocation4 + $0x36c] sm:$0xf0] }
  0xe0   :  { %2514 = vmatpush.bf16.msra.mxu2 %v3701_v33  ;;  %v4210_v52 = vld [vmem:[#allocation4 + $0x668] sm:$0xf0]  ;;  %v5064_v59 = vld [vmem:[#allocation4 + $0x9ac] sm:$0xf0] }
  0xe1   :  { %v5083_v55 = vld [vmem:[#allocation4 + $0xa4c] sm:$0xf]  ;;  %v4213_v63 = vor.u32 %v4955_v51, %v4210_v52  ;;  %v3800_v51 = vld [vmem:[#allocation4 + $0x310] sm:$0xf] }
  0xe2   :  { %2579 = vmatpush.bf16.msra.mxu3 %v3609_v26  ;;  %2501 = vmatpush.bf16.msra.mxu0 %v3413_v37  ;;  %v4722_v56 = vld [vmem:[#allocation4 + $0xa68] sm:$0xf0]  ;;  %v4872_v26 = vld [vmem:[#allocation4 + $0x3ac] sm:$0xf0]  ;;  %v4121_v37 = vor.u32 %v4936_v30, %v4120_v29 }
  0xe3   :  { %2540 = vmatpush.bf16.msrb.mxu1 %v4277_v34  ;;  %v5051_v60 = vld [vmem:[#allocation4 + $0x94c] sm:$0xf]  ;;  %v4725_v1 = vor.u32 %v5083_v55, %v4722_v56  ;;  %v3865_v33 = vor.u32 %v4872_v26, %v3864_v25  ;;  %v3416_v34 = vld [vmem:[#allocation4 + $0x10] sm:$0xf] }
  0xe4   :  { %v4594_v62 = vld [vmem:[#allocation4 + $0x968] sm:$0xf0]  ;;  %2515 = vmatpush.bf16.msra.mxu2 %v3669_v48  ;;  %v3833_v48 = vor.u32 %v4864_v40, %v3832_v39  ;;  %v4856_v52 = vld [vmem:[#allocation4 + $0x32c] sm:$0xf0] }
  0xe5   :  { %v4947_v0 = vld [vmem:[#allocation4 + $0x60c] sm:$0xf]  ;;  %2502 = vmatmul.bf16.vlgmr.msra.gmra.mxu0 %v5387_v7  ;;  %v4597_v6 = vor.u32 %v5051_v60, %v4594_v62  ;;  %v4056_v55 = vld [vmem:[#allocation4 + $0x510] sm:$0xf] }
  0xe6   :  { %2580 = vmatpush.bf16.msra.mxu3 %v3577_v21  ;;  %2550 = vmatpush.bf16.msrb.mxu0 %v4661_v42  ;;  %v4178_v2 = vld [vmem:[#allocation4 + $0x628] sm:$0xf0]  ;;  %v4088_v21 = vld [vmem:[#allocation4 + $0x550] sm:$0xf] }
  0xe7   :  { %2541 = vmatpush.bf16.msrb.mxu1 %v4245_v49  ;;  %v5075_v3 = vld [vmem:[#allocation4 + $0xa0c] sm:$0xf]  ;;  %2516 = vmatmul.bf16.vlgmr.msra.gmra.mxu2 %v5385_v57  ;;  %v4181_v15 = vor.u32 %v4947_v0, %v4178_v2  ;;  %v4928_v42 = vld [vmem:[#allocation4 + $0x56c] sm:$0xf0]  ;;  %v3417_v49 = vor.u32 %v4760_v38, %v3416_v34 }
  0xe8   :  { %2569 = vmatpush.bf16.msrb.mxu2 %v2228_v50  ;;  %v4690_v4 = vld [vmem:[#allocation4 + $0xa28] sm:$0xf0]  ;;  %v4089_v50 = vor.u32 %v4928_v42, %v4088_v21  ;;  %v4920_v56 = vld [vmem:[#allocation4 + $0x52c] sm:$0xf0] }
  0xe9   :  { %v5043_v17 = vld [vmem:[#allocation4 + $0x90c] sm:$0xf]  ;;  %v4693_v20 = vor.u32 %v5075_v3, %v4690_v4  ;;  %v4057_v0 = vor.u32 %v4920_v56, %v4056_v55  ;;  %v4848_v2 = vld [vmem:[#allocation4 + $0x2ec] sm:$0xf0]  ;;  %v4633_v3 = vor.u32 %v5064_v59, %v4632_v58  ;;  %v4812_v56 = vld [vmem:[#allocation4 + $0x1d4] sm:$0xf] }
  0xea   :  { %2581 = vmatpush.bf16.msra.mxu3 %v3545_v53  ;;  %2551 = vmatpush.bf16.msrb.mxu0 %v4629_v54  ;;  %v4562_v18 = vld [vmem:[#allocation4 + $0x928] sm:$0xf0]  ;;  %v4665_v53 = vor.u32 %v5072_v44, %v4664_v43  ;;  %v4600_v8 = vld [vmem:[#allocation4 + $0x950] sm:$0xf]  ;;  %v3642_v58 = vld [vmem:[#allocation4 + $0x1f0] sm:$0xf0] }
  0xeb   :  { %2542 = vmatpush.bf16.msrb.mxu1 %v4213_v63  ;;  %v4565_v27 = vor.u32 %v5043_v17, %v4562_v18  ;;  %v5035_v31 = vld [vmem:[#allocation4 + $0x8cc] sm:$0xf]  ;;  %v3801_v63 = vor.u32 %v4856_v52, %v3800_v51  ;;  %v5056_v9 = vld [vmem:[#allocation4 + $0x96c] sm:$0xf0] }
  0xec   :  { %2570 = vmatpush.bf16.msrb.mxu2 %v4725_v1  ;;  %v4530_v32 = vld [vmem:[#allocation4 + $0x8e8] sm:$0xf0]  ;;  %v3768_v1 = vld [vmem:[#allocation4 + $0x2d0] sm:$0xf] }
  0xed   :  { %v4533_v41 = vor.u32 %v5035_v31, %v4530_v32  ;;  %v5027_v46 = vld [vmem:[#allocation4 + $0x88c] sm:$0xf]  ;;  %v3769_v12 = vor.u32 %v4848_v2, %v3768_v1  ;;  %v4408_v14 = vld [vmem:[#allocation4 + $0x7d0] sm:$0xf]  ;;  %v3645_v2 = vor.u32 %v4812_v56, %v3642_v58  ;;  %v4988_v56 = vld [vmem:[#allocation4 + $0x754] sm:$0xf] }
  0xee   :  { %2582 = vmatpush.bf16.msra.mxu3 %v3513_v5  ;;  %2552 = vmatpush.bf16.msrb.mxu0 %v4597_v6  ;;  %v4498_v47 = vld [vmem:[#allocation4 + $0x8a8] sm:$0xf0]  ;;  %v4024_v5 = vld [vmem:[#allocation4 + $0x4d0] sm:$0xf]  ;;  %v4346_v58 = vld [vmem:[#allocation4 + $0x770] sm:$0xf0] }
  0xef   :  { %2543 = vmatpush.bf16.msrb.mxu1 %v4181_v15  ;;  %v4501_v54 = vor.u32 %v5027_v46, %v4498_v47  ;;  %v5019_v60 = vld [vmem:[#allocation4 + $0x84c] sm:$0xf]  ;;  %v4912_v6 = vld [vmem:[#allocation4 + $0x4ec] sm:$0xf0] }
  0xf0   :  { %2571 = vmatpush.bf16.msrb.mxu2 %v4693_v20  ;;  %v4466_v62 = vld [vmem:[#allocation4 + $0x868] sm:$0xf0]  ;;  %v5008_v15 = vld [vmem:[#allocation4 + $0x7ec] sm:$0xf0]  ;;  %v4025_v17 = vor.u32 %v4912_v6, %v4024_v5 }
  0xf1   :  { %v4469_v4 = vor.u32 %v5019_v60, %v4466_v62  ;;  %v5011_v10 = vld [vmem:[#allocation4 + $0x80c] sm:$0xf]  ;;  %v3736_v18 = vld [vmem:[#allocation4 + $0x290] sm:$0xf]  ;;  %v4409_v26 = vor.u32 %v5008_v15, %v4408_v14 }
  0xf2   :  { %2583 = vmatpush.bf16.msra.mxu3 %v3481_v16  ;;  %2553 = vmatpush.bf16.msrb.mxu0 %v4565_v27  ;;  %v4434_v11 = vld [vmem:[#allocation4 + $0x828] sm:$0xf0]  ;;  %v4840_v20 = vld [vmem:[#allocation4 + $0x2ac] sm:$0xf0] }
  0xf3   :  { %2592 = vmatpush.bf16.msra.mxu1 %v3897_v22  ;;  %v4601_v22 = vor.u32 %v5056_v9, %v4600_v8  ;;  %v4437_v16 = vor.u32 %v5011_v10, %v4434_v11  ;;  %v4904_v24 = vld [vmem:[#allocation4 + $0x4ac] sm:$0xf0]  ;;  %v3737_v29 = vor.u32 %v4840_v20, %v3736_v18  ;;  %v4804_v9 = vld [vmem:[#allocation4 + $0x194] sm:$0xf] }
  0xf4   :  { %2606 = vmatpush.bf16.msra.mxu2 %v4153_v23  ;;  %2544 = vmatmul.bf16.vlgmr.msrb.gmra.mxu1 %v5394_v19  ;;  %v3992_v23 = vld [vmem:[#allocation4 + $0x490] sm:$0xf]  ;;  %v3610_v10 = vld [vmem:[#allocation4 + $0x1b0] sm:$0xf0] }
  0xf5   :  { %v5433_v25 = vld [vmem:[#allocation4 + $0xa90] sm:$0x33]  ;;  %v3993_v32 = vor.u32 %v4904_v24, %v3992_v23  ;;  %v3613_v18 = vor.u32 %v4804_v9, %v3610_v10 }
  0xf6   :  { %2584 = vmatpush.bf16.msra.mxu3 %v3449_v35  ;;  %2554 = vmatpush.bf16.msrb.mxu0 %v4533_v41  ;;  %v4568_v27 = vld [vmem:[#allocation4 + $0x910] sm:$0xf]  ;;  %v1526_v35 = vunpack.c.l.b16 %v5433_v25  ;;  %v4796_v24 = vld [vmem:[#allocation4 + $0x154] sm:$0xf] }
  0xf7   :  { %2593 = vmatpush.bf16.msra.mxu1 %v3865_v33  ;;  %4745 = vmatmul.msk.bf16.vlgmr.msrb.gmra.mxu2 %vm2210_vm2, %v5397_v61  ;;  %v5048_v28 = vld [vmem:[#allocation4 + $0x92c] sm:$0xf0]  ;;  %v4980_v9 = vld [vmem:[#allocation4 + $0x714] sm:$0xf] }
  0xf8   :  { %2607 = vmatpush.bf16.msra.mxu2 %v4121_v37  ;;  %v4376_v30 = vld [vmem:[#allocation4 + $0x790] sm:$0xf]  ;;  %v4569_v37 = vor.u32 %v5048_v28, %v4568_v27  ;;  %v4940_v27 = vld [vmem:[#allocation4 + $0x5d4] sm:$0xf] }
  0xf9   :  { %v5000_v31 = vld [vmem:[#allocation4 + $0x7ac] sm:$0xf0]  ;;  %v4154_v28 = vld [vmem:[#allocation4 + $0x5f0] sm:$0xf0] }
  0xfa   :  { %2585 = vmatpush.bf16.msra.mxu3 %v3417_v49  ;;  %2555 = vmatpush.bf16.msrb.mxu0 %v4501_v54  ;;  %v3704_v33 = vld [vmem:[#allocation4 + $0x250] sm:$0xf]  ;;  %v4377_v40 = vor.u32 %v5000_v31, %v4376_v30  ;;  %v1870_v49 = vpack.c.b16 %v1526_v35, %v1526_v35  ;;  %v4410_v30 = vld [vmem:[#allocation4 + $0x7f0] sm:$0xf0] }
  0xfb   :  { %2594 = vmatpush.bf16.msra.mxu1 %v3833_v48  ;;  %v4832_v34 = vld [vmem:[#allocation4 + $0x26c] sm:$0xf0]  ;;  %v4314_v10 = vld [vmem:[#allocation4 + $0x730] sm:$0xf0] }
  0xfc   :  { %2608 = vmatpush.bf16.msra.mxu2 %v4089_v50  ;;  %v3960_v38 = vld [vmem:[#allocation4 + $0x450] sm:$0xf]  ;;  %v3705_v42 = vor.u32 %v4832_v34, %v3704_v33 }
  0xfd   :  { %2586 = vmatmul.bf16.vlgmr.msra.gmra.mxu3 %v5387_v7  ;;  %v4896_v39 = vld [vmem:[#allocation4 + $0x46c] sm:$0xf0] }
  0xfe   :  { %2634 = vmatpush.bf16.msrb.mxu3 %v4665_v53  ;;  %2556 = vmatpush.bf16.msrb.mxu0 %v4469_v4  ;;  %v4536_v41 = vld [vmem:[#allocation4 + $0x8d0] sm:$0xf]  ;;  %v3961_v46 = vor.u32 %v4896_v39, %v3960_v38  ;;  %v4788_v39 = vld [vmem:[#allocation4 + $0x114] sm:$0xf] }
  0xff   :  { %2595 = vmatpush.bf16.msra.mxu1 %v3801_v63  ;;  %v5040_v21 = vld [vmem:[#allocation4 + $0x8ec] sm:$0xf0] }
 0x100   :  { %2609 = vmatpush.bf16.msra.mxu2 %v4057_v0  ;;  %v4344_v43 = vld [vmem:[#allocation4 + $0x750] sm:$0xf]  ;;  %v4537_v50 = vor.u32 %v5040_v21, %v4536_v41  ;;  %v2231_v0 = vand.u32 %v5382_v36, %v1870_v49  ;;  %v4932_v41 = vld [vmem:[#allocation4 + $0x594] sm:$0xf] }
 0x101   :  { %v4992_v44 = vld [vmem:[#allocation4 + $0x76c] sm:$0xf0] }
 0x102   :  { %2635 = vmatpush.bf16.msrb.mxu3 %v4633_v3  ;;  %2557 = vmatpush.bf16.msrb.mxu0 %v4437_v16  ;;  %v3672_v47 = vld [vmem:[#allocation4 + $0x210] sm:$0xf]  ;;  %v4345_v54 = vor.u32 %v4992_v44, %v4344_v43  ;;  %v4996_v43 = vld [vmem:[#allocation4 + $0x794] sm:$0xf] }
 0x103   :  { %2596 = vmatpush.bf16.msra.mxu1 %v3769_v12  ;;  %v4824_v48 = vld [vmem:[#allocation4 + $0x22c] sm:$0xf0]  ;;  %v4378_v44 = vld [vmem:[#allocation4 + $0x7b0] sm:$0xf0] }
 0x104   :  { %2610 = vmatpush.bf16.msra.mxu2 %v4025_v17  ;;  %v3928_v51 = vld [vmem:[#allocation4 + $0x410] sm:$0xf]  ;;  %v3673_v59 = vor.u32 %v4824_v48, %v3672_v47 }
 0x105   :  { %2558 = vmatmul.bf16.vlgmr.msrb.gmra.mxu0 %v5403_v45  ;;  %v4888_v52 = vld [vmem:[#allocation4 + $0x42c] sm:$0xf0] }
 0x106   :  { %2636 = vmatpush.bf16.msrb.mxu3 %v4601_v22  ;;  %2620 = vmatpush.bf16.msra.mxu0 %v4409_v26  ;;  %v4504_v53 = vld [vmem:[#allocation4 + $0x890] sm:$0xf]  ;;  %v3929_v63 = vor.u32 %v4888_v52, %v3928_v51  ;;  %v3578_v26 = vld [vmem:[#allocation4 + $0x170] sm:$0xf0] }
 0x107   :  { %2597 = vmatpush.bf16.msra.mxu1 %v3737_v29  ;;  %v5032_v55 = vld [vmem:[#allocation4 + $0x8ac] sm:$0xf0]  ;;  %v5004_v29 = vld [vmem:[#allocation4 + $0x7d4] sm:$0xf]  ;;  %v3581_v35 = vor.u32 %v4796_v24, %v3578_v26 }
 0x108   :  { %2611 = vmatpush.bf16.msra.mxu2 %v3993_v32  ;;  %v4312_v60 = vld [vmem:[#allocation4 + $0x710] sm:$0xf]  ;;  %v4505_v1 = vor.u32 %v5032_v55, %v4504_v53  ;;  %v4413_v38 = vor.u32 %v5004_v29, %v4410_v30  ;;  %v4780_v51 = vld [vmem:[#allocation4 + $0xd4] sm:$0xf] }
 0x109   :  { %v4984_v62 = vld [vmem:[#allocation4 + $0x72c] sm:$0xf0]  ;;  %v3514_v52 = vld [vmem:[#allocation4 + $0xf0] sm:$0xf0] }
 0x10a   :  { %2637 = vmatpush.bf16.msrb.mxu3 %v4569_v37  ;;  %2621 = vmatpush.bf16.msra.mxu0 %v4377_v40  ;;  %v4472_v3 = vld [vmem:[#allocation4 + $0x850] sm:$0xf]  ;;  %v4313_v6 = vor.u32 %v4984_v62, %v4312_v60  ;;  %v4157_v37 = vor.u32 %v4940_v27, %v4154_v28  ;;  %v3546_v40 = vld [vmem:[#allocation4 + $0x130] sm:$0xf0]  ;;  %v3517_v62 = vor.u32 %v4780_v51, %v3514_v52 }
 0x10b   :  { %2598 = vmatpush.bf16.msra.mxu1 %v3705_v42  ;;  %v4728_v4 = vld [vmem:[#allocation4 + $0xa50] sm:$0xf]  ;;  %v4122_v42 = vld [vmem:[#allocation4 + $0x5b0] sm:$0xf0]  ;;  %v3549_v48 = vor.u32 %v4788_v39, %v3546_v40 }
 0x10c   :  { %2612 = vmatpush.bf16.msra.mxu2 %v3961_v46  ;;  %v5088_v5 = vld [vmem:[#allocation4 + $0xa6c] sm:$0xf0]  ;;  %v4125_v49 = vor.u32 %v4932_v41, %v4122_v42  ;;  %v4924_v53 = vld [vmem:[#allocation4 + $0x554] sm:$0xf] }
 0x10d   :  { %v5024_v8 = vld [vmem:[#allocation4 + $0x86c] sm:$0xf0]  ;;  %v4729_v14 = vor.u32 %v5088_v5, %v4728_v4  ;;  %v4090_v55 = vld [vmem:[#allocation4 + $0x570] sm:$0xf0] }
 0x10e   :  { %2638 = vmatpush.bf16.msrb.mxu3 %v4537_v50  ;;  %2622 = vmatpush.bf16.msra.mxu0 %v4345_v54  ;;  %v4280_v11 = vld [vmem:[#allocation4 + $0x6d0] sm:$0xf]  ;;  %v4473_v17 = vor.u32 %v5024_v8, %v4472_v3  ;;  %v4381_v50 = vor.u32 %v4996_v43, %v4378_v44  ;;  %v4772_v3 = vld [vmem:[#allocation4 + $0x94] sm:$0xf] }
 0x10f   :  { %2599 = vmatpush.bf16.msra.mxu1 %v3673_v59  ;;  %v4976_v12 = vld [vmem:[#allocation4 + $0x6ec] sm:$0xf0]  ;;  %v3482_v4 = vld [vmem:[#allocation4 + $0xb0] sm:$0xf0] }
 0x110   :  { %2613 = vmatpush.bf16.msra.mxu2 %v3929_v63  ;;  %v4440_v15 = vld [vmem:[#allocation4 + $0x810] sm:$0xf]  ;;  %v4281_v23 = vor.u32 %v4976_v12, %v4280_v11  ;;  %v4876_v63 = vld [vmem:[#allocation4 + $0x3d4] sm:$0xf]  ;;  %v3485_v12 = vor.u32 %v4772_v3, %v3482_v4 }
 0x111   :  { %v5016_v20 = vld [vmem:[#allocation4 + $0x82c] sm:$0xf0]  ;;  %v4916_v5 = vld [vmem:[#allocation4 + $0x514] sm:$0xf] }
 0x112   :  { %2639 = vmatpush.bf16.msrb.mxu3 %v4505_v1  ;;  %v4696_v22 = vld [vmem:[#allocation4 + $0xa10] sm:$0xf]  ;;  %2623 = vmatpush.bf16.msra.mxu0 %v4313_v6  ;;  %v4441_v34 = vor.u32 %v5016_v20, %v4440_v15  ;;  %v4093_v1 = vor.u32 %v4924_v53, %v4090_v55  ;;  %v4058_v8 = vld [vmem:[#allocation4 + $0x530] sm:$0xf0] }
 0x113   :  { %2653 = vmatpush.bf16.msrb.mxu1 %v2231_v0  ;;  %v5080_v16 = vld [vmem:[#allocation4 + $0xa2c] sm:$0xf0]  ;;  %2614 = vmatmul.bf16.vlgmr.msra.gmra.mxu2 %v5390_v13  ;;  %v3898_v0 = vld [vmem:[#allocation4 + $0x3f0] sm:$0xf0] }
 0x114   :  { %2662 = vmatpush.bf16.msrb.mxu2 %v3645_v2  ;;  %2600 = vmatmul.bf16.vlgmr.msra.gmra.mxu1 %v5385_v57  ;;  %v4697_v31 = vor.u32 %v5080_v16, %v4696_v22  ;;  %v4248_v32 = vld [vmem:[#allocation4 + $0x690] sm:$0xf]  ;;  %v4349_v2 = vor.u32 %v4988_v56, %v4346_v58  ;;  %v3901_v11 = vor.u32 %v4876_v63, %v3898_v0  ;;  %v3866_v15 = vld [vmem:[#allocation4 + $0x3b0] sm:$0xf0] }
 0x115   :  { %v4968_v33 = vld [vmem:[#allocation4 + $0x6ac] sm:$0xf0]  ;;  %v4764_v20 = vld [vmem:[#allocation4 + $0x54] sm:$0xf] }
 0x116   :  { %2640 = vmatpush.bf16.msrb.mxu3 %v4473_v17  ;;  %2624 = vmatpush.bf16.msra.mxu0 %v4281_v23  ;;  %v4249_v21 = vor.u32 %v4968_v33, %v4248_v32  ;;  %v4216_v46 = vld [vmem:[#allocation4 + $0x650] sm:$0xf]  ;;  %v4061_v17 = vor.u32 %v4916_v5, %v4058_v8  ;;  %v3450_v22 = vld [vmem:[#allocation4 + $0x70] sm:$0xf0] }
 0x117   :  { %2654 = vmatpush.bf16.msrb.mxu1 %v4729_v14  ;;  %v4960_v47 = vld [vmem:[#allocation4 + $0x66c] sm:$0xf0]  ;;  %v4868_v14 = vld [vmem:[#allocation4 + $0x394] sm:$0xf]  ;;  %v3453_v28 = vor.u32 %v4764_v20, %v3450_v22  ;;  %v5451_v22 = vpop.f32.mrf.mxu2 }
 0x118   :  { %2663 = vmatpush.bf16.msrb.mxu2 %v3613_v18  ;;  %v4217_v54 = vor.u32 %v4960_v47, %v4216_v46  ;;  %v4184_v59 = vld [vmem:[#allocation4 + $0x610] sm:$0xf]  ;;  %v4317_v18 = vor.u32 %v4980_v9, %v4314_v10  ;;  %v4908_v16 = vld [vmem:[#allocation4 + $0x4d4] sm:$0xf]  ;;  %v3869_v27 = vor.u32 %v4868_v14, %v3866_v15  ;;  %v3648_v9 = vld [vmem:[#allocation4 + $0x1d8] sm:$0xf] }
 0x119   :  { %v4952_v60 = vld [vmem:[#allocation4 + $0x62c] sm:$0xf0]  ;;  %v4026_v23 = vld [vmem:[#allocation4 + $0x4f0] sm:$0xf0]  ;;  %v4817_v10 = vld [vmem:[#allocation4 + $0x1f4] sm:$0xf0] }
 0x11a   :  { %2641 = vmatpush.bf16.msrb.mxu3 %v4441_v34  ;;  %2625 = vmatpush.bf16.msra.mxu0 %v4249_v21  ;;  %v4185_v6 = vor.u32 %v4952_v60, %v4184_v59  ;;  %v4972_v24 = vld [vmem:[#allocation4 + $0x6d4] sm:$0xf]  ;;  %v4881_v14 = vld [vmem:[#allocation4 + $0x3f4] sm:$0xf0] }
 0x11b   :  { %2655 = vmatpush.bf16.msrb.mxu1 %v4697_v31  ;;  %v4282_v26 = vld [vmem:[#allocation4 + $0x6f0] sm:$0xf0]  ;;  %v4029_v31 = vor.u32 %v4908_v16, %v4026_v23  ;;  %v3649_v23 = vor.u32 %v4817_v10, %v3648_v9 }
 0x11c   :  { %2664 = vmatpush.bf16.msrb.mxu2 %v3581_v35  ;;  %v4860_v29 = vld [vmem:[#allocation4 + $0x354] sm:$0xf]  ;;  %v4285_v32 = vor.u32 %v4972_v24, %v4282_v26 }
 0x11d   :  { %2642 = vmatmul.bf16.vlgmr.msrb.gmra.mxu3 %v5403_v45  ;;  %v3834_v30 = vld [vmem:[#allocation4 + $0x370] sm:$0xf0] }
 0x11e   :  { %2704 = vmatpush.bf16.msra.mxu3 %v4413_v38  ;;  %2626 = vmatpush.bf16.msra.mxu0 %v4217_v54  ;;  %v4756_v33 = vld [vmem:[#allocation4 + $0x14] sm:$0xf]  ;;  %v3837_v41 = vor.u32 %v4860_v29, %v3834_v30  ;;  %v3616_v29 = vld [vmem:[#allocation4 + $0x198] sm:$0xf] }
 0x11f   :  { %2690 = vmatpush.bf16.msra.mxu1 %v4157_v37  ;;  %v3418_v34 = vld [vmem:[#allocation4 + $0x30] sm:$0xf0]  ;;  %v5443_v37 = vpop.f32.mrf.mxu3  ;;  %v4809_v30 = vld [vmem:[#allocation4 + $0x1b4] sm:$0xf0] }
 0x120   :  { %2665 = vmatpush.bf16.msrb.mxu2 %v3549_v48  ;;  %v4900_v35 = vld [vmem:[#allocation4 + $0x494] sm:$0xf]  ;;  %v3421_v43 = vor.u32 %v4756_v33, %v3418_v34  ;;  %v4873_v33 = vld [vmem:[#allocation4 + $0x3b4] sm:$0xf0] }
 0x121   :  { %v3994_v38 = vld [vmem:[#allocation4 + $0x4b0] sm:$0xf0] }
 0x122   :  { %2705 = vmatpush.bf16.msra.mxu3 %v4381_v50  ;;  %2627 = vmatpush.bf16.msra.mxu0 %v4185_v6  ;;  %v4964_v39 = vld [vmem:[#allocation4 + $0x694] sm:$0xf]  ;;  %v3997_v47 = vor.u32 %v4900_v35, %v3994_v38  ;;  %v5446_v50 = vpop.f32.mrf.mxu1  ;;  %v1527_v38 = vunpack.c.h.b16 %v5433_v25  ;;  %v4865_v25 = vld [vmem:[#allocation4 + $0x374] sm:$0xf0] }
 0x123   :  { %2691 = vmatpush.bf16.msra.mxu1 %v4125_v49  ;;  %v4250_v40 = vld [vmem:[#allocation4 + $0x6b0] sm:$0xf0] }
 0x124   :  { %2666 = vmatpush.bf16.msrb.mxu2 %v3517_v62  ;;  %4746 = vmatmul.msk.bf16.vlgmr.msrb.gmra.mxu1 %vm2210_vm2, %v5397_v61  ;;  %v5068_v21 = vld [vmem:[#allocation4 + $0x9d4] sm:$0xf]  ;;  %v4253_v48 = vor.u32 %v4964_v39, %v4250_v40  ;;  %v5456_v39 = vpop.f32.mrf.mxu0 }
 0x125   :  { %2628 = vmatmul.bf16.vlgmr.msra.gmra.mxu0 %v5394_v19  ;;  %v4666_v42 = vld [vmem:[#allocation4 + $0x9f0] sm:$0xf0] }
 0x126   :  { %2706 = vmatpush.bf16.msra.mxu3 %v4349_v2  ;;  %2676 = vmatpush.bf16.msrb.mxu0 %v3901_v11  ;;  %v4852_v44 = vld [vmem:[#allocation4 + $0x314] sm:$0xf]  ;;  %v4669_v51 = vor.u32 %v5068_v21, %v4666_v42  ;;  %v3904_v11 = vld [vmem:[#allocation4 + $0x3d8] sm:$0xf] }
 0x127   :  { %2692 = vmatpush.bf16.msra.mxu1 %v4093_v1  ;;  %v3802_v46 = vld [vmem:[#allocation4 + $0x330] sm:$0xf0] }
 0x128   :  { %2667 = vmatpush.bf16.msrb.mxu2 %v3485_v12  ;;  %v4892_v49 = vld [vmem:[#allocation4 + $0x454] sm:$0xf]  ;;  %v3805_v55 = vor.u32 %v4852_v44, %v3802_v46  ;;  %v5449_v12 = vpop.f32.mrf.mxu3  ;;  %v3584_v46 = vld [vmem:[#allocation4 + $0x158] sm:$0xf] }
 0x129   :  { %v3962_v52 = vld [vmem:[#allocation4 + $0x470] sm:$0xf0] }
 0x12a   :  { %2707 = vmatpush.bf16.msra.mxu3 %v4317_v18  ;;  %2677 = vmatpush.bf16.msrb.mxu0 %v3869_v27  ;;  %v4956_v53 = vld [vmem:[#allocation4 + $0x654] sm:$0xf]  ;;  %v3965_v62 = vor.u32 %v4892_v49, %v3962_v52  ;;  %v3905_v27 = vor.u32 %v4881_v14, %v3904_v11 }
 0x12b   :  { %2693 = vmatpush.bf16.msra.mxu1 %v4061_v17  ;;  %v4218_v54 = vld [vmem:[#allocation4 + $0x670] sm:$0xf0] }
 0x12c   :  { %2668 = vmatpush.bf16.msrb.mxu2 %v3453_v28  ;;  %v5060_v56 = vld [vmem:[#allocation4 + $0x994] sm:$0xf]  ;;  %v4221_v63 = vor.u32 %v4956_v53, %v4218_v54  ;;  %v1871_v53 = vpack.c.b16 %v1527_v38, %v1527_v38  ;;  %v3488_v38 = vld [vmem:[#allocation4 + $0x98] sm:$0xf] }
 0x12d   :  { %v4634_v58 = vld [vmem:[#allocation4 + $0x9b0] sm:$0xf0] }
 0x12e   :  { %2708 = vmatpush.bf16.msra.mxu3 %v4285_v32  ;;  %2678 = vmatpush.bf16.msrb.mxu0 %v3837_v41  ;;  %v4844_v59 = vld [vmem:[#allocation4 + $0x2d4] sm:$0xf]  ;;  %v4637_v3 = vor.u32 %v5060_v56, %v4634_v58  ;;  %v5453_v32 = vpop.f32.mrf.mxu1  ;;  %v3617_v41 = vor.u32 %v4809_v30, %v3616_v29 }
 0x12f   :  { %2694 = vmatpush.bf16.msra.mxu1 %v4029_v31  ;;  %v3770_v60 = vld [vmem:[#allocation4 + $0x2f0] sm:$0xf0]  ;;  %v3872_v31 = vld [vmem:[#allocation4 + $0x398] sm:$0xf] }
 0x130   :  { %2669 = vmatpush.bf16.msrb.mxu2 %v3421_v43  ;;  %v4884_v0 = vld [vmem:[#allocation4 + $0x414] sm:$0xf]  ;;  %v3773_v8 = vor.u32 %v4844_v59, %v3770_v60  ;;  %v3873_v43 = vor.u32 %v4873_v33, %v3872_v31  ;;  %v5458_v49 = vpop.f32.mrf.mxu3  ;;  %v4160_v33 = vld [vmem:[#allocation4 + $0x5d8] sm:$0xf] }
 0x131   :  { %v3930_v1 = vld [vmem:[#allocation4 + $0x430] sm:$0xf0] }
 0x132   :  { %2709 = vmatpush.bf16.msra.mxu3 %v4253_v48  ;;  %v4948_v2 = vld [vmem:[#allocation4 + $0x614] sm:$0xf]  ;;  %2679 = vmatpush.bf16.msrb.mxu0 %v3805_v55  ;;  %v3933_v18 = vor.u32 %v4884_v0, %v3930_v1  ;;  %v3840_v48 = vld [vmem:[#allocation4 + $0x358] sm:$0xf]  ;;  %v5462_v0 = vpop.f32.mrf.mxu2  ;;  %v2234_v1 = vand.u32 %v5382_v36, %v1871_v53 }
 0x133   :  { %2695 = vmatpush.bf16.msra.mxu1 %v3997_v47  ;;  %v4186_v4 = vld [vmem:[#allocation4 + $0x630] sm:$0xf0]  ;;  %2670 = vmatmul.bf16.vlgmr.msrb.gmra.mxu2 %v5387_v7  ;;  %v4801_v47 = vld [vmem:[#allocation4 + $0x174] sm:$0xf0]  ;;  %v3841_v58 = vor.u32 %v4865_v25, %v3840_v48 }
 0x134   :  { %2718 = vmatpush.bf16.msra.mxu2 %v4669_v51  ;;  %v5052_v5 = vld [vmem:[#allocation4 + $0x954] sm:$0xf]  ;;  %v4189_v20 = vor.u32 %v4948_v2, %v4186_v4  ;;  %v3585_v55 = vor.u32 %v4801_v47, %v3584_v46  ;;  %v3808_v2 = vld [vmem:[#allocation4 + $0x318] sm:$0xf] }
 0x135   :  { %v4602_v6 = vld [vmem:[#allocation4 + $0x970] sm:$0xf0]  ;;  %v5009_v46 = vld [vmem:[#allocation4 + $0x7f4] sm:$0xf0] }
 0x136   :  { %v4836_v15 = vld [vmem:[#allocation4 + $0x294] sm:$0xf]  ;;  %2710 = vmatpush.bf16.msra.mxu3 %v4221_v63  ;;  %v4605_v16 = vor.u32 %v5052_v5, %v4602_v6  ;;  %2680 = vmatpush.bf16.msrb.mxu0 %v3773_v8  ;;  %v4793_v63 = vld [vmem:[#allocation4 + $0x134] sm:$0xf0]  ;;  %v5465_v6 = vpop.f32.mrf.mxu1 }
 0x137   :  { %v3738_v17 = vld [vmem:[#allocation4 + $0x2b0] sm:$0xf0]  ;;  %2696 = vmatpush.bf16.msra.mxu1 %v3965_v62  ;;  %v3552_v62 = vld [vmem:[#allocation4 + $0x118] sm:$0xf] }
 0x138   :  { %2719 = vmatpush.bf16.msra.mxu2 %v4637_v3  ;;  %v5044_v24 = vld [vmem:[#allocation4 + $0x914] sm:$0xf]  ;;  %v3741_v28 = vor.u32 %v4836_v15, %v3738_v17  ;;  %v4857_v3 = vld [vmem:[#allocation4 + $0x334] sm:$0xf0]  ;;  %v3553_v9 = vor.u32 %v4793_v63, %v3552_v62 }
 0x139   :  { %v4570_v26 = vld [vmem:[#allocation4 + $0x930] sm:$0xf0]  ;;  %v3809_v11 = vor.u32 %v4857_v3, %v3808_v2  ;;  %v3520_v15 = vld [vmem:[#allocation4 + $0xd8] sm:$0xf] }
 0x13a   :  { %v4828_v34 = vld [vmem:[#allocation4 + $0x254] sm:$0xf]  ;;  %2711 = vmatpush.bf16.msra.mxu3 %v4189_v20  ;;  %v4573_v40 = vor.u32 %v5044_v24, %v4570_v26  ;;  %2681 = vmatpush.bf16.msrb.mxu0 %v3741_v28  ;;  %v4785_v17 = vld [vmem:[#allocation4 + $0xf4] sm:$0xf0]  ;;  %v5469_v28 = vpop.f32.mrf.mxu3 }
 0x13b   :  { %v3706_v35 = vld [vmem:[#allocation4 + $0x270] sm:$0xf0]  ;;  %2697 = vmatpush.bf16.msra.mxu1 %v3933_v18  ;;  %v5467_v18 = vpop.f32.mrf.mxu0  ;;  %v3521_v30 = vor.u32 %v4785_v17, %v3520_v15  ;;  %v5474_v48 = vld [vmem:[#allocation4 + $0xa98] sm:$0x33] }
 0x13c   :  { %2720 = vmatpush.bf16.msra.mxu2 %v4605_v16  ;;  %v5036_v21 = vld [vmem:[#allocation4 + $0x8d4] sm:$0xf]  ;;  %v3709_v44 = vor.u32 %v4828_v34, %v3706_v35  ;;  %v3776_v16 = vld [vmem:[#allocation4 + $0x2d8] sm:$0xf]  ;;  %v1528_v2 = vunpack.c.l.b16 %v5474_v48 }
 0x13d   :  { %v4538_v42 = vld [vmem:[#allocation4 + $0x8f0] sm:$0xf0]  ;;  %2712 = vmatmul.bf16.vlgmr.msra.gmra.mxu3 %v5394_v19  ;;  %v4945_v34 = vld [vmem:[#allocation4 + $0x5f4] sm:$0xf0] }
 0x13e   :  { %2760 = vmatpush.bf16.msrb.mxu3 %v3905_v27  ;;  %v4820_v51 = vld [vmem:[#allocation4 + $0x214] sm:$0xf]  ;;  %2698 = vmatmul.bf16.vlgmr.msra.gmra.mxu1 %v5390_v13  ;;  %v4541_v54 = vor.u32 %v5036_v21, %v4538_v42  ;;  %v5472_v21 = vpop.f32.mrf.mxu2  ;;  %v4161_v47 = vor.u32 %v4945_v34, %v4160_v33  ;;  %v4937_v53 = vld [vmem:[#allocation4 + $0x5b4] sm:$0xf0] }
 0x13f   :  { %2746 = vmatpush.bf16.msrb.mxu1 %v3649_v23  ;;  %v3674_v52 = vld [vmem:[#allocation4 + $0x230] sm:$0xf0]  ;;  %2682 = vmatpush.bf16.msrb.mxu0 %v3709_v44  ;;  %v4849_v23 = vld [vmem:[#allocation4 + $0x2f4] sm:$0xf0] }
 0x140   :  { %2721 = vmatpush.bf16.msra.mxu2 %v4573_v40  ;;  %v5028_v56 = vld [vmem:[#allocation4 + $0x894] sm:$0xf]  ;;  %v3677_v59 = vor.u32 %v4820_v51, %v3674_v52  ;;  %v3777_v35 = vor.u32 %v4849_v23, %v3776_v16  ;;  %v4777_v40 = vld [vmem:[#allocation4 + $0xb4] sm:$0xf0] }
 0x141   :  { %v4506_v60 = vld [vmem:[#allocation4 + $0x8b0] sm:$0xf0]  ;;  %v4416_v44 = vld [vmem:[#allocation4 + $0x7d8] sm:$0xf]  ;;  %v3489_v51 = vor.u32 %v4777_v40, %v3488_v38 }
 0x142   :  { %2761 = vmatpush.bf16.msrb.mxu3 %v3873_v43  ;;  %v5084_v4 = vld [vmem:[#allocation4 + $0xa54] sm:$0xf]  ;;  %v4509_v8 = vor.u32 %v5028_v56, %v4506_v60  ;;  %v4841_v43 = vld [vmem:[#allocation4 + $0x2b4] sm:$0xf0]  ;;  %v5476_v60 = vpop.f32.mrf.mxu1 }
 0x143   :  { %2747 = vmatpush.bf16.msrb.mxu1 %v3617_v41  ;;  %v4730_v5 = vld [vmem:[#allocation4 + $0xa70] sm:$0xf0]  ;;  %2683 = vmatpush.bf16.msrb.mxu0 %v3677_v59  ;;  %v3744_v41 = vld [vmem:[#allocation4 + $0x298] sm:$0xf] }
 0x144   :  { %2722 = vmatpush.bf16.msra.mxu2 %v4541_v54  ;;  %v5020_v10 = vld [vmem:[#allocation4 + $0x854] sm:$0xf]  ;;  %v4733_v20 = vor.u32 %v5084_v4, %v4730_v5  ;;  %v4128_v52 = vld [vmem:[#allocation4 + $0x598] sm:$0xf]  ;;  %v3745_v54 = vor.u32 %v4841_v43, %v3744_v41  ;;  %v5479_v4 = vpop.f32.mrf.mxu0 }
 0x145   :  { %v4474_v14 = vld [vmem:[#allocation4 + $0x870] sm:$0xf0]  ;;  %v3456_v56 = vld [vmem:[#allocation4 + $0x58] sm:$0xf]  ;;  %v4129_v3 = vor.u32 %v4937_v53, %v4128_v52 }
 0x146   :  { %2762 = vmatpush.bf16.msrb.mxu3 %v3841_v58  ;;  %v5012_v24 = vld [vmem:[#allocation4 + $0x814] sm:$0xf]  ;;  %v4477_v29 = vor.u32 %v5020_v10, %v4474_v14  ;;  %2684 = vmatmul.bf16.vlgmr.msrb.gmra.mxu0 %v5385_v57  ;;  %v4769_v58 = vld [vmem:[#allocation4 + $0x74] sm:$0xf0] }
 0x147   :  { %2748 = vmatpush.bf16.msrb.mxu1 %v3585_v55  ;;  %2737 = vmatpush.bf16.msra.mxu0 %v2234_v1  ;;  %v5076_v26 = vld [vmem:[#allocation4 + $0xa14] sm:$0xf]  ;;  %v4417_v55 = vor.u32 %v5009_v46, %v4416_v44  ;;  %v3712_v59 = vld [vmem:[#allocation4 + $0x258] sm:$0xf]  ;;  %v3457_v5 = vor.u32 %v4769_v58, %v3456_v56 }
 0x148   :  { %v4698_v27 = vld [vmem:[#allocation4 + $0xa30] sm:$0xf0]  ;;  %2723 = vmatpush.bf16.msra.mxu2 %v4509_v8  ;;  %v4833_v62 = vld [vmem:[#allocation4 + $0x274] sm:$0xf0] }
 0x149   :  { %v4442_v31 = vld [vmem:[#allocation4 + $0x830] sm:$0xf0]  ;;  %v4701_v42 = vor.u32 %v5076_v26, %v4698_v27  ;;  %v4384_v63 = vld [vmem:[#allocation4 + $0x798] sm:$0xf]  ;;  %v3713_v10 = vor.u32 %v4833_v62, %v3712_v59  ;;  %v1872_v26 = vpack.c.b16 %v1528_v2, %v1528_v2 }
 0x14a   :  { %2763 = vmatpush.bf16.msrb.mxu3 %v3809_v11  ;;  %v4445_v25 = vor.u32 %v5012_v24, %v4442_v31  ;;  %v5001_v1 = vld [vmem:[#allocation4 + $0x7b4] sm:$0xf0]  ;;  %v5484_v31 = vpop.f32.mrf.mxu2  ;;  %v5486_v41 = vpop.f32.mrf.mxu1 }
 0x14b   :  { %2749 = vmatpush.bf16.msrb.mxu1 %v3553_v9  ;;  %2738 = vmatpush.bf16.msra.mxu0 %v4733_v20  ;;  %v4096_v8 = vld [vmem:[#allocation4 + $0x558] sm:$0xf]  ;;  %v4385_v11 = vor.u32 %v5001_v1, %v4384_v63  ;;  %v5481_v20 = vpop.f32.mrf.mxu3  ;;  %v2237_v43 = vand.u32 %v5382_v36, %v1872_v26 }
 0x14c   :  { %2724 = vmatpush.bf16.msra.mxu2 %v4477_v29  ;;  %v4929_v9 = vld [vmem:[#allocation4 + $0x574] sm:$0xf0]  ;;  %v5489_v58 = vpop.f32.mrf.mxu0 }
 0x14d   :  { %v3424_v14 = vld [vmem:[#allocation4 + $0x18] sm:$0xf]  ;;  %v4097_v27 = vor.u32 %v4929_v9, %v4096_v8 }
 0x14e   :  { %2764 = vmatpush.bf16.msrb.mxu3 %v3777_v35  ;;  %v4761_v15 = vld [vmem:[#allocation4 + $0x34] sm:$0xf0] }
 0x14f   :  { %2750 = vmatpush.bf16.msrb.mxu1 %v3521_v30  ;;  %2739 = vmatpush.bf16.msra.mxu0 %v4701_v42  ;;  %v3680_v17 = vld [vmem:[#allocation4 + $0x218] sm:$0xf]  ;;  %v3425_v33 = vor.u32 %v4761_v15, %v3424_v14  ;;  %v4162_v14 = vld [vmem:[#allocation4 + $0x5f8] sm:$0xf0] }
 0x150   :  { %2725 = vmatpush.bf16.msra.mxu2 %v4445_v25  ;;  %v4825_v16 = vld [vmem:[#allocation4 + $0x234] sm:$0xf0] }
 0x151   :  { %v4352_v23 = vld [vmem:[#allocation4 + $0x758] sm:$0xf]  ;;  %v3681_v34 = vor.u32 %v4825_v16, %v3680_v17 }
 0x152   :  { %2765 = vmatpush.bf16.msrb.mxu3 %v3745_v54  ;;  %v4993_v24 = vld [vmem:[#allocation4 + $0x774] sm:$0xf0] }
 0x153   :  { %2774 = vmatpush.bf16.msrb.mxu0 %v4161_v47  ;;  %2751 = vmatpush.bf16.msrb.mxu1 %v3489_v51  ;;  %v4672_v29 = vld [vmem:[#allocation4 + $0x9d8] sm:$0xf]  ;;  %v4353_v35 = vor.u32 %v4993_v24, %v4352_v23  ;;  %v5494_v9 = vpop.f32.mrf.mxu3  ;;  %v5497_v23 = vpop.f32.mrf.mxu2 }
 0x154   :  { %2788 = vmatpush.bf16.msrb.mxu2 %v4417_v55  ;;  %v5073_v30 = vld [vmem:[#allocation4 + $0x9f4] sm:$0xf0]  ;;  %6072 = vst [vmem:[#allocation17_spill] sm:$0xff] %v5494_v9 }
 0x155   :  { %2726 = vmatmul.bf16.vlgmr.msra.gmra.mxu2 %v5403_v45  ;;  %v4064_v38 = vld [vmem:[#allocation4 + $0x518] sm:$0xf]  ;;  %v4673_v42 = vor.u32 %v5073_v30, %v4672_v29 }
 0x156   :  { %2766 = vmatpush.bf16.msrb.mxu3 %v3713_v10  ;;  %v4921_v40 = vld [vmem:[#allocation4 + $0x534] sm:$0xf0]  ;;  %4747 = vmatmul.msk.bf16.vlgmr.msra.gmra.mxu0 %vm2210_vm2, %v5397_v61 }
 0x157   :  { %2775 = vmatpush.bf16.msrb.mxu0 %v4129_v3  ;;  %2752 = vmatpush.bf16.msrb.mxu1 %v3457_v5  ;;  %v4320_v44 = vld [vmem:[#allocation4 + $0x718] sm:$0xf]  ;;  %v4065_v53 = vor.u32 %v4921_v40, %v4064_v38  ;;  %v4933_v40 = vld [vmem:[#allocation4 + $0x59c] sm:$0xf] }
 0x158   :  { %2789 = vmatpush.bf16.msrb.mxu2 %v4385_v11  ;;  %v4985_v46 = vld [vmem:[#allocation4 + $0x734] sm:$0xf0]  ;;  %v4941_v11 = vld [vmem:[#allocation4 + $0x5dc] sm:$0xf] }
 0x159   :  { %v4640_v47 = vld [vmem:[#allocation4 + $0x998] sm:$0xf]  ;;  %v4321_v54 = vor.u32 %v4985_v46, %v4320_v44  ;;  %v4165_v30 = vor.u32 %v4941_v11, %v4162_v14  ;;  %v4813_v14 = vld [vmem:[#allocation4 + $0x1dc] sm:$0xf] }
 0x15a   :  { %v5065_v25 = vld [vmem:[#allocation4 + $0x9b4] sm:$0xf0]  ;;  %2767 = vmatpush.bf16.msrb.mxu3 %v3681_v34 }
 0x15b   :  { %2776 = vmatpush.bf16.msrb.mxu0 %v4097_v27  ;;  %v4736_v51 = vld [vmem:[#allocation4 + $0xa58] sm:$0xf]  ;;  %2753 = vmatpush.bf16.msrb.mxu1 %v3425_v33  ;;  %v4641_v59 = vor.u32 %v5065_v25, %v4640_v47  ;;  %v5501_v47 = vpop.f32.mrf.mxu0 }
 0x15c   :  { %v5089_v52 = vld [vmem:[#allocation4 + $0xa74] sm:$0xf0]  ;;  %2790 = vmatpush.bf16.msrb.mxu2 %v4353_v35  ;;  %v5499_v35 = vpop.f32.mrf.mxu1 }
 0x15d   :  { %v4032_v55 = vld [vmem:[#allocation4 + $0x4d8] sm:$0xf]  ;;  %v4737_v62 = vor.u32 %v5089_v52, %v4736_v51  ;;  %2768 = vmatmul.bf16.vlgmr.msrb.gmra.mxu3 %v5385_v57 }
 0x15e   :  { %v4913_v56 = vld [vmem:[#allocation4 + $0x4f4] sm:$0xf0]  ;;  %2821 = vmatpush.bf16.msra.mxu3 %v2237_v43  ;;  %2754 = vmatmul.bf16.vlgmr.msrb.gmra.mxu1 %v5387_v7 }
 0x15f   :  { %2802 = vmatpush.bf16.msra.mxu1 %v4673_v42  ;;  %v4288_v63 = vld [vmem:[#allocation4 + $0x6d8] sm:$0xf]  ;;  %2777 = vmatpush.bf16.msrb.mxu0 %v4065_v53  ;;  %v4033_v10 = vor.u32 %v4913_v56, %v4032_v55  ;;  %v4130_v42 = vld [vmem:[#allocation4 + $0x5b8] sm:$0xf0]  ;;  %v5503_v56 = vpop.f32.mrf.mxu3 }
 0x160   :  { %v4977_v1 = vld [vmem:[#allocation4 + $0x6f4] sm:$0xf0]  ;;  %2791 = vmatpush.bf16.msrb.mxu2 %v4321_v54  ;;  %v4133_v53 = vor.u32 %v4933_v40, %v4130_v42 }
 0x161   :  { %v4608_v2 = vld [vmem:[#allocation4 + $0x958] sm:$0xf]  ;;  %v4289_v15 = vor.u32 %v4977_v1, %v4288_v63  ;;  %v4098_v63 = vld [vmem:[#allocation4 + $0x578] sm:$0xf0] }
 0x162   :  { %v5057_v3 = vld [vmem:[#allocation4 + $0x974] sm:$0xf0]  ;;  %2822 = vmatpush.bf16.msra.mxu3 %v4737_v62  ;;  %v4925_v62 = vld [vmem:[#allocation4 + $0x55c] sm:$0xf] }
 0x163   :  { %v4704_v5 = vld [vmem:[#allocation4 + $0xa18] sm:$0xf]  ;;  %2803 = vmatpush.bf16.msra.mxu1 %v4641_v59  ;;  %v4609_v24 = vor.u32 %v5057_v3, %v4608_v2  ;;  %2778 = vmatpush.bf16.msrb.mxu0 %v4033_v10 }
 0x164   :  { %v5081_v8 = vld [vmem:[#allocation4 + $0xa34] sm:$0xf0]  ;;  %2792 = vmatpush.bf16.msrb.mxu2 %v4289_v15  ;;  %v3650_v15 = vld [vmem:[#allocation4 + $0x1f8] sm:$0xf0] }
 0x165   :  { %v4000_v17 = vld [vmem:[#allocation4 + $0x498] sm:$0xf]  ;;  %v4705_v26 = vor.u32 %v5081_v8, %v4704_v5  ;;  %v3653_v40 = vor.u32 %v4813_v14, %v3650_v15  ;;  %v4861_v15 = vld [vmem:[#allocation4 + $0x35c] sm:$0xf] }
 0x166   :  { %v4905_v16 = vld [vmem:[#allocation4 + $0x4b4] sm:$0xf0] }
 0x167   :  { %v4256_v27 = vld [vmem:[#allocation4 + $0x698] sm:$0xf]  ;;  %v4001_v38 = vor.u32 %v4905_v16, %v4000_v17  ;;  %2804 = vmatpush.bf16.msra.mxu1 %v4609_v24  ;;  %2823 = vmatpush.bf16.msra.mxu3 %v4705_v26  ;;  %v4101_v17 = vor.u32 %v4925_v62, %v4098_v63  ;;  %v4877_v24 = vld [vmem:[#allocation4 + $0x3dc] sm:$0xf] }
 0x168   :  { %v4969_v29 = vld [vmem:[#allocation4 + $0x6b4] sm:$0xf0]  ;;  %v3906_v26 = vld [vmem:[#allocation4 + $0x3f8] sm:$0xf0] }
 0x169   :  { %v4576_v33 = vld [vmem:[#allocation4 + $0x918] sm:$0xf]  ;;  %v4257_v43 = vor.u32 %v4969_v29, %v4256_v27  ;;  %2779 = vmatpush.bf16.msrb.mxu0 %v4001_v38  ;;  %v5505_v27 = vpop.f32.mrf.mxu2  ;;  %v5507_v29 = vpop.f32.mrf.mxu1  ;;  %v4034_v62 = vld [vmem:[#allocation4 + $0x4f8] sm:$0xf0] }
 0x16a   :  { %v5049_v34 = vld [vmem:[#allocation4 + $0x934] sm:$0xf0] }
 0x16b   :  { %v3968_v44 = vld [vmem:[#allocation4 + $0x458] sm:$0xf]  ;;  %v4577_v25 = vor.u32 %v5049_v34, %v4576_v33  ;;  %2858 = vmatpush.bf16.msrb.mxu3 %v4165_v30  ;;  %2793 = vmatpush.bf16.msrb.mxu2 %v4257_v43  ;;  %v4917_v33 = vld [vmem:[#allocation4 + $0x51c] sm:$0xf]  ;;  %v3909_v43 = vor.u32 %v4877_v24, %v3906_v26 }
 0x16c   :  { %v4897_v46 = vld [vmem:[#allocation4 + $0x474] sm:$0xf0]  ;;  %v4066_v34 = vld [vmem:[#allocation4 + $0x538] sm:$0xf0] }
 0x16d   :  { %v4224_v51 = vld [vmem:[#allocation4 + $0x658] sm:$0xf]  ;;  %v3969_v59 = vor.u32 %v4897_v46, %v3968_v44  ;;  %2805 = vmatpush.bf16.msra.mxu1 %v4577_v25  ;;  %v4805_v46 = vld [vmem:[#allocation4 + $0x19c] sm:$0xf]  ;;  %4748 = vmatmul.msk.bf16.vlgmr.msra.gmra.mxu3 %vm2210_vm2, %v5397_v61 }
 0x16e   :  { %v4961_v52 = vld [vmem:[#allocation4 + $0x674] sm:$0xf0]  ;;  %v3618_v25 = vld [vmem:[#allocation4 + $0x1b8] sm:$0xf0] }
 0x16f   :  { %v4544_v54 = vld [vmem:[#allocation4 + $0x8d8] sm:$0xf]  ;;  %v4225_v2 = vor.u32 %v4961_v52, %v4224_v51  ;;  %2859 = vmatpush.bf16.msrb.mxu3 %v4133_v53  ;;  %2780 = vmatpush.bf16.msrb.mxu0 %v3969_v59  ;;  %v4069_v51 = vor.u32 %v4917_v33, %v4066_v34  ;;  %v4869_v53 = vld [vmem:[#allocation4 + $0x39c] sm:$0xf]  ;;  %v3621_v63 = vor.u32 %v4805_v46, %v3618_v25 }
 0x170   :  { %v5041_v55 = vld [vmem:[#allocation4 + $0x8f4] sm:$0xf0]  ;;  %v4909_v59 = vld [vmem:[#allocation4 + $0x4dc] sm:$0xf] }
 0x171   :  { %v3936_v1 = vld [vmem:[#allocation4 + $0x418] sm:$0xf]  ;;  %v4545_v10 = vor.u32 %v5041_v55, %v4544_v54  ;;  %2794 = vmatpush.bf16.msrb.mxu2 %v4225_v2  ;;  %v3874_v54 = vld [vmem:[#allocation4 + $0x3b8] sm:$0xf0]  ;;  %v5509_v55 = vpop.f32.mrf.mxu0  ;;  %v5513_v2 = vpop.f32.mrf.mxu3  ;;  %v4037_v14 = vor.u32 %v4909_v59, %v4034_v62 }
 0x172   :  { %v4889_v3 = vld [vmem:[#allocation4 + $0x434] sm:$0xf0]  ;;  %v5516_v24 = vpop.f32.mrf.mxu2  ;;  %v4002_v26 = vld [vmem:[#allocation4 + $0x4b8] sm:$0xf0] }
 0x173   :  { %v4192_v5 = vld [vmem:[#allocation4 + $0x618] sm:$0xf]  ;;  %v3937_v30 = vor.u32 %v4889_v3, %v3936_v1  ;;  %2806 = vmatpush.bf16.msra.mxu1 %v4545_v10  ;;  %2860 = vmatpush.bf16.msrb.mxu3 %v4101_v17  ;;  %v4797_v10 = vld [vmem:[#allocation4 + $0x15c] sm:$0xf] }
 0x174   :  { %v4953_v8 = vld [vmem:[#allocation4 + $0x634] sm:$0xf0]  ;;  %v3842_v17 = vld [vmem:[#allocation4 + $0x378] sm:$0xf0] }
 0x175   :  { %v4512_v11 = vld [vmem:[#allocation4 + $0x898] sm:$0xf]  ;;  %v4193_v38 = vor.u32 %v4953_v8, %v4192_v5  ;;  %2781 = vmatpush.bf16.msrb.mxu0 %v3937_v30  ;;  %v3877_v5 = vor.u32 %v4869_v53, %v3874_v54  ;;  %v5005_v30 = vld [vmem:[#allocation4 + $0x7dc] sm:$0xf] }
 0x176   :  { %v5033_v16 = vld [vmem:[#allocation4 + $0x8b4] sm:$0xf0]  ;;  %v4418_v33 = vld [vmem:[#allocation4 + $0x7f8] sm:$0xf0] }
 0x177   :  { %v4513_v42 = vor.u32 %v5033_v16, %v4512_v11  ;;  %v4480_v44 = vld [vmem:[#allocation4 + $0x858] sm:$0xf]  ;;  %2795 = vmatpush.bf16.msrb.mxu2 %v4193_v38  ;;  %v3586_v11 = vld [vmem:[#allocation4 + $0x178] sm:$0xf0]  ;;  %2861 = vmatpush.bf16.msrb.mxu3 %v4069_v51  ;;  %v5519_v38 = vpop.f32.mrf.mxu1  ;;  %v4421_v25 = vor.u32 %v5005_v30, %v4418_v33 }
 0x178   :  { %v5025_v52 = vld [vmem:[#allocation4 + $0x874] sm:$0xf0]  ;;  %2782 = vmatmul.bf16.vlgmr.msrb.gmra.mxu0 %v5390_v13  ;;  %v4901_v16 = vld [vmem:[#allocation4 + $0x49c] sm:$0xf]  ;;  %v3589_v34 = vor.u32 %v4797_v10, %v3586_v11 }
 0x179   :  { %2830 = vmatpush.bf16.msra.mxu0 %v3653_v40  ;;  %v4448_v1 = vld [vmem:[#allocation4 + $0x818] sm:$0xf]  ;;  %2807 = vmatpush.bf16.msra.mxu1 %v4513_v42  ;;  %v4481_v3 = vor.u32 %v5025_v52, %v4480_v44  ;;  %v3845_v42 = vor.u32 %v4861_v15, %v3842_v17  ;;  %v3554_v44 = vld [vmem:[#allocation4 + $0x138] sm:$0xf0]  ;;  %v4005_v46 = vor.u32 %v4901_v16, %v4002_v26  ;;  %v5521_v54 = vpop.f32.mrf.mxu0  ;;  %v5523_v16 = vpop.f32.mrf.mxu3 }
 0x17a   :  { %v5017_v8 = vld [vmem:[#allocation4 + $0x834] sm:$0xf0]  ;;  %2796 = vmatmul.bf16.vlgmr.msrb.gmra.mxu2 %v5394_v19  ;;  %v4853_v51 = vld [vmem:[#allocation4 + $0x31c] sm:$0xf] }
 0x17b   :  { %2844 = vmatpush.bf16.msra.mxu2 %v3909_v43  ;;  %v4449_v40 = vor.u32 %v5017_v8, %v4448_v1  ;;  %v4789_v43 = vld [vmem:[#allocation4 + $0x11c] sm:$0xf]  ;;  %2862 = vmatpush.bf16.msrb.mxu3 %v4037_v14 }
 0x17c   :  { %v3810_v52 = vld [vmem:[#allocation4 + $0x338] sm:$0xf0]  ;;  %v3557_v10 = vor.u32 %v4789_v43, %v3554_v44 }
 0x17d   :  { %2831 = vmatpush.bf16.msra.mxu0 %v3621_v63  ;;  %2808 = vmatpush.bf16.msra.mxu1 %v4481_v3  ;;  %v4893_v53 = vld [vmem:[#allocation4 + $0x45c] sm:$0xf]  ;;  %v3813_v3 = vor.u32 %v4853_v51, %v3810_v52 }
 0x17e   :  { %v3970_v59 = vld [vmem:[#allocation4 + $0x478] sm:$0xf0] }
 0x17f   :  { %2845 = vmatpush.bf16.msra.mxu2 %v3877_v5  ;;  %v4997_v62 = vld [vmem:[#allocation4 + $0x79c] sm:$0xf]  ;;  %2863 = vmatpush.bf16.msrb.mxu3 %v4005_v46  ;;  %v3973_v8 = vor.u32 %v4893_v53, %v3970_v59  ;;  %v5528_v53 = vld [vmem:[#allocation6] sm:$0xff]  ;;  %v5530_v59 = vpop.f32.mrf.mxu1 }
 0x180   :  { %v4386_v63 = vld [vmem:[#allocation4 + $0x7b8] sm:$0xf0] }
 0x181   :  { %2832 = vmatpush.bf16.msra.mxu0 %v3589_v34  ;;  %2809 = vmatpush.bf16.msra.mxu1 %v4449_v40  ;;  %v4781_v1 = vld [vmem:[#allocation4 + $0xdc] sm:$0xf]  ;;  %v4389_v11 = vor.u32 %v4997_v62, %v4386_v63  ;;  %v5526_v40 = vpop.f32.mrf.mxu2 }
 0x182   :  { %v3522_v5 = vld [vmem:[#allocation4 + $0xf8] sm:$0xf0] }
 0x183   :  { %2846 = vmatpush.bf16.msra.mxu2 %v3845_v42  ;;  %v4845_v14 = vld [vmem:[#allocation4 + $0x2dc] sm:$0xf]  ;;  %v3525_v34 = vor.u32 %v4781_v1, %v3522_v5  ;;  %2864 = vmatpush.bf16.msrb.mxu3 %v3973_v8  ;;  %v5535_v1 = vpop.f32.mrf.mxu0 }
 0x184   :  { %v3778_v15 = vld [vmem:[#allocation4 + $0x2f8] sm:$0xf0]  ;;  %2810 = vmatmul.bf16.vlgmr.msra.gmra.mxu1 %v5403_v45 }
 0x185   :  { %2872 = vmatpush.bf16.msrb.mxu1 %v4421_v25  ;;  %v4885_v17 = vld [vmem:[#allocation4 + $0x41c] sm:$0xf]  ;;  %2833 = vmatpush.bf16.msra.mxu0 %v3557_v10  ;;  %v3781_v42 = vor.u32 %v4845_v14, %v3778_v15  ;;  %v6071_v14 = vperm.slane %v5528_v53, 0  ;;  %v2976_v15 = vld [vmem:[%s6064_s3 + $0x70] sm:$0xff] }
 0x186   :  { %v3938_v26 = vld [vmem:[#allocation4 + $0x438] sm:$0xf0] }
 0x187   :  { %v4989_v30 = vld [vmem:[#allocation4 + $0x75c] sm:$0xf]  ;;  %2847 = vmatpush.bf16.msra.mxu2 %v3813_v3  ;;  %v3941_v46 = vor.u32 %v4885_v17, %v3938_v26 }
 0x188   :  { %v4354_v33 = vld [vmem:[#allocation4 + $0x778] sm:$0xf0] }
 0x189   :  { %v4773_v43 = vld [vmem:[#allocation4 + $0x9c] sm:$0xf]  ;;  %2873 = vmatpush.bf16.msrb.mxu1 %v4389_v11  ;;  %v4357_v25 = vor.u32 %v4989_v30, %v4354_v33  ;;  %2834 = vmatpush.bf16.msra.mxu0 %v3525_v34 }
 0x18a   :  { %v3490_v44 = vld [vmem:[#allocation4 + $0xb8] sm:$0xf0]  ;;  %2865 = vmatpush.bf16.msrb.mxu3 %v3941_v46  ;;  %v5545_v46 = vpop.f32.mrf.mxu3 }
 0x18b   :  { %v4837_v51 = vld [vmem:[#allocation4 + $0x29c] sm:$0xf]  ;;  %v3493_v3 = vor.u32 %v4773_v43, %v3490_v44  ;;  %2848 = vmatpush.bf16.msra.mxu2 %v3781_v42  ;;  %v1529_v43 = vunpack.c.h.b16 %v5474_v48  ;;  %v2975_v42 = vld [vmem:[%s6064_s3 + $0x68] sm:$0xff]  ;;  %6073 = vst [vmem:[#allocation18_spill] sm:$0xff] %v5545_v46  ;;  %v2252_v48 = vadd.f32 %v5456_v39, %v6071_v14  ;;  %v5561_v39 = vpop.f32.mrf.mxu0 }
 0x18c   :  { %v3746_v52 = vld [vmem:[#allocation4 + $0x2b8] sm:$0xf0] }
 0x18d   :  { %v4981_v62 = vld [vmem:[#allocation4 + $0x71c] sm:$0xf]  ;;  %v3749_v5 = vor.u32 %v4837_v51, %v3746_v52  ;;  %2874 = vmatpush.bf16.msrb.mxu1 %v4357_v25  ;;  %2835 = vmatpush.bf16.msra.mxu0 %v3493_v3  ;;  %v5547_v25 = vpop.f32.mrf.mxu2  ;;  %v2974_v52 = vld [vmem:[%s6064_s3 + $0x60] sm:$0xff] }
 0x18e   :  { %v4322_v63 = vld [vmem:[#allocation4 + $0x738] sm:$0xf0]  ;;  %6074 = vst [vmem:[#allocation19_spill] sm:$0xff] %v5547_v25  ;;  %2866 = vmatmul.bf16.vlgmr.msrb.gmra.mxu3 %v5390_v13  ;;  %v5559_v25 = vpop.f32.mrf.mxu1  ;;  %v2266_v13 = vadd.f32 %v5446_v50, %v2252_v48 }
 0x18f   :  { %v2977_v10 = vld [vmem:[%s6064_s3 + $0x78] sm:$0xff]  ;;  %v4325_v17 = vor.u32 %v4981_v62, %v4322_v63  ;;  %2849 = vmatpush.bf16.msra.mxu2 %v3749_v5 }
 0x190   :  { %v4765_v8 = vld [vmem:[#allocation4 + $0x5c] sm:$0xf]  ;;  %3094 = vmatpush.msra.mxu3 %v2977_v10 }
 0x191   :  { %v3458_v11 = vld [vmem:[#allocation4 + $0x78] sm:$0xf0]  ;;  %2875 = vmatpush.bf16.msrb.mxu1 %v4325_v17 }
 0x192   :  { %v4829_v26 = vld [vmem:[#allocation4 + $0x25c] sm:$0xf]  ;;  %v3461_v44 = vor.u32 %v4765_v8, %v3458_v11  ;;  %3095 = vmatpush.msra.mxu3 %v2976_v15  ;;  %v5571_v48 = vpop.f32.mrf.mxu3 }
 0x193   :  { %v3714_v30 = vld [vmem:[#allocation4 + $0x278] sm:$0xf0] }
 0x194   :  { %v4973_v33 = vld [vmem:[#allocation4 + $0x6dc] sm:$0xf]  ;;  %v3717_v51 = vor.u32 %v4829_v26, %v3714_v30  ;;  %3096 = vmatpush.msra.mxu3 %v2975_v42  ;;  %v1873_v30 = vpack.c.b16 %v1529_v43, %v1529_v43  ;;  %2836 = vmatpush.bf16.msra.mxu0 %v3461_v44 }
 0x195   :  { %v4290_v34 = vld [vmem:[#allocation4 + $0x6f8] sm:$0xf0] }
 0x196   :  { %v4757_v62 = vld [vmem:[#allocation4 + $0x1c] sm:$0xf]  ;;  %v4293_v10 = vor.u32 %v4973_v33, %v4290_v34  ;;  %2850 = vmatpush.bf16.msra.mxu2 %v3717_v51  ;;  %3097 = vmatpush.msra.mxu3 %v2974_v52  ;;  %v2972_v33 = vld [vmem:[%s6064_s3 + $0x50] sm:$0xff]  ;;  %v2240_v44 = vand.u32 %v5382_v36, %v1873_v30  ;;  %v2971_v51 = vld [vmem:[%s6064_s3 + $0x48] sm:$0xff]  ;;  %v6075_v30 = vperm.slane %v5528_v53, 0 }
 0x197   :  { %v3426_v63 = vld [vmem:[#allocation4 + $0x38] sm:$0xf0]  ;;  %v2970_v36 = vld [vmem:[%s6064_s3 + $0x40] sm:$0xff] }
 0x198   :  { %v4821_v3 = vld [vmem:[#allocation4 + $0x21c] sm:$0xf]  ;;  %v3429_v9 = vor.u32 %v4757_v62, %v3426_v63  ;;  %2876 = vmatpush.bf16.msrb.mxu1 %v4293_v10  ;;  %v2280_v10 = vadd.f32 %v5451_v22, %v2266_v13  ;;  %v2254_v22 = vadd.f32 %v5467_v18, %v6075_v30  ;;  %v2968_v18 = vld [vmem:[%s6064_s3 + $0x30] sm:$0xff] }
 0x199   :  { %v3682_v8 = vld [vmem:[#allocation4 + $0x238] sm:$0xf0] }
 0x19a   :  { %v4965_v11 = vld [vmem:[#allocation4 + $0x69c] sm:$0xf]  ;;  %v3685_v17 = vor.u32 %v4821_v3, %v3682_v8  ;;  %2837 = vmatpush.bf16.msra.mxu0 %v3429_v9  ;;  %v5577_v8 = vpop.f32.mrf.mxu2 }
 0x19b   :  { %v4258_v5 = vld [vmem:[#allocation4 + $0x6b8] sm:$0xf0] }
 0x19c   :  { %v5069_v15 = vld [vmem:[#allocation4 + $0x9dc] sm:$0xf]  ;;  %v4261_v34 = vor.u32 %v4965_v11, %v4258_v5  ;;  %2851 = vmatpush.bf16.msra.mxu2 %v3685_v17 }
 0x19d   :  { %v4674_v26 = vld [vmem:[#allocation4 + $0x9f8] sm:$0xf0]  ;;  %2838 = vmatmul.bf16.vlgmr.msra.gmra.mxu0 %v5387_v7 }
 0x19e   :  { %v2973_v46 = vld [vmem:[%s6064_s3 + $0x58] sm:$0xff]  ;;  %v4677_v43 = vor.u32 %v5069_v15, %v4674_v26  ;;  %2877 = vmatpush.bf16.msrb.mxu1 %v4261_v34  ;;  %v2294_v34 = vadd.f32 %v5443_v37, %v2280_v10  ;;  %v495_v10 = vperm.slane %v5528_v53, 1 }
 0x19f   :  { %v4957_v42 = vld [vmem:[#allocation4 + $0x65c] sm:$0xf]  ;;  %3098 = vmatpush.msra.mxu3 %v2973_v46  ;;  %2852 = vmatmul.bf16.vlgmr.msra.gmra.mxu2 %v5385_v57 }
 0x1a0   :  { %v4226_v62 = vld [vmem:[#allocation4 + $0x678] sm:$0xf0]  ;;  %2886 = vmatpush.bf16.msrb.mxu0 %v4677_v43  ;;  %2905 = vmatpush.bf16.msrb.mxu2 %v2240_v44  ;;  %v2268_v44 = vadd.f32 %v5453_v32, %v2254_v22  ;;  %v2966_v32 = vld [vmem:[%s6064_s3 + $0x20] sm:$0xff]  ;;  %v2991_v22 = vld [vmem:[%s6064_s3 + $0xe8] sm:$0xff] }
 0x1a1   :  { %v5061_v63 = vld [vmem:[#allocation4 + $0x99c] sm:$0xf]  ;;  %3099 = vmatpush.msra.mxu3 %v2972_v33  ;;  %v4229_v46 = vor.u32 %v4957_v42, %v4226_v62  ;;  %v5587_v33 = vpop.f32.mrf.mxu1  ;;  %v5593_v42 = vpop.f32.mrf.mxu0  ;;  %v2967_v62 = vld [vmem:[%s6064_s3 + $0x28] sm:$0xff] }
 0x1a2   :  { %v4642_v14 = vld [vmem:[#allocation4 + $0x9b8] sm:$0xf0]  ;;  %v5623_v30 = vpop.f32.mrf.mxu2 }
 0x1a3   :  { %v5085_v50 = vld [vmem:[#allocation4 + $0xa5c] sm:$0xf]  ;;  %v4645_v9 = vor.u32 %v5061_v63, %v4642_v14  ;;  %3100 = vmatpush.msra.mxu3 %v2971_v51  ;;  %2878 = vmatpush.bf16.msrb.mxu1 %v4229_v46  ;;  %v5611_v46 = vpop.f32.mrf.mxu3 }
 0x1a4   :  { %v4738_v52 = vld [vmem:[#allocation4 + $0xa78] sm:$0xf0] }
 0x1a5   :  { %v4949_v3 = vld [vmem:[#allocation4 + $0x61c] sm:$0xf]  ;;  %v4741_v11 = vor.u32 %v5085_v50, %v4738_v52  ;;  %3101 = vmatpush.msra.mxu3 %v2970_v36  ;;  %2887 = vmatpush.bf16.msrb.mxu0 %v4645_v9  ;;  %v2308_v52 = vadd.f32 %v5479_v4, %v2294_v34  ;;  %v496_v36 = vperm.slane %v5528_v53, 2  ;;  %v2992_v9 = vld [vmem:[%s6064_s3 + $0xf0] sm:$0xff] }
 0x1a6   :  { %v4194_v5 = vld [vmem:[#allocation4 + $0x638] sm:$0xf0]  ;;  %v3008_v4 = vld [vmem:[%s6064_s3 + $0x170] sm:$0xff] }
 0x1a7   :  { %v5053_v15 = vld [vmem:[#allocation4 + $0x95c] sm:$0xf]  ;;  %v4197_v57 = vor.u32 %v4949_v3, %v4194_v5  ;;  %2906 = vmatpush.bf16.msrb.mxu2 %v4741_v11  ;;  %v2282_v11 = vadd.f32 %v5462_v0, %v2268_v44  ;;  %v3007_v0 = vld [vmem:[%s6064_s3 + $0x168] sm:$0xff] }
 0x1a8   :  { %v4610_v26 = vld [vmem:[#allocation4 + $0x978] sm:$0xf0] }
 0x1a9   :  { %v2969_v17 = vld [vmem:[%s6064_s3 + $0x38] sm:$0xff]  ;;  %v4613_v43 = vor.u32 %v5053_v15, %v4610_v26  ;;  %2879 = vmatpush.bf16.msrb.mxu1 %v4197_v57  ;;  %v5642_v34 = vpop.f32.mrf.mxu1  ;;  %v2296_v57 = vadd.f32 %v5449_v12, %v2282_v11  ;;  %v5654_v44 = vpop.f32.mrf.mxu0  ;;  %v2987_v11 = vld [vmem:[%s6064_s3 + $0xc8] sm:$0xff] }
 0x1aa   :  { %v5077_v14 = vld [vmem:[#allocation4 + $0xa1c] sm:$0xf]  ;;  %3102 = vmatpush.msra.mxu3 %v2969_v17  ;;  %v2322_v17 = vadd.f32 %v5465_v6, %v2308_v52  ;;  %v2990_v6 = vld [vmem:[%s6064_s3 + $0xe0] sm:$0xff] }
 0x1ab   :  { %v4706_v13 = vld [vmem:[#allocation4 + $0xa38] sm:$0xf0]  ;;  %2888 = vmatpush.bf16.msrb.mxu0 %v4613_v43 }
 0x1ac   :  { %v4709_v7 = vor.u32 %v5077_v14, %v4706_v13  ;;  %v5045_v37 = vld [vmem:[#allocation4 + $0x91c] sm:$0xf]  ;;  %3103 = vmatpush.msra.mxu3 %v2968_v18  ;;  %2880 = vmatmul.bf16.vlgmr.msrb.gmra.mxu1 %v5394_v19  ;;  %v2336_v14 = vadd.f32 %v5472_v21, %v495_v10  ;;  %v2964_v19 = vld [vmem:[%s6064_s3 + $0x10] sm:$0xff]  ;;  %v2420_v13 = vadd.f32 %v5507_v29, %v496_v36  ;;  %v3006_v21 = vld [vmem:[%s6064_s3 + $0x160] sm:$0xff]  ;;  %v2930_v12 = vmul.f32 0.01, %v2322_v17 }
 0x1ad   :  { %v4578_v63 = vld [vmem:[#allocation4 + $0x938] sm:$0xf0]  ;;  %v2963_v29 = vld [vmem:[%s6064_s3 + $0x8] sm:$0xff]  ;;  %vm2914_vm3 = vcmp.gt.f32.partialorder %v2322_v17, 0.0 }
 0x1ae   :  { %v2993_v51 = vld [vmem:[%s6064_s3 + $0xf8] sm:$0xff]  ;;  %2907 = vmatpush.bf16.msrb.mxu2 %v4709_v7  ;;  %3104 = vmatpush.msra.mxu3 %v2967_v62  ;;  %v4581_v3 = vor.u32 %v5045_v37, %v4578_v63  ;;  %v2310_v63 = vadd.f32 %v5489_v58, %v2296_v57  ;;  %v2434_v52 = vadd.f32 %v5503_v56, %v2420_v13 }
 0x1af   :  { %v3009_v50 = vld [vmem:[%s6064_s3 + $0x178] sm:$0xff]  ;;  %3117 = vmatpush.msra.mxu1 %v2993_v51  ;;  %v2350_v51 = vadd.f32 %v5458_v49, %v2336_v14  ;;  %v3004_v49 = vld [vmem:[%s6064_s3 + $0x150] sm:$0xff]  ;;  %v5692_v14 = vpop.f32.mrf.mxu2 }
 0x1b0   :  { %v2965_v5 = vld [vmem:[%s6064_s3 + $0x18] sm:$0xff]  ;;  %3105 = vmatpush.msra.mxu3 %v2966_v32  ;;  %2889 = vmatpush.bf16.msrb.mxu0 %v4581_v3  ;;  %v2587_v32 = vpop.f32.mrf.mxu3 }
 0x1b1   :  { %v5037_v15 = vld [vmem:[#allocation4 + $0x8dc] sm:$0xf]  ;;  %3118 = vmatpush.msra.mxu1 %v2992_v9  ;;  %v2988_v9 = vld [vmem:[%s6064_s3 + $0xd0] sm:$0xff]  ;;  %4749 = vmatmul.msk.bf16.vlgmr.msrb.gmra.mxu2 %vm2210_vm2, %v5397_v61  ;;  %v3003_v61 = vld [vmem:[%s6064_s3 + $0x148] sm:$0xff] }
 0x1b2   :  { %3140 = vmatpush.msra.mxu2 %v3009_v50  ;;  %v4546_v26 = vld [vmem:[#allocation4 + $0x8f8] sm:$0xf0]  ;;  %3106 = vmatpush.msra.mxu3 %v2965_v5  ;;  %v2962_v50 = vld [vmem:[%s6064_s3] sm:$0xff]  ;;  %v2324_v5 = vadd.f32 %v5476_v60, %v2310_v63  ;;  %v3040_v60 = vld [vmem:[%s6064_s3 + $0x270] sm:$0xff] }
 0x1b3   :  { %v4549_v18 = vor.u32 %v5037_v15, %v4546_v26  ;;  %3119 = vmatpush.msra.mxu1 %v2991_v22  ;;  %v5029_v43 = vld [vmem:[#allocation4 + $0x89c] sm:$0xf]  ;;  %v2364_v15 = vadd.f32 %v5486_v41, %v2350_v51  ;;  %v2946_v26 = vsel %vm2914_vm3, %v2322_v17, %v2930_v12  ;;  %v2338_v22 = vadd.f32 %v5484_v31, %v495_v10  ;;  %v2986_v41 = vld [vmem:[%s6064_s3 + $0xc0] sm:$0xff]  ;;  %v2983_v51 = vld [vmem:[%s6064_s3 + $0xa8] sm:$0xff] }
 0x1b4   :  { %3141 = vmatpush.msra.mxu2 %v3008_v4  ;;  %v4514_v7 = vld [vmem:[#allocation4 + $0x8b8] sm:$0xf0]  ;;  %3107 = vmatpush.msra.mxu3 %v2964_v19  ;;  %v2601_v19 = vpop.f32.mrf.mxu1  ;;  %v2422_v31 = vadd.f32 %v5519_v38, %v496_v36  ;;  %v3002_v10 = vld [vmem:[%s6064_s3 + $0x140] sm:$0xff]  ;;  %vm2922_vm4 = vcmp.gt.f32.partialorder %v2324_v5, 0.0 }
 0x1b5   :  { %v2989_v62 = vld [vmem:[%s6064_s3 + $0xd8] sm:$0xff]  ;;  %3120 = vmatpush.msra.mxu1 %v2990_v6  ;;  %2890 = vmatpush.bf16.msrb.mxu0 %v4549_v18  ;;  %v4517_v58 = vor.u32 %v5029_v43, %v4514_v7  ;;  %v2378_v38 = vadd.f32 %v5501_v47, %v2364_v15  ;;  %v2352_v57 = vadd.f32 %v5469_v28, %v2338_v22  ;;  %v5719_v43 = vpop.f32.mrf.mxu0  ;;  %v3038_v7 = vld [vmem:[%s6064_s3 + $0x260] sm:$0xff]  ;;  %v2984_v47 = vld [vmem:[%s6064_s3 + $0xb0] sm:$0xff] }
 0x1b6   :  { %3142 = vmatpush.msra.mxu2 %v3007_v0  ;;  %v3005_v37 = vld [vmem:[%s6064_s3 + $0x158] sm:$0xff]  ;;  %3108 = vmatpush.msra.mxu3 %v2963_v29  ;;  %v2448_v0 = vadd.f32 %v5521_v54, %v2434_v52  ;;  %v498_v54 = vperm.slane %v5528_v53, 4  ;;  %v2436_v12 = vadd.f32 %v5513_v2, %v2422_v31  ;;  %v2999_v52 = vld [vmem:[%s6064_s3 + $0x128] sm:$0xff]  ;;  %v3024_v15 = vld [vmem:[%s6064_s3 + $0x1f0] sm:$0xff] }
 0x1b7   :  { %3121 = vmatpush.msra.mxu1 %v2989_v62  ;;  %v5021_v4 = vld [vmem:[#allocation4 + $0x85c] sm:$0xf]  ;;  %v3022_v31 = vld [vmem:[%s6064_s3 + $0x1e0] sm:$0xff] }
 0x1b8   :  { %3143 = vmatpush.msra.mxu2 %v3006_v21  ;;  %v4482_v3 = vld [vmem:[#allocation4 + $0x878] sm:$0xf0]  ;;  %3109 = vmatpush.msra.mxu3 %v2962_v50  ;;  %v3039_v21 = vld [vmem:[%s6064_s3 + $0x268] sm:$0xff]  ;;  %v2462_v29 = vadd.f32 %v5516_v24, %v2448_v0  ;;  %v2588_v28 = vadd.f32 %v2587_v32, %v498_v54  ;;  %v3000_v24 = vld [vmem:[%s6064_s3 + $0x130] sm:$0xff]  ;;  %v2589_v63 = vpop.f32.mrf.mxu3  ;;  %v2392_v50 = vadd.f32 %v5497_v23, %v2378_v38  ;;  %v2615_v23 = vpop.f32.mrf.mxu2 }
 0x1b9   :  { %v3041_v56 = vld [vmem:[%s6064_s3 + $0x278] sm:$0xff]  ;;  %3122 = vmatpush.msra.mxu1 %v2988_v9  ;;  %2891 = vmatpush.bf16.msrb.mxu0 %v4517_v58  ;;  %v4485_v17 = vor.u32 %v5021_v4, %v4482_v3  ;;  %v2366_v32 = vadd.f32 %v5499_v35, %v2352_v57  ;;  %v2982_v3 = vld [vmem:[%s6064_s3 + $0xa0] sm:$0xff]  ;;  %v3036_v35 = vld [vmem:[%s6064_s3 + $0x250] sm:$0xff] }
 0x1ba   :  { %3144 = vmatpush.msra.mxu2 %v3005_v37  ;;  %3110 = vmatmul.f32.vlgmr.msra.gmra.mxu3 %v2946_v26  ;;  %v5013_v13 = vld [vmem:[#allocation4 + $0x81c] sm:$0xf]  ;;  %v2938_v37 = vmul.f32 0.01, %v2324_v5  ;;  %v2476_v9 = vadd.f32 %v5530_v59, %v2462_v29  ;;  %v3035_v26 = vld [vmem:[%s6064_s3 + $0x248] sm:$0xff] }
 0x1bb   :  { %3186 = vmatpush.msrb.mxu3 %v3041_v56  ;;  %3123 = vmatpush.msra.mxu1 %v2987_v11  ;;  %v4450_v6 = vld [vmem:[#allocation4 + $0x838] sm:$0xf0]  ;;  %v2450_v56 = vadd.f32 %v5535_v1, %v2436_v12  ;;  %v2602_v11 = vadd.f32 %v2601_v19, %v2588_v28  ;;  %v2406_v1 = vadd.f32 %v5481_v20, %v2392_v50  ;;  %v2995_v57 = vld [vmem:[%s6064_s3 + $0x108] sm:$0xff]  ;;  %v2994_v28 = vld [vmem:[%s6064_s3 + $0x100] sm:$0xff] }
 0x1bc   :  { %3145 = vmatpush.msra.mxu2 %v3004_v49  ;;  %v2985_v18 = vld [vmem:[%s6064_s3 + $0xb8] sm:$0xff]  ;;  %v4453_v62 = vor.u32 %v5013_v13, %v4450_v6  ;;  %v497_v49 = vperm.slane %v5528_v53, 3  ;;  %v2954_v58 = vsel %vm2922_vm4, %v2324_v5, %v2938_v37  ;;  %v2603_v59 = vpop.f32.mrf.mxu1  ;;  %v2998_v5 = vld [vmem:[%s6064_s3 + $0x120] sm:$0xff]  ;;  %v2380_v22 = vadd.f32 %v5509_v55, %v2366_v32  ;;  %v2979_v13 = vld [vmem:[%s6064_s3 + $0x88] sm:$0xff] }
 0x1bd   :  { %3187 = vmatpush.msrb.mxu3 %v3040_v60  ;;  %3124 = vmatpush.msra.mxu1 %v2986_v41  ;;  %v3001_v36 = vld [vmem:[%s6064_s3 + $0x138] sm:$0xff]  ;;  %v2490_v0 = vadd.f32 %v5523_v16, %v2476_v9  ;;  %v2629_v20 = vpop.f32.mrf.mxu0  ;;  %v3023_v41 = vld [vmem:[%s6064_s3 + $0x1e8] sm:$0xff]  ;;  %v2464_v55 = vadd.f32 %v5526_v40, %v2450_v56  ;;  %v2590_v16 = vadd.f32 %v2589_v63, %v498_v54  ;;  %v2996_v40 = vld [vmem:[%s6064_s3 + $0x110] sm:$0xff]  ;;  %v2931_v54 = vmul.f32 0.01, %v2406_v1 }
 0x1be   :  { %3146 = vmatpush.msra.mxu2 %v3003_v61  ;;  %2892 = vmatpush.bf16.msrb.mxu0 %v4485_v17  ;;  %v3037_v2 = vld [vmem:[%s6064_s3 + $0x258] sm:$0xff]  ;;  %v2504_v19 = vadd.f32 %v5561_v39, %v497_v49  ;;  %v2616_v17 = vadd.f32 %v2615_v23, %v2602_v11  ;;  %v2980_v39 = vld [vmem:[%s6064_s3 + $0x90] sm:$0xff]  ;;  %vm2915_vm5 = vcmp.gt.f32.partialorder %v2406_v1, 0.0  ;;  %v2394_v6 = vadd.f32 %v5505_v27, %v2380_v22  ;;  %v2978_v37 = vld [vmem:[%s6064_s3 + $0x80] sm:$0xff] }
 0x1bf   :  { %3188 = vmatpush.msrb.mxu3 %v3039_v21  ;;  %3125 = vmatpush.msra.mxu1 %v2985_v18  ;;  %v3025_v4 = vld [vmem:[%s6064_s3 + $0x1f8] sm:$0xff]  ;;  %v2932_v21 = vmul.f32 0.01, %v2490_v0  ;;  %vm2916_vm6 = vcmp.gt.f32.partialorder %v2490_v0, 0.0  ;;  %v3032_v27 = vld [vmem:[%s6064_s3 + $0x230] sm:$0xff]  ;;  %v3031_v32 = vld [vmem:[%s6064_s3 + $0x228] sm:$0xff] }
 0x1c0   :  { %3147 = vmatpush.msra.mxu2 %v3002_v10  ;;  %v2981_v61 = vld [vmem:[%s6064_s3 + $0x98] sm:$0xff]  ;;  %v2617_v12 = vpop.f32.mrf.mxu2  ;;  %v6077_v63 = vld [vmem:[#allocation17_spill] sm:$0xff]  ;;  %v3030_v11 = vld [vmem:[%s6064_s3 + $0x220] sm:$0xff]  ;;  %vm3292_vm4 = vcmask 261120  }
 0x1c1   :  { %3189 = vmatpush.msrb.mxu3 %v3038_v7  ;;  %3126 = vmatpush.msra.mxu1 %v2984_v47  ;;  %v2997_v60 = vld [vmem:[%s6064_s3 + $0x118] sm:$0xff]  ;;  %v2478_v7 = vadd.f32 %v5559_v25, %v2464_v55  ;;  %v2604_v47 = vadd.f32 %v2603_v59, %v2590_v16  ;;  %v3020_v25 = vld [vmem:[%s6064_s3 + $0x1d0] sm:$0xff]  ;;  %v2948_v50 = vsel %vm2916_vm6, %v2490_v0, %v2932_v21  ;;  %v3019_v9 = vld [vmem:[%s6064_s3 + $0x1c8] sm:$0xff] }
 0x1c2   :  { %3148 = vmatpush.msra.mxu2 %v3001_v36  ;;  %2893 = vmatpush.bf16.msrb.mxu0 %v4453_v62  ;;  %v3033_v10 = vld [vmem:[%s6064_s3 + $0x238] sm:$0xff]  ;;  %v2643_v36 = vpop.f32.mrf.mxu3  ;;  %v2630_v62 = vadd.f32 %v2629_v20, %v2616_v17  ;;  %v2506_v59 = vadd.f32 %v5593_v42, %v497_v49  ;;  %v3055_v0 = vld [vmem:[%s6064_s3 + $0x2e8] sm:$0xff]  ;;  %v3016_v20 = vld [vmem:[%s6064_s3 + $0x1b0] sm:$0xff] }
 0x1c3   :  { %3113 = vmatmul.f32.gmra.mxu3 %v2954_v58  ;;  %3127 = vmatpush.msra.mxu1 %v2983_v51  ;;  %v6076_v18 = vld [vmem:[#allocation19_spill] sm:$0xff]  ;;  %v2408_v51 = vadd.f32 %v6077_v63, %v2394_v6  ;;  %v6078_v58 = vld [vmem:[#allocation18_spill] sm:$0xff]  ;;  %v3027_v55 = vld [vmem:[%s6064_s3 + $0x208] sm:$0xff] }
 0x1c4   :  { %3149 = vmatpush.msra.mxu2 %v3000_v24  ;;  %3190 = vmatpush.msrb.mxu3 %v3037_v2  ;;  %v2518_v38 = vadd.f32 %v6076_v18, %v2504_v19  ;;  %v3021_v29 = vld [vmem:[%s6064_s3 + $0x1d8] sm:$0xff]  ;;  %v2947_v24 = vsel %vm2915_vm5, %v2406_v1, %v2931_v54  ;;  %v2492_v23 = vadd.f32 %v6078_v58, %v2478_v7  ;;  %v3028_v19 = vld [vmem:[%s6064_s3 + $0x210] sm:$0xff]  ;;  %v3015_v16 = vld [vmem:[%s6064_s3 + $0x1a8] sm:$0xff] }
 0x1c5   :  { %3128 = vmatpush.msra.mxu1 %v2982_v3  ;;  %2894 = vmatmul.bf16.vlgmr.msrb.gmra.mxu0 %v5403_v45  ;;  %v3034_v45 = vld [vmem:[%s6064_s3 + $0x240] sm:$0xff]  ;;  %v2618_v3 = vadd.f32 %v2617_v12, %v2604_v47  ;;  %v2631_v56 = vpop.f32.mrf.mxu0  ;;  %v3029_v1 = vld [vmem:[%s6064_s3 + $0x218] sm:$0xff]  ;;  %v2939_v49 = vmul.f32 0.01, %v2408_v51  ;;  %vm2923_vm7 = vcmp.gt.f32.partialorder %v2408_v51, 0.0  ;;  %v3051_v7 = vld [vmem:[%s6064_s3 + $0x2c8] sm:$0xff] }
 0x1c6   :  { %3150 = vmatpush.msra.mxu2 %v2999_v52  ;;  %3163 = vmatpush.msra.mxu0 %v3025_v4  ;;  %v2532_v2 = vadd.f32 %v5571_v48, %v2518_v38  ;;  %v2657_v52 = vpop.f32.mrf.mxu1  ;;  %v2644_v4 = vadd.f32 %v2643_v36, %v2630_v62  ;;  %v3057_v48 = vld [vmem:[%s6064_s3 + $0x2f8] sm:$0xff]  ;;  %vm2924_vm8 = vcmp.gt.f32.partialorder %v2492_v23, 0.0  ;;  %v3014_v54 = vld [vmem:[%s6064_s3 + $0x1a0] sm:$0xff]  ;;  %v3052_v36 = vld [vmem:[%s6064_s3 + $0x2d0] sm:$0xff] }
 0x1c7   :  { %3191 = vmatpush.msrb.mxu3 %v3036_v35  ;;  %3129 = vmatpush.msra.mxu1 %v2981_v61  ;;  %v3018_v35 = vld [vmem:[%s6064_s3 + $0x1c0] sm:$0xff]  ;;  %v2940_v61 = vmul.f32 0.01, %v2492_v23  ;;  %v2632_v42 = vadd.f32 %v2631_v56, %v2618_v3  ;;  %v3073_v6 = vld [vmem:[%s6064_s3 + $0x378] sm:$0xff]  ;;  %v3072_v47 = vld [vmem:[%s6064_s3 + $0x370] sm:$0xff] }
 0x1c8   :  { %3151 = vmatpush.msra.mxu2 %v2998_v5  ;;  %3164 = vmatpush.msra.mxu0 %v3024_v15  ;;  %v3056_v5 = vld [vmem:[%s6064_s3 + $0x2f0] sm:$0xff]  ;;  %v2546_v15 = vadd.f32 %v5587_v33, %v2532_v2  ;;  %v2658_v22 = vadd.f32 %v2657_v52, %v2644_v4  ;;  %v3013_v18 = vld [vmem:[%s6064_s3 + $0x198] sm:$0xff]  ;;  %v3071_v62 = vld [vmem:[%s6064_s3 + $0x368] sm:$0xff] }
 0x1c9   :  { %3192 = vmatpush.msrb.mxu3 %v3035_v26  ;;  %3130 = vmatpush.msra.mxu1 %v2980_v39  ;;  %v3017_v26 = vld [vmem:[%s6064_s3 + $0x1b8] sm:$0xff]  ;;  %v2955_v39 = vsel %vm2923_vm7, %v2408_v51, %v2939_v49  ;;  %v3010_v63 = vld [vmem:[%s6064_s3 + $0x180] sm:$0xff]  ;;  %v3048_v58 = vld [vmem:[%s6064_s3 + $0x2b0] sm:$0xff] }
 0x1ca   :  { %3152 = vmatpush.msra.mxu2 %v2997_v60  ;;  %3165 = vmatpush.msra.mxu0 %v3023_v41  ;;  %v2645_v33 = vpop.f32.mrf.mxu3  ;;  %v2520_v60 = vadd.f32 %v5577_v8, %v2506_v59  ;;  %v2560_v41 = vadd.f32 %v5654_v44, %v2546_v15  ;;  %v2934_v17 = vmul.f32 0.01, %v2658_v22  ;;  %v3054_v8 = vld [vmem:[%s6064_s3 + $0x2e0] sm:$0xff]  ;;  %vm2918_vm9 = vcmp.gt.f32.partialorder %v2658_v22, 0.0  ;;  %v3044_v49 = vld [vmem:[%s6064_s3 + $0x290] sm:$0xff] }
 0x1cb   :  { %3193 = vmatpush.msrb.mxu3 %v3034_v45  ;;  %3131 = vmatpush.msra.mxu1 %v2979_v13  ;;  %v2646_v45 = vadd.f32 %v2645_v33, %v2632_v42  ;;  %v3053_v13 = vld [vmem:[%s6064_s3 + $0x2d8] sm:$0xff]  ;;  %v3066_v15 = vld [vmem:[%s6064_s3 + $0x340] sm:$0xff]  ;;  %v3043_v33 = vld [vmem:[%s6064_s3 + $0x288] sm:$0xff] }
 0x1cc   :  { %3153 = vmatpush.msra.mxu2 %v2996_v40  ;;  %3166 = vmatpush.msra.mxu0 %v3022_v31  ;;  %v2956_v40 = vsel %vm2924_vm8, %v2492_v23, %v2940_v61  ;;  %v3026_v31 = vld [vmem:[%s6064_s3 + $0x200] sm:$0xff]  ;;  %v2574_v21 = vadd.f32 %v5623_v30, %v2560_v41  ;;  %v2950_v38 = vsel %vm2918_vm9, %v2658_v22, %v2934_v17  ;;  %v2671_v30 = vpop.f32.mrf.mxu2  ;;  %v3068_v23 = vld [vmem:[%s6064_s3 + $0x350] sm:$0xff]  ;;  %vm3365_vm8 = vcmask 39936  }
 0x1cd   :  { %3194 = vmatpush.msrb.mxu3 %v3033_v10  ;;  %3132 = vmatpush.msra.mxu1 %v2978_v37  ;;  %v2534_v10 = vadd.f32 %v5611_v46, %v2520_v60  ;;  %v3011_v37 = vld [vmem:[%s6064_s3 + $0x188] sm:$0xff]  ;;  %v2685_v51 = vpop.f32.mrf.mxu0  ;;  %v3062_v17 = vld [vmem:[%s6064_s3 + $0x320] sm:$0xff] }
 0x1ce   :  { %3154 = vmatpush.msra.mxu2 %v2995_v57  ;;  %3167 = vmatpush.msra.mxu0 %v3021_v29  ;;  %v2659_v44 = vpop.f32.mrf.mxu1  ;;  %v3012_v57 = vld [vmem:[%s6064_s3 + $0x190] sm:$0xff]  ;;  %vm2917_vm10 = vcmp.gt.f32.partialorder %v2574_v21, 0.0 }
 0x1cf   :  { %3195 = vmatpush.msrb.mxu3 %v3032_v27  ;;  %3133 = vmatmul.f32.vlgmr.msra.gmra.mxu1 %v2947_v24  ;;  %v2660_v46 = vadd.f32 %v2659_v44, %v2646_v45  ;;  %v2548_v29 = vadd.f32 %v5642_v34, %v2534_v10  ;;  %v2933_v27 = vmul.f32 0.01, %v2574_v21  ;;  %v3070_v24 = vld [vmem:[%s6064_s3 + $0x360] sm:$0xff]  ;;  %v3060_v10 = vld [vmem:[%s6064_s3 + $0x310] sm:$0xff] }
 0x1d0   :  { %3155 = vmatpush.msra.mxu2 %v2994_v28  ;;  %3168 = vmatpush.msra.mxu0 %v3020_v25  ;;  %v499_v28 = vperm.slane %v5528_v53, 5  ;;  %v3050_v25 = vld [vmem:[%s6064_s3 + $0x2c0] sm:$0xff] }
 0x1d1   :  { %3156 = vmatmul.f32.vlgmr.msra.gmra.mxu2 %v2948_v50  ;;  %3196 = vmatpush.msrb.mxu3 %v3031_v32  ;;  %v2562_v34 = vadd.f32 %v5719_v43, %v2548_v29  ;;  %v2942_v12 = vmul.f32 0.01, %v2660_v46  ;;  %vm2926_vm11 = vcmp.gt.f32.partialorder %v2660_v46, 0.0  ;;  %v3049_v43 = vld [vmem:[%s6064_s3 + $0x2b8] sm:$0xff]  ;;  %v2949_v2 = vsel %vm2917_vm10, %v2574_v21, %v2933_v27  ;;  %v3059_v21 = vld [vmem:[%s6064_s3 + $0x308] sm:$0xff] }
 0x1d2   :  { %3169 = vmatpush.msra.mxu0 %v3019_v9  ;;  %3209 = vmatpush.msrb.mxu1 %v3057_v48  ;;  %v3069_v50 = vld [vmem:[%s6064_s3 + $0x358] sm:$0xff]  ;;  %v2672_v32 = vadd.f32 %v2671_v30, %v499_v28  ;;  %v3067_v48 = vld [vmem:[%s6064_s3 + $0x348] sm:$0xff] }
 0x1d3   :  { %3197 = vmatpush.msrb.mxu3 %v3030_v11  ;;  %3232 = vmatpush.msrb.mxu2 %v3073_v6  ;;  %v2576_v52 = vadd.f32 %v5692_v14, %v2562_v34  ;;  %v2958_v9 = vsel %vm2926_vm11, %v2660_v46, %v2942_v12  ;;  %v3047_v14 = vld [vmem:[%s6064_s3 + $0x2a8] sm:$0xff]  ;;  %v3089_v34 = vld [vmem:[%s6064_s3 + $0x3f8] sm:$0xff] }
 0x1d4   :  { %3170 = vmatpush.msra.mxu0 %v3018_v35  ;;  %3210 = vmatpush.msrb.mxu1 %v3056_v5  ;;  %v2673_v3 = vpop.f32.mrf.mxu2  ;;  %v2686_v11 = vadd.f32 %v2685_v51, %v2672_v32  ;;  %v2713_v35 = vpop.f32.mrf.mxu3  ;;  %v3046_v5 = vld [vmem:[%s6064_s3 + $0x2a0] sm:$0xff] }
 0x1d5   :  { %3198 = vmatpush.msrb.mxu3 %v3029_v1  ;;  %3233 = vmatpush.msrb.mxu2 %v3072_v47  ;;  %v2941_v56 = vmul.f32 0.01, %v2576_v52  ;;  %v2687_v59 = vpop.f32.mrf.mxu0  ;;  %vm2925_vm12 = vcmp.gt.f32.partialorder %v2576_v52, 0.0  ;;  %v3045_v1 = vld [vmem:[%s6064_s3 + $0x298] sm:$0xff]  ;;  %v2674_v22 = vadd.f32 %v2673_v3, %v499_v28  ;;  %v500_v47 = vperm.slane %v5528_v53, 6  ;;  %v3087_v53 = vld [vmem:[%s6064_s3 + $0x3e8] sm:$0xff] }
 0x1d6   :  { %3171 = vmatpush.msra.mxu0 %v3017_v26  ;;  %3211 = vmatpush.msrb.mxu1 %v3055_v0  ;;  %v2699_v4 = vpop.f32.mrf.mxu1  ;;  %v3065_v26 = vld [vmem:[%s6064_s3 + $0x338] sm:$0xff]  ;;  %v3064_v0 = vld [vmem:[%s6064_s3 + $0x330] sm:$0xff] }
 0x1d7   :  { %3199 = vmatpush.msrb.mxu3 %v3028_v19  ;;  %3136 = vmatmul.f32.gmra.mxu1 %v2955_v39  ;;  %v2700_v61 = vadd.f32 %v2699_v4, %v2686_v11  ;;  %v2957_v42 = vsel %vm2925_vm12, %v2576_v52, %v2941_v56  ;;  %v3063_v19 = vld [vmem:[%s6064_s3 + $0x328] sm:$0xff]  ;;  %v2688_v60 = vadd.f32 %v2687_v59, %v2674_v22  ;;  %v3085_v4 = vld [vmem:[%s6064_s3 + $0x3d8] sm:$0xff]  ;;  %v3084_v11 = vld [vmem:[%s6064_s3 + $0x3d0] sm:$0xff] }
 0x1d8   :  { %3172 = vmatpush.msra.mxu0 %v3016_v20  ;;  %3212 = vmatpush.msrb.mxu1 %v3054_v8  ;;  %v3061_v8 = vld [vmem:[%s6064_s3 + $0x318] sm:$0xff] }
 0x1d9   :  { %3159 = vmatmul.f32.gmra.mxu2 %v2956_v40  ;;  %3200 = vmatpush.msrb.mxu3 %v3027_v55  ;;  %v2714_v20 = vadd.f32 %v2713_v35, %v2700_v61  ;;  %v3083_v35 = vld [vmem:[%s6064_s3 + $0x3c8] sm:$0xff]  ;;  %v3081_v22 = vld [vmem:[%s6064_s3 + $0x3b8] sm:$0xff] }
 0x1da   :  { %3173 = vmatpush.msra.mxu0 %v3015_v16  ;;  %3213 = vmatpush.msrb.mxu1 %v3053_v13  ;;  %v3042_v16 = vld [vmem:[%s6064_s3 + $0x280] sm:$0xff] }
 0x1db   :  { %3201 = vmatpush.msrb.mxu3 %v3026_v31  ;;  %3234 = vmatpush.msrb.mxu2 %v3071_v62 }
 0x1dc   :  { %3174 = vmatpush.msra.mxu0 %v3014_v54  ;;  %3202 = vmatmul.f32.vlgmr.msrb.gmra.mxu3 %v2950_v38  ;;  %v2727_v55 = vpop.f32.mrf.mxu2  ;;  %v2715_v39 = vpop.f32.mrf.mxu3  ;;  %v3058_v38 = vld [vmem:[%s6064_s3 + $0x300] sm:$0xff] }
 0x1dd   :  { %3214 = vmatpush.msrb.mxu1 %v3052_v36  ;;  %3235 = vmatpush.msrb.mxu2 %v3070_v24  ;;  %v2728_v45 = vadd.f32 %v2727_v55, %v2714_v20  ;;  %v2741_v40 = vpop.f32.mrf.mxu0  ;;  %v3078_v20 = vld [vmem:[%s6064_s3 + $0x3a0] sm:$0xff]  ;;  %v3075_v55 = vld [vmem:[%s6064_s3 + $0x388] sm:$0xff] }
 0x1de   :  { %3175 = vmatpush.msra.mxu0 %v3013_v18  ;;  %v2701_v41 = vpop.f32.mrf.mxu1 }
 0x1df   :  { %3215 = vmatpush.msrb.mxu1 %v3051_v7  ;;  %3236 = vmatpush.msrb.mxu2 %v3069_v50  ;;  %v2702_v44 = vadd.f32 %v2701_v41, %v2688_v60  ;;  %v2742_v31 = vadd.f32 %v2741_v40, %v2728_v45  ;;  %v3077_v60 = vld [vmem:[%s6064_s3 + $0x398] sm:$0xff]  ;;  %v3076_v41 = vld [vmem:[%s6064_s3 + $0x390] sm:$0xff] }
 0x1e0   :  { %3176 = vmatpush.msra.mxu0 %v3012_v57 }
 0x1e1   :  { %3216 = vmatpush.msrb.mxu1 %v3050_v25  ;;  %3237 = vmatpush.msrb.mxu2 %v3068_v23  ;;  %vm2919_vm13 = vcmp.gt.f32.partialorder %v2742_v31, 0.0  ;;  %v2935_v54 = vmul.f32 0.01, %v2742_v31  ;;  %v2716_v13 = vadd.f32 %v2715_v39, %v2702_v44  ;;  %v5115_v39 = vld [vmem:[#allocation6] sm:$0xff] }
 0x1e2   :  { %3177 = vmatpush.msra.mxu0 %v3011_v37  ;;  %v501_v40 = vperm.slane %v5115_v39, 7 }
 0x1e3   :  { %3217 = vmatpush.msrb.mxu1 %v3049_v43  ;;  %3238 = vmatpush.msrb.mxu2 %v3067_v48  ;;  %v2951_v6 = vsel %vm2919_vm13, %v2742_v31, %v2935_v54  ;;  %v3088_v43 = vld [vmem:[%s6064_s3 + $0x3f0] sm:$0xff] }
 0x1e4   :  { %3178 = vmatpush.msra.mxu0 %v3010_v63  ;;  %3205 = vmatmul.f32.gmra.mxu3 %v2958_v9  ;;  %v2729_v18 = vpop.f32.mrf.mxu2  ;;  %v2769_v57 = vpop.f32.mrf.mxu3  ;;  %v3086_v9 = vld [vmem:[%s6064_s3 + $0x3e0] sm:$0xff] }
 0x1e5   :  { %3179 = vmatmul.f32.vlgmr.msra.gmra.mxu0 %v2949_v2  ;;  %3218 = vmatpush.msrb.mxu1 %v3048_v58  ;;  %v2730_v46 = vadd.f32 %v2729_v18, %v2716_v13  ;;  %v2743_v36 = vpop.f32.mrf.mxu0 }
 0x1e6   :  { %3239 = vmatpush.msrb.mxu2 %v3066_v15  ;;  %v2755_v29 = vpop.f32.mrf.mxu1  ;;  %3255 = vmatpush.msrb.mxu0 %v3089_v34  ;;  %v3082_v15 = vld [vmem:[%s6064_s3 + $0x3c0] sm:$0xff] }
 0x1e7   :  { %3219 = vmatpush.msrb.mxu1 %v3047_v14  ;;  %v2744_v30 = vadd.f32 %v2743_v36, %v2730_v46  ;;  %v2756_v27 = vadd.f32 %v2755_v29, %v500_v47 }
 0x1e8   :  { %3240 = vmatpush.msrb.mxu2 %v3065_v26  ;;  %3256 = vmatpush.msrb.mxu0 %v3088_v43  ;;  %v3286_v43 = vld [vmem:[#allocation9 + $0x10] sm:$0xff] }
 0x1e9   :  { %3220 = vmatpush.msrb.mxu1 %v3046_v5  ;;  %v2943_v7 = vmul.f32 0.01, %v2744_v30  ;;  %vm2927_vm14 = vcmp.gt.f32.partialorder %v2744_v30, 0.0  ;;  %v2770_v12 = vadd.f32 %v2769_v57, %v2756_v27 }
 0x1ea   :  { %3241 = vmatpush.msrb.mxu2 %v3064_v0  ;;  %3257 = vmatpush.msrb.mxu0 %v3087_v53  ;;  %v3080_v0 = vld [vmem:[%s6064_s3 + $0x3b0] sm:$0xff] }
 0x1eb   :  { %3221 = vmatpush.msrb.mxu1 %v3045_v1  ;;  %v2959_v62 = vsel %vm2927_vm14, %v2744_v30, %v2943_v7  ;;  %v3285_v53 = vld [vmem:[#allocation9 + $0x8] sm:$0xff] }
 0x1ec   :  { %3242 = vmatpush.msrb.mxu2 %v3063_v19  ;;  %v2771_v37 = vpop.f32.mrf.mxu3  ;;  %3258 = vmatpush.msrb.mxu0 %v3086_v9  ;;  %v5104_v9 = vld [vmem:[#allocation7] ss:$0 sm:$0xff] }
 0x1ed   :  { %3182 = vmatmul.f32.gmra.mxu0 %v2957_v42  ;;  %3222 = vmatpush.msrb.mxu1 %v3044_v49 }
 0x1ee   :  { %3243 = vmatpush.msrb.mxu2 %v3062_v17  ;;  %v2757_v28 = vpop.f32.mrf.mxu1  ;;  %3259 = vmatpush.msrb.mxu0 %v3085_v4  ;;  %v3330_v4 = vld [vmem:[%s6068_s7 + $0x10] sm:$0xff] }
 0x1ef   :  { %3223 = vmatpush.msrb.mxu1 %v3043_v33  ;;  %v2758_v24 = vadd.f32 %v2757_v28, %v500_v47  ;;  %v3079_v33 = vld [vmem:[%s6064_s3 + $0x3a8] sm:$0xff] }
 0x1f0   :  { %3244 = vmatpush.msrb.mxu2 %v3061_v8  ;;  %3260 = vmatpush.msrb.mxu0 %v3084_v11 }
 0x1f1   :  { %3224 = vmatpush.msrb.mxu1 %v3042_v16  ;;  %v2772_v50 = vadd.f32 %v2771_v37, %v2758_v24  ;;  %v3074_v16 = vld [vmem:[%s6064_s3 + $0x380] sm:$0xff] }
 0x1f2   :  { %3245 = vmatpush.msrb.mxu2 %v3060_v10  ;;  %3225 = vmatmul.f32.vlgmr.msrb.gmra.mxu1 %v2951_v6 }
 0x1f3   :  { %3261 = vmatpush.msrb.mxu0 %v3083_v35 }
 0x1f4   :  { %3246 = vmatpush.msrb.mxu2 %v3059_v21  ;;  %v2825_v52 = vpop.f32.mrf.mxu3 }
 0x1f5   :  { %v2783_v25 = vpop.f32.mrf.mxu0  ;;  %3262 = vmatpush.msrb.mxu0 %v3082_v15 }
 0x1f6   :  { %3247 = vmatpush.msrb.mxu2 %v3058_v38  ;;  %v2784_v63 = vadd.f32 %v2783_v25, %v2770_v12 }
 0x1f7   :  { %3263 = vmatpush.msrb.mxu0 %v3081_v22 }
 0x1f9   :  { %3264 = vmatpush.msrb.mxu0 %v3080_v0 }
 0x1fa   :  { %3228 = vmatmul.f32.gmra.mxu1 %v2959_v62 }
 0x1fb   :  { %3265 = vmatpush.msrb.mxu0 %v3079_v33 }
 0x1fc   :  { %v2827_v26 = vpop.f32.mrf.mxu3 }
 0x1fd   :  { %v2797_v51 = vpop.f32.mrf.mxu2  ;;  %v2785_v32 = vpop.f32.mrf.mxu0  ;;  %3266 = vmatpush.msrb.mxu0 %v3078_v20 }
 0x1fe   :  { %v2798_v2 = vadd.f32 %v2797_v51, %v2784_v63  ;;  %v2786_v3 = vadd.f32 %v2785_v32, %v2772_v50  ;;  %v3287_v51 = vld [vmem:[#allocation9 + $0x18] sm:$0xff] }
 0x1ff   :  { %3267 = vmatpush.msrb.mxu0 %v3077_v60  ;;  %3311 = vmatpush.msra.mxu3 %v3287_v51 }
 0x201   :  { %v2811_v58 = vpop.f32.mrf.mxu1  ;;  %3268 = vmatpush.msrb.mxu0 %v3076_v41  ;;  %3312 = vmatpush.msra.mxu3 %v3286_v43 }
 0x202   :  { %v2812_v23 = vadd.f32 %v2811_v58, %v2798_v2  ;;  %v3284_v2 = vld [vmem:[#allocation9] sm:$0xff] }
 0x203   :  { %3269 = vmatpush.msrb.mxu0 %v3075_v55  ;;  %3313 = vmatpush.msra.mxu3 %v3285_v53 }
 0x204   :  { %v2826_v14 = vadd.f32 %v2825_v52, %v2812_v23  ;;  %v3331_v23 = vld [vmem:[%s6068_s7 + $0x18] sm:$0xff] }
 0x205   :  { %v2799_v56 = vpop.f32.mrf.mxu2  ;;  %3270 = vmatpush.msrb.mxu0 %v3074_v16  ;;  %3314 = vmatpush.msra.mxu3 %v3284_v2 }
 0x206   :  { %vm2920_vm15 = vcmp.gt.f32.partialorder %v2826_v14, 0.0  ;;  %v2936_v48 = vmul.f32 0.01, %v2826_v14  ;;  %v2800_v59 = vadd.f32 %v2799_v56, %v2786_v3  ;;  %3354 = vmatpush.msra.mxu1 %v3331_v23 }
 0x208   :  { %v2952_v5 = vsel %vm2920_vm15, %v2826_v14, %v2936_v48  ;;  %v3329_v48 = vld [vmem:[%s6068_s7 + $0x8] sm:$0xff]  ;;  %3355 = vmatpush.msra.mxu1 %v3330_v4 }
 0x209   :  { %v2813_v1 = vpop.f32.mrf.mxu1  ;;  %3248 = vmatmul.f32.vlgmr.msrb.gmra.mxu2 %v2952_v5 }
 0x20a   :  { %v2814_v61 = vadd.f32 %v2813_v1, %v2800_v59  ;;  %3356 = vmatpush.msra.mxu1 %v3329_v48 }
 0x20c   :  { %v2828_v42 = vadd.f32 %v2827_v26, %v2814_v61 }
 0x20e   :  { %v2944_v49 = vmul.f32 0.01, %v2828_v42  ;;  %vm2928_vm0 = vcmp.gt.f32.partialorder %v2828_v42, 0.0 }
 0x210   :  { %v2960_v19 = vsel %vm2928_vm0, %v2828_v42, %v2944_v49 }
 0x211   :  { %3251 = vmatmul.f32.gmra.mxu2 %v2960_v19  ;;  %v2867_v44 = vpop.f32.mrf.mxu3 }
 0x219   :  { %v2869_v46 = vpop.f32.mrf.mxu3 }
 0x21a   :  { %v2839_v45 = vpop.f32.mrf.mxu0 }
 0x21b   :  { %v2840_v8 = vadd.f32 %v2839_v45, %v501_v40 }
 0x222   :  { %v2853_v17 = vpop.f32.mrf.mxu2  ;;  %v2841_v10 = vpop.f32.mrf.mxu0 }
 0x223   :  { %v2854_v54 = vadd.f32 %v2853_v17, %v2840_v8  ;;  %v2842_v21 = vadd.f32 %v2841_v10, %v501_v40 }
 0x225   :  { %v2868_v6 = vadd.f32 %v2867_v44, %v2854_v54 }
 0x229   :  { %v2881_v13 = vpop.f32.mrf.mxu1 }
 0x22a   :  { %v2855_v31 = vpop.f32.mrf.mxu2  ;;  %v2882_v18 = vadd.f32 %v2881_v13, %v2868_v6  ;;  %v3328_v6 = vld [vmem:[%s6068_s7] sm:$0xff] }
 0x22b   :  { %v2856_v38 = vadd.f32 %v2855_v31, %v2842_v21  ;;  %3357 = vmatpush.msra.mxu1 %v3328_v6  ;;  %v5105_v21 = vld [vmem:[#allocation10] ss:$0 sm:$0xff] }
 0x22d   :  { %v2870_v29 = vadd.f32 %v2869_v46, %v2856_v38 }
 0x231   :  { %v2883_v47 = vpop.f32.mrf.mxu1 }
 0x232   :  { %v2884_v27 = vadd.f32 %v2883_v47, %v2870_v29  ;;  %v5106_v47 = vld [vmem:[#allocation12] ss:$0 sm:$0xff] }
 0x234   :  { %v2909_v36 = vpop.f32.mrf.mxu2 }
 0x23c   :  { %v2911_v28 = vpop.f32.mrf.mxu2 }
 0x23d   :  { %v3111_v50 = vpop.f32.mrf.mxu3 }
 0x23e   :  { %v3112_v56 = vadd.f32 %v5104_v9, %v3111_v50 }
 0x242   :  { %v2895_v57 = vpop.f32.mrf.mxu0 }
 0x243   :  { %v2896_v30 = vadd.f32 %v2895_v57, %v2882_v18 }
 0x245   :  { %v2910_v7 = vadd.f32 %v2909_v36, %v2896_v30 }
 0x246   :  { %v3114_v3 = vpop.f32.mrf.mxu3 }
 0x247   :  { %vm2921_vm1 = vcmp.gt.f32.partialorder %v2910_v7, 0.0  ;;  %v2937_v62 = vmul.f32 0.01, %v2910_v7  ;;  %v3115_v61 = vadd.f32 %v5104_v9, %v3114_v3 }
 0x249   :  { %v2953_v37 = vsel %vm2921_vm1, %v2910_v7, %v2937_v62 }
 0x24a   :  { %v2897_v34 = vpop.f32.mrf.mxu0  ;;  %3271 = vmatmul.f32.vlgmr.msrb.gmra.mxu0 %v2953_v37 }
 0x24b   :  { %v2898_v12 = vadd.f32 %v2897_v34, %v2884_v27 }
 0x24c   :  { %v3134_v52 = vpop.f32.mrf.mxu1 }
 0x24d   :  { %v2912_v25 = vadd.f32 %v2911_v28, %v2898_v12  ;;  %v3135_v35 = vadd.f32 %v3134_v52, %v3112_v56 }
 0x24f   :  { %vm2929_vm2 = vcmp.gt.f32.partialorder %v2912_v25, 0.0  ;;  %v2945_v24 = vmul.f32 0.01, %v2912_v25 }
 0x251   :  { %v2961_v63 = vsel %vm2929_vm2, %v2912_v25, %v2945_v24 }
 0x252   :  { %3274 = vmatmul.f32.gmra.mxu0 %v2961_v63 }
 0x254   :  { %v3157_v32 = vpop.f32.mrf.mxu2  ;;  %v3137_v14 = vpop.f32.mrf.mxu1 }
 0x255   :  { %v3158_v59 = vadd.f32 %v3157_v32, %v3135_v35  ;;  %v3138_v42 = vadd.f32 %v3137_v14, %v3115_v61 }
 0x25c   :  { %v3160_v11 = vpop.f32.mrf.mxu2 }
 0x25d   :  { %v3161_v0 = vadd.f32 %v3160_v11, %v3138_v42 }
 0x25f   :  { %v3203_v5 = vpop.f32.mrf.mxu3 }
 0x262   :  { %v3180_v58 = vpop.f32.mrf.mxu0 }
 0x263   :  { %v3181_v15 = vadd.f32 %v3180_v58, %v3158_v59 }
 0x265   :  { %v3204_v49 = vadd.f32 %v3203_v5, %v3181_v15 }
 0x267   :  { %v3206_v55 = vpop.f32.mrf.mxu3 }
 0x26a   :  { %v3183_v1 = vpop.f32.mrf.mxu0 }
 0x26b   :  { %v3184_v19 = vadd.f32 %v3183_v1, %v3161_v0 }
 0x26d   :  { %v3207_v17 = vadd.f32 %v3206_v55, %v3184_v19 }
 0x26f   :  { %v3226_v26 = vpop.f32.mrf.mxu1 }
 0x270   :  { %v3227_v33 = vadd.f32 %v3226_v26, %v3204_v49 }
 0x277   :  { %v3229_v16 = vpop.f32.mrf.mxu1 }
 0x278   :  { %v3230_v40 = vadd.f32 %v3229_v16, %v3207_v17 }
 0x28c   :  { %v3249_v22 = vpop.f32.mrf.mxu2 }
 0x28d   :  { %v3250_v20 = vadd.f32 %v3249_v22, %v3227_v33 }
 0x294   :  { %v3252_v39 = vpop.f32.mrf.mxu2 }
 0x295   :  { %v3253_v44 = vadd.f32 %v3252_v39, %v3230_v40 }
 0x2c7   :  { %v3272_v60 = vpop.f32.mrf.mxu0 }
 0x2c8   :  { %v3273_v41 = vadd.f32 %v3272_v60, %v3250_v20 }
 0x2ca   :  { %vm3278_vm3 = vcmp.gt.f32.partialorder %v3273_v41, 0.0  ;;  %v3280_v45 = vmul.f32 0.01, %v3273_v41 }
 0x2cc   :  { %v3282_v8 = vsel %vm3278_vm3, %v3273_v41, %v3280_v45 }
 0x2cd   :  { %4750 = vmatmul.msk.f32.vlgmr.msra.gmra.mxu3 %vm3292_vm4, %v3282_v8 }
 0x2cf   :  { %v3275_v31 = vpop.f32.mrf.mxu0 }
 0x2d0   :  { %v3276_v54 = vadd.f32 %v3275_v31, %v3253_v44 }
 0x2d2   :  { %vm3279_vm5 = vcmp.gt.f32.partialorder %v3276_v54, 0.0  ;;  %v3281_v10 = vmul.f32 0.01, %v3276_v54 }
 0x2d4   :  { %v3283_v13 = vsel %vm3279_vm5, %v3276_v54, %v3281_v10 }
 0x2d5   :  { %4751 = vmatmul.msk.f32.gmra.mxu3 %vm3292_vm4, %v3283_v13 }
 0x350   :  { %v3316_v18 = vpop.f32.mrf.mxu3 }
 0x351   :  { %v3317_v38 = vadd.f32 %v5105_v21, %v3316_v18 }
 0x353   :  { %vm3322_vm6 = vcmp.gt.f32.partialorder %v3317_v38, 0.0  ;;  %v3324_v46 = vmul.f32 0.01, %v3317_v38 }
 0x355   :  { %v3326_v36 = vsel %vm3322_vm6, %v3317_v38, %v3324_v46 }
 0x356   :  { %4752 = vmatmul.msk.f32.vlgmr.msra.gmra.mxu1 %vm3292_vm4, %v3326_v36 }
 0x358   :  { %v3319_v57 = vpop.f32.mrf.mxu3 }
 0x359   :  { %v3320_v30 = vadd.f32 %v5105_v21, %v3319_v57 }
 0x35b   :  { %vm3323_vm7 = vcmp.gt.f32.partialorder %v3320_v30, 0.0  ;;  %v3325_v29 = vmul.f32 0.01, %v3320_v30 }
 0x35d   :  { %v3327_v7 = vsel %vm3323_vm7, %v3320_v30, %v3325_v29 }
 0x35e   :  { %4753 = vmatmul.msk.f32.gmra.mxu1 %vm3292_vm4, %v3327_v7 }
 0x3d3   :  { %v3359_v62 = vpop.f32.mrf.mxu1 }
 0x3d4   :  { %v3360_v27 = vadd.f32 %v5106_v47, %v3359_v62 }
 0x3d6   :  { %v3366_v37 = vsel %vm3365_vm8, %v3360_v27, -inf }
 0x3d7   :  { %3367 = vmax.xlane.f32.xlu0 %v3366_v37 }
 0x3db   :  { %v3362_v34 = vpop.f32.mrf.mxu1 }
 0x3dc   :  { %v3363_v12 = vadd.f32 %v5106_v47, %v3362_v34 }
 0x3de   :  { %v3369_v28 = vsel %vm3365_vm8, %v3363_v12, -inf }
 0x3df   :  { %3370 = vmax.xlane.f32.xlu0 %v3369_v28 }
 0x44a   :  { %v3368_v25 = vpop.xlane.xlu0 %3367 }
 0x44b   :  { %v3372_v24 = vsub.f32 %v3360_v27, %v3368_v25 }
 0x44d   :  { %v3374_v63 = vmul.f32 1.442695, %v3372_v24 }
 0x44f   :  { %5107 = vpow2.f32 %v3374_v63 }
 0x452   :  { %v3371_v51 = vpop.xlane.xlu0 %3370 }
 0x453   :  { %v3373_v43 = vsub.f32 %v3363_v12, %v3371_v51 }
 0x455   :  { %v5108_v53 = vpop.eup %5107  ;;  %v3376_v50 = vmul.f32 1.442695, %v3373_v43 }
 0x456   :  { %v3378_v2 = vsel %vm3365_vm8, %v5108_v53, 0.0 }
 0x457   :  { %5109 = vpow2.f32 %v3376_v50  ;;  %3379 = vadd.xlane.f32.xlu1 %v3378_v2 }
 0x45d   :  { %v5110_v52 = vpop.eup %5109 }
 0x45e   :  { %v3381_v32 = vsel %vm3365_vm8, %v5110_v52, 0.0 }
 0x45f   :  { %3382 = vadd.xlane.f32.xlu1 %v3381_v32 }
 0x4ca   :  { %v3380_v9 = vpop.xlane.xlu1 %3379 }
 0x4cb   :  { %5111 = vrcp.f32 %v3380_v9 }
 0x4d1   :  { %v5112_v58 = vpop.eup %5111 }
 0x4d2   :  { %v3386_v23 = vmul.f32 %v5112_v58, %v5108_v53  ;;  %v3383_v4 = vpop.xlane.xlu1 %3382 }
 0x4d3   :  { %5113 = vrcp.f32 %v3383_v4 }
 0x4d4   :  { %3388 = vst.msk [vmem:[%s6070_s9] sm:$0xff] %vm3365_vm8, %v3386_v23 }
 0x4d9   :  { %v5114_v3 = vpop.eup %5113 }
 0x4da   :  { %v3387_v14 = vmul.f32 %v5114_v3, %v5110_v52 }
 0x4dc   :  { %3389 = vst.msk [vmem:[%s6070_s9 + $0x8] sm:$0xff] %vm3365_vm8, %v3387_v14 }
 0x4dd   :  { %3394 = vsyncpa [#allocation3], 1 }
 0x4de   :  { %3395 = vsyncpa [#allocation5], 1 }
 0x4df   :  { %3396 = vsyncpa [#allocation8], 1 }
 0x4e0   :  { %3397 = vsyncpa [#allocation11], 1 }

</bundles_post_ra>
